<compile_context>
chip_gen: v7x
topology: tpu7x:2x2x1
jax: 0.10.0
libtpu: 0.0.40
codegen_flags: <defaults>
</compile_context>

<pallas_src>
import numpy as np
import jax
import jax.numpy as jnp
from jax.experimental import pallas as pl
from jax.experimental.pallas import tpu as pltpu

# Small shapes (original module uses 100x100 spatial; fc1 in-features = 8*H*W).
N, H, W = 2, 16, 16
C1, C2, C3 = 4, 8, 8
FC_IN = C3 * H * W          # 2048
FC_H = 500                  # logical hidden width (as in the module)
FC_HP = 512                 # padded hidden width (multiple of 128)
FC_OUT = 5                  # logical output width
FC_OUT_PAD = 128            # lane-dense padded output width
EPS = 1e-5
CNT = N * H * W             # per-branch BatchNorm population size


# ----------------------------- in-kernel helpers ------------------------------------

def _reflect_pad_packed(t, c):
    # ReflectionPad2d(1) on a lane-packed (2, N, H, W*c) activation (lanes = (w, c)):
    # row -1 mirrors row 1, row H mirrors row H-2 (no edge repeat); same along w.
    top = t[:, :, 1:2, :]
    bot = t[:, :, H - 2:H - 1, :]
    t = jnp.concatenate([top, t, bot], axis=2)               # (2, N, H+2, W*c)
    left = t[..., c:2 * c]
    right = t[..., (W - 2) * c:(W - 1) * c]
    return jnp.concatenate([left, t, right], axis=-1)        # (2, N, H+2, (W+2)*c)


def _relu_bn_packed(y, gavg_ref, g_ref, be_ref):
    # y: (2*N*H, W*c) conv+bias output, lanes packed (w, c) with c fastest.
    # ReLU, then BatchNorm2d with training-mode statistics computed PER BRANCH
    # (matching two separate forward_once() calls), biased variance.
    # gavg: (W*c, W*c) matrix that averages the W lane-copies of each channel and
    # broadcasts the result back to every w slot -> per-channel stats via two tiny
    # MXU dots, keeping everything full-lane on the VPU.
    wc = y.shape[-1]
    y = jnp.maximum(y, 0.0)
    yb = y.reshape(2, N * H, wc)
    s = jnp.sum(yb, axis=1)                                   # (2, W*c)
    mean_l = jnp.dot(s, gavg_ref[...], preferred_element_type=jnp.float32)
    d = yb - mean_l[:, None, :]
    v = jnp.sum(d * d, axis=1)                                # (2, W*c)
    var_l = jnp.maximum(
        jnp.dot(v, gavg_ref[...], preferred_element_type=jnp.float32), 0.0)
    rstd_l = jax.lax.rsqrt(var_l + EPS)
    scale_l = g_ref[...] * rstd_l                             # (2, W*c)
    shift_l = be_ref[...] - mean_l * scale_l                  # (2, W*c)
    return yb * scale_l[:, None, :] + shift_l[:, None, :]     # (2, N*H, W*c)


def _conv_relu_bn(t, cin, cout, ct_ref, cb_ref, gavg_ref, g_ref, be_ref):
    # ReflectionPad2d(1) + Conv3x3 + ReLU + BatchNorm2d on lane-packed activations.
    # The conv is 3 accumulated MXU matmuls (one per kernel row dy) against a
    # block-Toeplitz weight ((W+2)*cin, W*cout) built host-side: the dx taps never
    # need a lane-axis im2col concat and the output is already lane-dense.
    tp = _reflect_pad_packed(t, cin)                          # (2, N, H+2, (W+2)*cin)
    acc = jnp.zeros((2 * N * H, W * cout), jnp.float32)
    for dy in range(3):
        lhs = tp[:, :, dy:dy + H, :].reshape(2 * N * H, (W + 2) * cin)
        acc = acc + jnp.dot(lhs, ct_ref[dy], preferred_element_type=jnp.float32)
    y = acc + cb_ref[...]                                     # bias pre-tiled (1, W*cout)
    yn = _relu_bn_packed(y, gavg_ref, g_ref, be_ref)          # (2, N*H, W*cout)
    return yn.reshape(2, N, H, W * cout)


# ----------------------------- the fused kernel -------------------------------------

def siamese_fused_kernel(
    x1_ref, x2_ref,                                           # (N, H, W) f32 each
    ct1_ref, cb1_ref, g1_ref, be1_ref,
    ct2_ref, cb2_ref, g2_ref, be2_ref,
    ct3_ref, cb3_ref, g3_ref, be3_ref,
    gavg1_ref, gavg8_ref,
    fb1_ref, fb2_ref, fb3_ref,
    fw1_hbm, fw2_hbm, fw3_hbm,                                # bf16 FC weights, in HBM
    out_ref,                                                  # (2*N, FC_OUT_PAD) f32
    fw1_v, fw2_v, fw3_v, dma_sem,                             # scratch
):
    # Kick off the big FC weight DMAs (HBM->VMEM) immediately so they overlap the
    # conv/BN stage; wait right before each corresponding dot.
    cp1 = pltpu.make_async_copy(fw1_hbm, fw1_v, dma_sem.at[0]); cp1.start()
    cp2 = pltpu.make_async_copy(fw2_hbm, fw2_v, dma_sem.at[1]); cp2.start()
    cp3 = pltpu.make_async_copy(fw3_hbm, fw3_v, dma_sem.at[2]); cp3.start()

    # Stack both Siamese branches into one (2, N, H, W) batch (Cin = 1, lanes = w).
    x = jnp.stack([x1_ref[...], x2_ref[...]], axis=0)

    f1 = _conv_relu_bn(x, 1, C1, ct1_ref, cb1_ref, gavg1_ref, g1_ref, be1_ref)
    f2 = _conv_relu_bn(f1, C1, C2, ct2_ref, cb2_ref, gavg8_ref, g2_ref, be2_ref)
    f3 = _conv_relu_bn(f2, C2, C3, ct3_ref, cb3_ref, gavg8_ref, g3_ref, be3_ref)

    # Flatten in (h, w, c) order; the fc1 weight rows were permuted host-side so this
    # matches PyTorch's NCHW .view(N, -1) exactly.  With the lane-dense layout this is
    # a cheap (4,16,128)->(4,2048) relayout.
    flat = f3.reshape(2 * N, FC_IN).astype(jnp.bfloat16)      # (2N, 2048) bf16

    # FC stack: bf16 activations x bf16 weights straight on the MXU, f32 accumulate.
    cp1.wait()
    h = jnp.dot(flat, fw1_v[...], preferred_element_type=jnp.float32) + fb1_ref[...]
    h = jnp.maximum(h, 0.0).astype(jnp.bfloat16)
    cp2.wait()
    h = jnp.dot(h, fw2_v[...], preferred_element_type=jnp.float32) + fb2_ref[...]
    h = jnp.maximum(h, 0.0).astype(jnp.bfloat16)
    cp3.wait()
    out_ref[...] = jnp.dot(h, fw3_v[...], preferred_element_type=jnp.float32) + fb3_ref[...]


# ----------------------------- host-side parameter prep -----------------------------

def _make_toeplitz(conv_w_hwio):
    # (3, 3, cin, cout) HWIO conv weight -> (3, (W+2)*cin, W*cout) per-dy block-Toeplitz
    # matrices: wt[dy, (w_out+dx)*cin + ci, w_out*cout + co] = conv_w[dy, dx, ci, co].
    _, _, cin, cout = conv_w_hwio.shape
    w_np = np.asarray(conv_w_hwio)
    wt = np.zeros((3, (W + 2) * cin, W * cout), np.float32)
    for dy in range(3):
        for w_out in range(W):
            for dx in range(3):
                w_in = w_out + dx
                wt[dy, w_in * cin:(w_in + 1) * cin,
                   w_out * cout:(w_out + 1) * cout] = w_np[dy, dx]
    return jnp.asarray(wt)


def _make_group_avg(c):
    # (W*c, W*c): averages the W lane-copies of each channel and broadcasts back.
    wc = W * c
    idx = np.arange(wc)
    m = (idx[:, None] % c == idx[None, :] % c).astype(np.float32) / float(CNT)
    return jnp.asarray(m)


def _tile_w(v):
    # (C,) per-channel vector -> (1, W*C) lane-packed (w, c) tiling.
    return jnp.tile(jnp.asarray(v, jnp.float32)[None, :], (1, W))


def init_params(key):
    ks = jax.random.split(key, 12)

    def rnd(k, shape, scale=0.1):
        return (scale * jax.random.normal(k, shape)).astype(jnp.float32)

    # Conv weights in HWIO, turned into per-dy block-Toeplitz matrices host-side.
    conv1_w = rnd(ks[0], (3, 3, 1, C1));  conv1_b = rnd(ks[1], (C1,))
    conv2_w = rnd(ks[2], (3, 3, C1, C2)); conv2_b = rnd(ks[3], (C2,))
    conv3_w = rnd(ks[4], (3, 3, C2, C3)); conv3_b = rnd(ks[5], (C3,))

    ct1, ct2, ct3 = map(_make_toeplitz, (conv1_w, conv2_w, conv3_w))
    cb1, cb2, cb3 = map(_tile_w, (conv1_b, conv2_b, conv3_b))

    # BatchNorm2d defaults (weight=1, bias=0), pre-tiled along w.
    g1, be1 = _tile_w(np.ones(C1)), _tile_w(np.zeros(C1))
    g2, be2 = _tile_w(np.ones(C2)), _tile_w(np.zeros(C2))
    g3, be3 = _tile_w(np.ones(C3)), _tile_w(np.zeros(C3))

    gavg1 = _make_group_avg(C1)          # (64, 64)
    gavg8 = _make_group_avg(C3)          # (128, 128), shared by conv2/conv3

    # fc1 weight generated in PyTorch (in, out) layout with rows in NCHW-flatten
    # (c, h, w) order, permuted once host-side to the kernel's (h, w, c) flatten order,
    # zero-padded 500 -> 512 cols, stored/streamed as bf16.  Pads must stay exactly zero.
    fc1_w_chw = rnd(ks[6], (FC_IN, FC_H), scale=0.02)
    fc1_w = (fc1_w_chw.reshape(C3, H, W, FC_H)
             .transpose(1, 2, 0, 3)
             .reshape(FC_IN, FC_H))
    fw1 = jnp.pad(fc1_w, ((0, 0), (0, FC_HP - FC_H))).astype(jnp.bfloat16)
    fb1 = jnp.pad(rnd(ks[7], (1, FC_H)), ((0, 0), (0, FC_HP - FC_H)))

    fw2 = jnp.pad(rnd(ks[8], (FC_H, FC_H), scale=0.02),
                  ((0, FC_HP - FC_H), (0, FC_HP - FC_H))).astype(jnp.bfloat16)
    fb2 = jnp.pad(rnd(ks[9], (1, FC_H)), ((0, 0), (0, FC_HP - FC_H)))

    fw3 = jnp.pad(rnd(ks[10], (FC_H, FC_OUT), scale=0.02),
                  ((0, FC_HP - FC_H), (0, FC_OUT_PAD - FC_OUT))).astype(jnp.bfloat16)
    fb3 = jnp.pad(rnd(ks[11], (1, FC_OUT)), ((0, 0), (0, FC_OUT_PAD - FC_OUT)))

    return (ct1, cb1, g1, be1,
            ct2, cb2, g2, be2,
            ct3, cb3, g3, be3,
            gavg1, gavg8,
            fb1, fb2, fb3,
            fw1, fw2, fw3)


# ----------------------------- wrapper ----------------------------------------------

_CONV_FLOPS = sum(3 * 2 * (2 * N * H) * ((W + 2) * cin) * (W * cout)
                  for cin, cout in ((1, C1), (C1, C2), (C2, C3)))
_FC_FLOPS = 2 * (2 * N) * (FC_IN * FC_HP + FC_HP * FC_HP + FC_HP * FC_OUT_PAD)
_FLOPS = int(_CONV_FLOPS + _FC_FLOPS)
_BYTES = int(2 * (FC_IN * FC_HP + FC_HP * FC_HP + FC_HP * FC_OUT_PAD)          # bf16 FC w
             + 4 * 3 * ((W + 2) * 1 * W * C1 + (W + 2) * C1 * W * C2
                        + (W + 2) * C2 * W * C3)                               # conv Toeplitz
             + 4 * ((W * C1) ** 2 + (W * C3) ** 2)                             # group-avg mats
             + 4 * (2 * N * H * W) + 4 * (2 * N * FC_OUT_PAD))                 # acts in/out
_TRANS = int(2 * (W * C1 + 2 * W * C3))                                        # rsqrt lanes

_N_VMEM_IN = 2 + 12 + 2 + 3   # x1,x2 + conv/bn params + group-avg mats + fc biases


@jax.jit
def siamese_forward(input1, input2, params):
    # Both branches fused into one launch: weights are shared, so the ~2.75 MB of bf16
    # FC weights cross HBM->VMEM once, overlapped with the conv stage.
    x1 = input1.reshape(N, H, W).astype(jnp.float32)
    x2 = input2.reshape(N, H, W).astype(jnp.float32)
    out = pl.pallas_call(
        siamese_fused_kernel,
        out_shape=jax.ShapeDtypeStruct((2 * N, FC_OUT_PAD), jnp.float32),
        in_specs=([pl.BlockSpec(memory_space=pltpu.MemorySpace.VMEM)] * _N_VMEM_IN
                  + [pl.BlockSpec(memory_space=pl.ANY)] * 3),
        out_specs=pl.BlockSpec(memory_space=pltpu.MemorySpace.VMEM),
        scratch_shapes=[
            pltpu.VMEM((FC_IN, FC_HP), jnp.bfloat16),
            pltpu.VMEM((FC_HP, FC_HP), jnp.bfloat16),
            pltpu.VMEM((FC_HP, FC_OUT_PAD), jnp.bfloat16),
            pltpu.SemaphoreType.DMA((3,)),
        ],
        compiler_params=pltpu.CompilerParams(vmem_limit_bytes=32 * 1024 * 1024),
        cost_estimate=pl.CostEstimate(flops=_FLOPS, transcendentals=_TRANS,
                                      bytes_accessed=_BYTES),
    )(x1, x2, *params)
    out = out[:, :FC_OUT]                                          # drop lane padding
    return out[:N], out[N:]                                        # branch1, branch2


if __name__ == "__main__":
    key = jax.random.PRNGKey(0)
    k_params, k_x1, k_x2 = jax.random.split(key, 3)
    params = init_params(k_params)

    input1 = jax.random.normal(k_x1, (N, 1, H, W), dtype=jnp.float32)
    input2 = jax.random.normal(k_x2, (N, 1, H, W), dtype=jnp.float32)

    out1, out2 = siamese_forward(input1, input2, params)
    jax.block_until_ready((out1, out2))
    assert out1.shape == (N, FC_OUT) and out2.shape == (N, FC_OUT)
    print("KERNEL_OK")
</pallas_src>

<mosaic_0001>
module attributes {stable_mosaic.version = 11 : i64} {
  func.func @siamese_fused_kernel(%arg0: memref<2x16x16xf32, #tpu.memory_space<vmem>>, %arg1: memref<2x16x16xf32, #tpu.memory_space<vmem>>, %arg2: memref<3x18x64xf32, #tpu.memory_space<vmem>>, %arg3: memref<1x64xf32, #tpu.memory_space<vmem>>, %arg4: memref<1x64xf32, #tpu.memory_space<vmem>>, %arg5: memref<1x64xf32, #tpu.memory_space<vmem>>, %arg6: memref<3x72x128xf32, #tpu.memory_space<vmem>>, %arg7: memref<1x128xf32, #tpu.memory_space<vmem>>, %arg8: memref<1x128xf32, #tpu.memory_space<vmem>>, %arg9: memref<1x128xf32, #tpu.memory_space<vmem>>, %arg10: memref<3x144x128xf32, #tpu.memory_space<vmem>>, %arg11: memref<1x128xf32, #tpu.memory_space<vmem>>, %arg12: memref<1x128xf32, #tpu.memory_space<vmem>>, %arg13: memref<1x128xf32, #tpu.memory_space<vmem>>, %arg14: memref<64x64xf32, #tpu.memory_space<vmem>>, %arg15: memref<128x128xf32, #tpu.memory_space<vmem>>, %arg16: memref<1x512xf32, #tpu.memory_space<vmem>>, %arg17: memref<1x512xf32, #tpu.memory_space<vmem>>, %arg18: memref<1x128xf32, #tpu.memory_space<vmem>>, %arg19: memref<2048x512xbf16, #tpu.memory_space<any>>, %arg20: memref<512x512xbf16, #tpu.memory_space<any>>, %arg21: memref<512x128xbf16, #tpu.memory_space<any>>, %arg22: memref<4x128xf32, #tpu.memory_space<vmem>>, %arg23: memref<2048x512xbf16, #tpu.memory_space<vmem>>, %arg24: memref<512x512xbf16, #tpu.memory_space<vmem>>, %arg25: memref<512x128xbf16, #tpu.memory_space<vmem>>, %arg26: memref<3x!tpu.dma_semaphore, #tpu.memory_space<semaphore_mem>>) attributes {dimension_semantics = [], scalar_prefetch = 0 : i64, scratch_operands = 4 : i64, tpu.core_type = #tpu.core_type<tc>} {
    %c0_i32 = arith.constant 0 : i32
    %0 = tpu.memref_slice %arg26[%c0_i32] : memref<3x!tpu.dma_semaphore, #tpu.memory_space<semaphore_mem>> -> memref<1x!tpu.dma_semaphore, #tpu.memory_space<semaphore_mem>>
    %1 = tpu.memref_squeeze %0 : memref<1x!tpu.dma_semaphore, #tpu.memory_space<semaphore_mem>> -> memref<!tpu.dma_semaphore, #tpu.memory_space<semaphore_mem>>
    tpu.enqueue_dma source(%arg19 : memref<2048x512xbf16, #tpu.memory_space<any>>) target(%arg23 : memref<2048x512xbf16, #tpu.memory_space<vmem>>) target_semaphore(%1 : memref<!tpu.dma_semaphore, #tpu.memory_space<semaphore_mem>>)
    %c1_i32 = arith.constant 1 : i32
    %2 = tpu.memref_slice %arg26[%c1_i32] : memref<3x!tpu.dma_semaphore, #tpu.memory_space<semaphore_mem>> -> memref<1x!tpu.dma_semaphore, #tpu.memory_space<semaphore_mem>>
    %3 = tpu.memref_squeeze %2 : memref<1x!tpu.dma_semaphore, #tpu.memory_space<semaphore_mem>> -> memref<!tpu.dma_semaphore, #tpu.memory_space<semaphore_mem>>
    tpu.enqueue_dma source(%arg20 : memref<512x512xbf16, #tpu.memory_space<any>>) target(%arg24 : memref<512x512xbf16, #tpu.memory_space<vmem>>) target_semaphore(%3 : memref<!tpu.dma_semaphore, #tpu.memory_space<semaphore_mem>>)
    %c2_i32 = arith.constant 2 : i32
    %4 = tpu.memref_slice %arg26[%c2_i32] : memref<3x!tpu.dma_semaphore, #tpu.memory_space<semaphore_mem>> -> memref<1x!tpu.dma_semaphore, #tpu.memory_space<semaphore_mem>>
    %5 = tpu.memref_squeeze %4 : memref<1x!tpu.dma_semaphore, #tpu.memory_space<semaphore_mem>> -> memref<!tpu.dma_semaphore, #tpu.memory_space<semaphore_mem>>
    tpu.enqueue_dma source(%arg21 : memref<512x128xbf16, #tpu.memory_space<any>>) target(%arg25 : memref<512x128xbf16, #tpu.memory_space<vmem>>) target_semaphore(%5 : memref<!tpu.dma_semaphore, #tpu.memory_space<semaphore_mem>>)
    %c0 = arith.constant 0 : index
    %c0_0 = arith.constant 0 : index
    %c0_1 = arith.constant 0 : index
    %6 = vector.load %arg0[%c0, %c0_0, %c0_1] : memref<2x16x16xf32, #tpu.memory_space<vmem>>, vector<2x16x16xf32>
    %c0_2 = arith.constant 0 : index
    %c0_3 = arith.constant 0 : index
    %c0_4 = arith.constant 0 : index
    %7 = vector.load %arg1[%c0_2, %c0_3, %c0_4] : memref<2x16x16xf32, #tpu.memory_space<vmem>>, vector<2x16x16xf32>
    %8 = vector.shape_cast %6 : vector<2x16x16xf32> to vector<1x2x16x16xf32>
    %9 = vector.shape_cast %7 : vector<2x16x16xf32> to vector<1x2x16x16xf32>
    %10 = tpu.concatenate %8, %9 in 0 : vector<1x2x16x16xf32>, vector<1x2x16x16xf32> -> vector<2x2x16x16xf32>
    %11 = vector.extract_strided_slice %10 {offsets = [0, 0, 1, 0], sizes = [2, 2, 1, 16], strides = [1, 1, 1, 1]} : vector<2x2x16x16xf32> to vector<2x2x1x16xf32>
    %12 = vector.extract_strided_slice %10 {offsets = [0, 0, 14, 0], sizes = [2, 2, 1, 16], strides = [1, 1, 1, 1]} : vector<2x2x16x16xf32> to vector<2x2x1x16xf32>
    %13 = tpu.concatenate %11, %10, %12 in 2 : vector<2x2x1x16xf32>, vector<2x2x16x16xf32>, vector<2x2x1x16xf32> -> vector<2x2x18x16xf32>
    %14 = vector.extract_strided_slice %13 {offsets = [0, 0, 0, 1], sizes = [2, 2, 18, 1], strides = [1, 1, 1, 1]} : vector<2x2x18x16xf32> to vector<2x2x18x1xf32>
    %15 = vector.extract_strided_slice %13 {offsets = [0, 0, 0, 14], sizes = [2, 2, 18, 1], strides = [1, 1, 1, 1]} : vector<2x2x18x16xf32> to vector<2x2x18x1xf32>
    %16 = tpu.concatenate %14, %13, %15 in 3 : vector<2x2x18x1xf32>, vector<2x2x18x16xf32>, vector<2x2x18x1xf32> -> vector<2x2x18x18xf32>
    %cst = arith.constant 0.000000e+00 : f32
    %17 = vector.broadcast %cst : f32 to vector<64x64xf32>
    %18 = vector.extract_strided_slice %16 {offsets = [0, 0, 0, 0], sizes = [2, 2, 16, 18], strides = [1, 1, 1, 1]} : vector<2x2x18x18xf32> to vector<2x2x16x18xf32>
    %19 = vector.shape_cast %18 : vector<2x2x16x18xf32> to vector<64x18xf32>
    %c0_5 = arith.constant 0 : index
    %c0_6 = arith.constant 0 : index
    %c0_7 = arith.constant 0 : index
    %20 = vector.load %arg2[%c0_5, %c0_6, %c0_7] : memref<3x18x64xf32, #tpu.memory_space<vmem>>, vector<1x18x64xf32>
    %21 = vector.shape_cast %20 : vector<1x18x64xf32> to vector<18x64xf32>
    %cst_8 = arith.constant dense<0.000000e+00> : vector<64x64xf32>
    %22 = tpu.matmul %19, %21, %cst_8 {dimension_numbers = #tpu.dot_dimension_numbers<[1], [0], [0], [1], [0, 0, 1, 1], [], []>} : vector<64x18xf32>, vector<18x64xf32>, vector<64x64xf32> -> vector<64x64xf32>
    %23 = arith.addf %17, %22 : vector<64x64xf32>
    %24 = vector.extract_strided_slice %16 {offsets = [0, 0, 1, 0], sizes = [2, 2, 16, 18], strides = [1, 1, 1, 1]} : vector<2x2x18x18xf32> to vector<2x2x16x18xf32>
    %25 = vector.shape_cast %24 : vector<2x2x16x18xf32> to vector<64x18xf32>
    %c1 = arith.constant 1 : index
    %c0_9 = arith.constant 0 : index
    %c0_10 = arith.constant 0 : index
    %26 = vector.load %arg2[%c1, %c0_9, %c0_10] : memref<3x18x64xf32, #tpu.memory_space<vmem>>, vector<1x18x64xf32>
    %27 = vector.shape_cast %26 : vector<1x18x64xf32> to vector<18x64xf32>
    %cst_11 = arith.constant dense<0.000000e+00> : vector<64x64xf32>
    %28 = tpu.matmul %25, %27, %cst_11 {dimension_numbers = #tpu.dot_dimension_numbers<[1], [0], [0], [1], [0, 0, 1, 1], [], []>} : vector<64x18xf32>, vector<18x64xf32>, vector<64x64xf32> -> vector<64x64xf32>
    %29 = arith.addf %23, %28 : vector<64x64xf32>
    %30 = vector.extract_strided_slice %16 {offsets = [0, 0, 2, 0], sizes = [2, 2, 16, 18], strides = [1, 1, 1, 1]} : vector<2x2x18x18xf32> to vector<2x2x16x18xf32>
    %31 = vector.shape_cast %30 : vector<2x2x16x18xf32> to vector<64x18xf32>
    %c2 = arith.constant 2 : index
    %c0_12 = arith.constant 0 : index
    %c0_13 = arith.constant 0 : index
    %32 = vector.load %arg2[%c2, %c0_12, %c0_13] : memref<3x18x64xf32, #tpu.memory_space<vmem>>, vector<1x18x64xf32>
    %33 = vector.shape_cast %32 : vector<1x18x64xf32> to vector<18x64xf32>
    %cst_14 = arith.constant dense<0.000000e+00> : vector<64x64xf32>
    %34 = tpu.matmul %31, %33, %cst_14 {dimension_numbers = #tpu.dot_dimension_numbers<[1], [0], [0], [1], [0, 0, 1, 1], [], []>} : vector<64x18xf32>, vector<18x64xf32>, vector<64x64xf32> -> vector<64x64xf32>
    %35 = arith.addf %29, %34 : vector<64x64xf32>
    %c0_15 = arith.constant 0 : index
    %c0_16 = arith.constant 0 : index
    %36 = vector.load %arg3[%c0_15, %c0_16] : memref<1x64xf32, #tpu.memory_space<vmem>>, vector<1x64xf32>
    %37 = vector.broadcast %36 : vector<1x64xf32> to vector<64x64xf32>
    %38 = arith.addf %35, %37 : vector<64x64xf32>
    %cst_17 = arith.constant 0.000000e+00 : f32
    %39 = vector.broadcast %cst_17 : f32 to vector<64x64xf32>
    %40 = arith.maximumf %38, %39 : vector<64x64xf32>
    %41 = vector.shape_cast %40 : vector<64x64xf32> to vector<2x32x64xf32>
    %cst_18 = arith.constant dense<0.000000e+00> : vector<2x64xf32>
    %42 = vector.multi_reduction <add>, %41, %cst_18 [1] : vector<2x32x64xf32> to vector<2x64xf32>
    %c0_19 = arith.constant 0 : index
    %c0_20 = arith.constant 0 : index
    %43 = vector.load %arg14[%c0_19, %c0_20] : memref<64x64xf32, #tpu.memory_space<vmem>>, vector<64x64xf32>
    %cst_21 = arith.constant dense<0.000000e+00> : vector<2x64xf32>
    %44 = tpu.matmul %42, %43, %cst_21 {dimension_numbers = #tpu.dot_dimension_numbers<[1], [0], [0], [1], [0, 0, 1, 1], [], []>} : vector<2x64xf32>, vector<64x64xf32>, vector<2x64xf32> -> vector<2x64xf32>
    %45 = vector.shape_cast %44 : vector<2x64xf32> to vector<2x1x64xf32>
    %46 = vector.broadcast %45 : vector<2x1x64xf32> to vector<2x32x64xf32>
    %47 = arith.subf %41, %46 : vector<2x32x64xf32>
    %48 = arith.mulf %47, %47 : vector<2x32x64xf32>
    %cst_22 = arith.constant dense<0.000000e+00> : vector<2x64xf32>
    %49 = vector.multi_reduction <add>, %48, %cst_22 [1] : vector<2x32x64xf32> to vector<2x64xf32>
    %c0_23 = arith.constant 0 : index
    %c0_24 = arith.constant 0 : index
    %50 = vector.load %arg14[%c0_23, %c0_24] : memref<64x64xf32, #tpu.memory_space<vmem>>, vector<64x64xf32>
    %cst_25 = arith.constant dense<0.000000e+00> : vector<2x64xf32>
    %51 = tpu.matmul %49, %50, %cst_25 {dimension_numbers = #tpu.dot_dimension_numbers<[1], [0], [0], [1], [0, 0, 1, 1], [], []>} : vector<2x64xf32>, vector<64x64xf32>, vector<2x64xf32> -> vector<2x64xf32>
    %cst_26 = arith.constant 0.000000e+00 : f32
    %52 = vector.broadcast %cst_26 : f32 to vector<2x64xf32>
    %53 = arith.maximumf %51, %52 : vector<2x64xf32>
    %cst_27 = arith.constant 9.99999974E-6 : f32
    %54 = vector.broadcast %cst_27 : f32 to vector<2x64xf32>
    %55 = arith.addf %53, %54 : vector<2x64xf32>
    %56 = math.rsqrt %55 : vector<2x64xf32>
    %c0_28 = arith.constant 0 : index
    %c0_29 = arith.constant 0 : index
    %57 = vector.load %arg4[%c0_28, %c0_29] : memref<1x64xf32, #tpu.memory_space<vmem>>, vector<1x64xf32>
    %58 = vector.broadcast %57 : vector<1x64xf32> to vector<2x64xf32>
    %59 = arith.mulf %58, %56 : vector<2x64xf32>
    %c0_30 = arith.constant 0 : index
    %c0_31 = arith.constant 0 : index
    %60 = vector.load %arg5[%c0_30, %c0_31] : memref<1x64xf32, #tpu.memory_space<vmem>>, vector<1x64xf32>
    %61 = arith.mulf %44, %59 : vector<2x64xf32>
    %62 = vector.broadcast %60 : vector<1x64xf32> to vector<2x64xf32>
    %63 = arith.subf %62, %61 : vector<2x64xf32>
    %64 = vector.shape_cast %59 : vector<2x64xf32> to vector<2x1x64xf32>
    %65 = vector.broadcast %64 : vector<2x1x64xf32> to vector<2x32x64xf32>
    %66 = arith.mulf %41, %65 : vector<2x32x64xf32>
    %67 = vector.shape_cast %63 : vector<2x64xf32> to vector<2x1x64xf32>
    %68 = vector.broadcast %67 : vector<2x1x64xf32> to vector<2x32x64xf32>
    %69 = arith.addf %66, %68 : vector<2x32x64xf32>
    %70 = vector.shape_cast %69 : vector<2x32x64xf32> to vector<2x2x16x64xf32>
    %71 = vector.extract_strided_slice %70 {offsets = [0, 0, 1, 0], sizes = [2, 2, 1, 64], strides = [1, 1, 1, 1]} : vector<2x2x16x64xf32> to vector<2x2x1x64xf32>
    %72 = vector.extract_strided_slice %70 {offsets = [0, 0, 14, 0], sizes = [2, 2, 1, 64], strides = [1, 1, 1, 1]} : vector<2x2x16x64xf32> to vector<2x2x1x64xf32>
    %73 = tpu.concatenate %71, %70, %72 in 2 : vector<2x2x1x64xf32>, vector<2x2x16x64xf32>, vector<2x2x1x64xf32> -> vector<2x2x18x64xf32>
    %74 = vector.extract_strided_slice %73 {offsets = [0, 0, 0, 4], sizes = [2, 2, 18, 4], strides = [1, 1, 1, 1]} : vector<2x2x18x64xf32> to vector<2x2x18x4xf32>
    %75 = vector.extract_strided_slice %73 {offsets = [0, 0, 0, 56], sizes = [2, 2, 18, 4], strides = [1, 1, 1, 1]} : vector<2x2x18x64xf32> to vector<2x2x18x4xf32>
    %76 = tpu.concatenate %74, %73, %75 in 3 : vector<2x2x18x4xf32>, vector<2x2x18x64xf32>, vector<2x2x18x4xf32> -> vector<2x2x18x72xf32>
    %cst_32 = arith.constant 0.000000e+00 : f32
    %77 = vector.broadcast %cst_32 : f32 to vector<64x128xf32>
    %78 = vector.extract_strided_slice %76 {offsets = [0, 0, 0, 0], sizes = [2, 2, 16, 72], strides = [1, 1, 1, 1]} : vector<2x2x18x72xf32> to vector<2x2x16x72xf32>
    %79 = vector.shape_cast %78 : vector<2x2x16x72xf32> to vector<64x72xf32>
    %c0_33 = arith.constant 0 : index
    %c0_34 = arith.constant 0 : index
    %c0_35 = arith.constant 0 : index
    %80 = vector.load %arg6[%c0_33, %c0_34, %c0_35] : memref<3x72x128xf32, #tpu.memory_space<vmem>>, vector<1x72x128xf32>
    %81 = vector.shape_cast %80 : vector<1x72x128xf32> to vector<72x128xf32>
    %cst_36 = arith.constant dense<0.000000e+00> : vector<64x128xf32>
    %82 = tpu.matmul %79, %81, %cst_36 {dimension_numbers = #tpu.dot_dimension_numbers<[1], [0], [0], [1], [0, 0, 1, 1], [], []>} : vector<64x72xf32>, vector<72x128xf32>, vector<64x128xf32> -> vector<64x128xf32>
    %83 = arith.addf %77, %82 : vector<64x128xf32>
    %84 = vector.extract_strided_slice %76 {offsets = [0, 0, 1, 0], sizes = [2, 2, 16, 72], strides = [1, 1, 1, 1]} : vector<2x2x18x72xf32> to vector<2x2x16x72xf32>
    %85 = vector.shape_cast %84 : vector<2x2x16x72xf32> to vector<64x72xf32>
    %c1_37 = arith.constant 1 : index
    %c0_38 = arith.constant 0 : index
    %c0_39 = arith.constant 0 : index
    %86 = vector.load %arg6[%c1_37, %c0_38, %c0_39] : memref<3x72x128xf32, #tpu.memory_space<vmem>>, vector<1x72x128xf32>
    %87 = vector.shape_cast %86 : vector<1x72x128xf32> to vector<72x128xf32>
    %cst_40 = arith.constant dense<0.000000e+00> : vector<64x128xf32>
    %88 = tpu.matmul %85, %87, %cst_40 {dimension_numbers = #tpu.dot_dimension_numbers<[1], [0], [0], [1], [0, 0, 1, 1], [], []>} : vector<64x72xf32>, vector<72x128xf32>, vector<64x128xf32> -> vector<64x128xf32>
    %89 = arith.addf %83, %88 : vector<64x128xf32>
    %90 = vector.extract_strided_slice %76 {offsets = [0, 0, 2, 0], sizes = [2, 2, 16, 72], strides = [1, 1, 1, 1]} : vector<2x2x18x72xf32> to vector<2x2x16x72xf32>
    %91 = vector.shape_cast %90 : vector<2x2x16x72xf32> to vector<64x72xf32>
    %c2_41 = arith.constant 2 : index
    %c0_42 = arith.constant 0 : index
    %c0_43 = arith.constant 0 : index
    %92 = vector.load %arg6[%c2_41, %c0_42, %c0_43] : memref<3x72x128xf32, #tpu.memory_space<vmem>>, vector<1x72x128xf32>
    %93 = vector.shape_cast %92 : vector<1x72x128xf32> to vector<72x128xf32>
    %cst_44 = arith.constant dense<0.000000e+00> : vector<64x128xf32>
    %94 = tpu.matmul %91, %93, %cst_44 {dimension_numbers = #tpu.dot_dimension_numbers<[1], [0], [0], [1], [0, 0, 1, 1], [], []>} : vector<64x72xf32>, vector<72x128xf32>, vector<64x128xf32> -> vector<64x128xf32>
    %95 = arith.addf %89, %94 : vector<64x128xf32>
    %c0_45 = arith.constant 0 : index
    %c0_46 = arith.constant 0 : index
    %96 = vector.load %arg7[%c0_45, %c0_46] : memref<1x128xf32, #tpu.memory_space<vmem>>, vector<1x128xf32>
    %97 = vector.broadcast %96 : vector<1x128xf32> to vector<64x128xf32>
    %98 = arith.addf %95, %97 : vector<64x128xf32>
    %cst_47 = arith.constant 0.000000e+00 : f32
    %99 = vector.broadcast %cst_47 : f32 to vector<64x128xf32>
    %100 = arith.maximumf %98, %99 : vector<64x128xf32>
    %101 = vector.shape_cast %100 : vector<64x128xf32> to vector<2x32x128xf32>
    %cst_48 = arith.constant dense<0.000000e+00> : vector<2x128xf32>
    %102 = vector.multi_reduction <add>, %101, %cst_48 [1] : vector<2x32x128xf32> to vector<2x128xf32>
    %c0_49 = arith.constant 0 : index
    %c0_50 = arith.constant 0 : index
    %103 = vector.load %arg15[%c0_49, %c0_50] : memref<128x128xf32, #tpu.memory_space<vmem>>, vector<128x128xf32>
    %cst_51 = arith.constant dense<0.000000e+00> : vector<2x128xf32>
    %104 = tpu.matmul %102, %103, %cst_51 {dimension_numbers = #tpu.dot_dimension_numbers<[1], [0], [0], [1], [0, 0, 1, 1], [], []>} : vector<2x128xf32>, vector<128x128xf32>, vector<2x128xf32> -> vector<2x128xf32>
    %105 = vector.shape_cast %104 : vector<2x128xf32> to vector<2x1x128xf32>
    %106 = vector.broadcast %105 : vector<2x1x128xf32> to vector<2x32x128xf32>
    %107 = arith.subf %101, %106 : vector<2x32x128xf32>
    %108 = arith.mulf %107, %107 : vector<2x32x128xf32>
    %cst_52 = arith.constant dense<0.000000e+00> : vector<2x128xf32>
    %109 = vector.multi_reduction <add>, %108, %cst_52 [1] : vector<2x32x128xf32> to vector<2x128xf32>
    %c0_53 = arith.constant 0 : index
    %c0_54 = arith.constant 0 : index
    %110 = vector.load %arg15[%c0_53, %c0_54] : memref<128x128xf32, #tpu.memory_space<vmem>>, vector<128x128xf32>
    %cst_55 = arith.constant dense<0.000000e+00> : vector<2x128xf32>
    %111 = tpu.matmul %109, %110, %cst_55 {dimension_numbers = #tpu.dot_dimension_numbers<[1], [0], [0], [1], [0, 0, 1, 1], [], []>} : vector<2x128xf32>, vector<128x128xf32>, vector<2x128xf32> -> vector<2x128xf32>
    %cst_56 = arith.constant 0.000000e+00 : f32
    %112 = vector.broadcast %cst_56 : f32 to vector<2x128xf32>
    %113 = arith.maximumf %111, %112 : vector<2x128xf32>
    %cst_57 = arith.constant 9.99999974E-6 : f32
    %114 = vector.broadcast %cst_57 : f32 to vector<2x128xf32>
    %115 = arith.addf %113, %114 : vector<2x128xf32>
    %116 = math.rsqrt %115 : vector<2x128xf32>
    %c0_58 = arith.constant 0 : index
    %c0_59 = arith.constant 0 : index
    %117 = vector.load %arg8[%c0_58, %c0_59] : memref<1x128xf32, #tpu.memory_space<vmem>>, vector<1x128xf32>
    %118 = vector.broadcast %117 : vector<1x128xf32> to vector<2x128xf32>
    %119 = arith.mulf %118, %116 : vector<2x128xf32>
    %c0_60 = arith.constant 0 : index
    %c0_61 = arith.constant 0 : index
    %120 = vector.load %arg9[%c0_60, %c0_61] : memref<1x128xf32, #tpu.memory_space<vmem>>, vector<1x128xf32>
    %121 = arith.mulf %104, %119 : vector<2x128xf32>
    %122 = vector.broadcast %120 : vector<1x128xf32> to vector<2x128xf32>
    %123 = arith.subf %122, %121 : vector<2x128xf32>
    %124 = vector.shape_cast %119 : vector<2x128xf32> to vector<2x1x128xf32>
    %125 = vector.broadcast %124 : vector<2x1x128xf32> to vector<2x32x128xf32>
    %126 = arith.mulf %101, %125 : vector<2x32x128xf32>
    %127 = vector.shape_cast %123 : vector<2x128xf32> to vector<2x1x128xf32>
    %128 = vector.broadcast %127 : vector<2x1x128xf32> to vector<2x32x128xf32>
    %129 = arith.addf %126, %128 : vector<2x32x128xf32>
    %130 = vector.shape_cast %129 : vector<2x32x128xf32> to vector<2x2x16x128xf32>
    %131 = vector.extract_strided_slice %130 {offsets = [0, 0, 1, 0], sizes = [2, 2, 1, 128], strides = [1, 1, 1, 1]} : vector<2x2x16x128xf32> to vector<2x2x1x128xf32>
    %132 = vector.extract_strided_slice %130 {offsets = [0, 0, 14, 0], sizes = [2, 2, 1, 128], strides = [1, 1, 1, 1]} : vector<2x2x16x128xf32> to vector<2x2x1x128xf32>
    %133 = tpu.concatenate %131, %130, %132 in 2 : vector<2x2x1x128xf32>, vector<2x2x16x128xf32>, vector<2x2x1x128xf32> -> vector<2x2x18x128xf32>
    %134 = vector.extract_strided_slice %133 {offsets = [0, 0, 0, 8], sizes = [2, 2, 18, 8], strides = [1, 1, 1, 1]} : vector<2x2x18x128xf32> to vector<2x2x18x8xf32>
    %135 = vector.extract_strided_slice %133 {offsets = [0, 0, 0, 112], sizes = [2, 2, 18, 8], strides = [1, 1, 1, 1]} : vector<2x2x18x128xf32> to vector<2x2x18x8xf32>
    %136 = tpu.concatenate %134, %133, %135 in 3 : vector<2x2x18x8xf32>, vector<2x2x18x128xf32>, vector<2x2x18x8xf32> -> vector<2x2x18x144xf32>
    %cst_62 = arith.constant 0.000000e+00 : f32
    %137 = vector.broadcast %cst_62 : f32 to vector<64x128xf32>
    %138 = vector.extract_strided_slice %136 {offsets = [0, 0, 0, 0], sizes = [2, 2, 16, 144], strides = [1, 1, 1, 1]} : vector<2x2x18x144xf32> to vector<2x2x16x144xf32>
    %139 = vector.shape_cast %138 : vector<2x2x16x144xf32> to vector<64x144xf32>
    %c0_63 = arith.constant 0 : index
    %c0_64 = arith.constant 0 : index
    %c0_65 = arith.constant 0 : index
    %140 = vector.load %arg10[%c0_63, %c0_64, %c0_65] : memref<3x144x128xf32, #tpu.memory_space<vmem>>, vector<1x144x128xf32>
    %141 = vector.shape_cast %140 : vector<1x144x128xf32> to vector<144x128xf32>
    %cst_66 = arith.constant dense<0.000000e+00> : vector<64x128xf32>
    %142 = tpu.matmul %139, %141, %cst_66 {dimension_numbers = #tpu.dot_dimension_numbers<[1], [0], [0], [1], [0, 0, 1, 1], [], []>} : vector<64x144xf32>, vector<144x128xf32>, vector<64x128xf32> -> vector<64x128xf32>
    %143 = arith.addf %137, %142 : vector<64x128xf32>
    %144 = vector.extract_strided_slice %136 {offsets = [0, 0, 1, 0], sizes = [2, 2, 16, 144], strides = [1, 1, 1, 1]} : vector<2x2x18x144xf32> to vector<2x2x16x144xf32>
    %145 = vector.shape_cast %144 : vector<2x2x16x144xf32> to vector<64x144xf32>
    %c1_67 = arith.constant 1 : index
    %c0_68 = arith.constant 0 : index
    %c0_69 = arith.constant 0 : index
    %146 = vector.load %arg10[%c1_67, %c0_68, %c0_69] : memref<3x144x128xf32, #tpu.memory_space<vmem>>, vector<1x144x128xf32>
    %147 = vector.shape_cast %146 : vector<1x144x128xf32> to vector<144x128xf32>
    %cst_70 = arith.constant dense<0.000000e+00> : vector<64x128xf32>
    %148 = tpu.matmul %145, %147, %cst_70 {dimension_numbers = #tpu.dot_dimension_numbers<[1], [0], [0], [1], [0, 0, 1, 1], [], []>} : vector<64x144xf32>, vector<144x128xf32>, vector<64x128xf32> -> vector<64x128xf32>
    %149 = arith.addf %143, %148 : vector<64x128xf32>
    %150 = vector.extract_strided_slice %136 {offsets = [0, 0, 2, 0], sizes = [2, 2, 16, 144], strides = [1, 1, 1, 1]} : vector<2x2x18x144xf32> to vector<2x2x16x144xf32>
    %151 = vector.shape_cast %150 : vector<2x2x16x144xf32> to vector<64x144xf32>
    %c2_71 = arith.constant 2 : index
    %c0_72 = arith.constant 0 : index
    %c0_73 = arith.constant 0 : index
    %152 = vector.load %arg10[%c2_71, %c0_72, %c0_73] : memref<3x144x128xf32, #tpu.memory_space<vmem>>, vector<1x144x128xf32>
    %153 = vector.shape_cast %152 : vector<1x144x128xf32> to vector<144x128xf32>
    %cst_74 = arith.constant dense<0.000000e+00> : vector<64x128xf32>
    %154 = tpu.matmul %151, %153, %cst_74 {dimension_numbers = #tpu.dot_dimension_numbers<[1], [0], [0], [1], [0, 0, 1, 1], [], []>} : vector<64x144xf32>, vector<144x128xf32>, vector<64x128xf32> -> vector<64x128xf32>
    %155 = arith.addf %149, %154 : vector<64x128xf32>
    %c0_75 = arith.constant 0 : index
    %c0_76 = arith.constant 0 : index
    %156 = vector.load %arg11[%c0_75, %c0_76] : memref<1x128xf32, #tpu.memory_space<vmem>>, vector<1x128xf32>
    %157 = vector.broadcast %156 : vector<1x128xf32> to vector<64x128xf32>
    %158 = arith.addf %155, %157 : vector<64x128xf32>
    %cst_77 = arith.constant 0.000000e+00 : f32
    %159 = vector.broadcast %cst_77 : f32 to vector<64x128xf32>
    %160 = arith.maximumf %158, %159 : vector<64x128xf32>
    %161 = vector.shape_cast %160 : vector<64x128xf32> to vector<2x32x128xf32>
    %cst_78 = arith.constant dense<0.000000e+00> : vector<2x128xf32>
    %162 = vector.multi_reduction <add>, %161, %cst_78 [1] : vector<2x32x128xf32> to vector<2x128xf32>
    %c0_79 = arith.constant 0 : index
    %c0_80 = arith.constant 0 : index
    %163 = vector.load %arg15[%c0_79, %c0_80] : memref<128x128xf32, #tpu.memory_space<vmem>>, vector<128x128xf32>
    %cst_81 = arith.constant dense<0.000000e+00> : vector<2x128xf32>
    %164 = tpu.matmul %162, %163, %cst_81 {dimension_numbers = #tpu.dot_dimension_numbers<[1], [0], [0], [1], [0, 0, 1, 1], [], []>} : vector<2x128xf32>, vector<128x128xf32>, vector<2x128xf32> -> vector<2x128xf32>
    %165 = vector.shape_cast %164 : vector<2x128xf32> to vector<2x1x128xf32>
    %166 = vector.broadcast %165 : vector<2x1x128xf32> to vector<2x32x128xf32>
    %167 = arith.subf %161, %166 : vector<2x32x128xf32>
    %168 = arith.mulf %167, %167 : vector<2x32x128xf32>
    %cst_82 = arith.constant dense<0.000000e+00> : vector<2x128xf32>
    %169 = vector.multi_reduction <add>, %168, %cst_82 [1] : vector<2x32x128xf32> to vector<2x128xf32>
    %c0_83 = arith.constant 0 : index
    %c0_84 = arith.constant 0 : index
    %170 = vector.load %arg15[%c0_83, %c0_84] : memref<128x128xf32, #tpu.memory_space<vmem>>, vector<128x128xf32>
    %cst_85 = arith.constant dense<0.000000e+00> : vector<2x128xf32>
    %171 = tpu.matmul %169, %170, %cst_85 {dimension_numbers = #tpu.dot_dimension_numbers<[1], [0], [0], [1], [0, 0, 1, 1], [], []>} : vector<2x128xf32>, vector<128x128xf32>, vector<2x128xf32> -> vector<2x128xf32>
    %cst_86 = arith.constant 0.000000e+00 : f32
    %172 = vector.broadcast %cst_86 : f32 to vector<2x128xf32>
    %173 = arith.maximumf %171, %172 : vector<2x128xf32>
    %cst_87 = arith.constant 9.99999974E-6 : f32
    %174 = vector.broadcast %cst_87 : f32 to vector<2x128xf32>
    %175 = arith.addf %173, %174 : vector<2x128xf32>
    %176 = math.rsqrt %175 : vector<2x128xf32>
    %c0_88 = arith.constant 0 : index
    %c0_89 = arith.constant 0 : index
    %177 = vector.load %arg12[%c0_88, %c0_89] : memref<1x128xf32, #tpu.memory_space<vmem>>, vector<1x128xf32>
    %178 = vector.broadcast %177 : vector<1x128xf32> to vector<2x128xf32>
    %179 = arith.mulf %178, %176 : vector<2x128xf32>
    %c0_90 = arith.constant 0 : index
    %c0_91 = arith.constant 0 : index
    %180 = vector.load %arg13[%c0_90, %c0_91] : memref<1x128xf32, #tpu.memory_space<vmem>>, vector<1x128xf32>
    %181 = arith.mulf %164, %179 : vector<2x128xf32>
    %182 = vector.broadcast %180 : vector<1x128xf32> to vector<2x128xf32>
    %183 = arith.subf %182, %181 : vector<2x128xf32>
    %184 = vector.shape_cast %179 : vector<2x128xf32> to vector<2x1x128xf32>
    %185 = vector.broadcast %184 : vector<2x1x128xf32> to vector<2x32x128xf32>
    %186 = arith.mulf %161, %185 : vector<2x32x128xf32>
    %187 = vector.shape_cast %183 : vector<2x128xf32> to vector<2x1x128xf32>
    %188 = vector.broadcast %187 : vector<2x1x128xf32> to vector<2x32x128xf32>
    %189 = arith.addf %186, %188 : vector<2x32x128xf32>
    %190 = vector.shape_cast %189 : vector<2x32x128xf32> to vector<2x2x16x128xf32>
    %191 = vector.shape_cast %190 : vector<2x2x16x128xf32> to vector<4x2048xf32>
    %192 = arith.truncf %191 : vector<4x2048xf32> to vector<4x2048xbf16>
    %c0_i32_92 = arith.constant 0 : i32
    %193 = tpu.memref_slice %arg26[%c0_i32_92] : memref<3x!tpu.dma_semaphore, #tpu.memory_space<semaphore_mem>> -> memref<1x!tpu.dma_semaphore, #tpu.memory_space<semaphore_mem>>
    %194 = tpu.memref_squeeze %193 : memref<1x!tpu.dma_semaphore, #tpu.memory_space<semaphore_mem>> -> memref<!tpu.dma_semaphore, #tpu.memory_space<semaphore_mem>>
    tpu.wait_dma2 semaphore(%194 : memref<!tpu.dma_semaphore, #tpu.memory_space<semaphore_mem>>) src(%arg19 : memref<2048x512xbf16, #tpu.memory_space<any>>) dst(%arg23 : memref<2048x512xbf16, #tpu.memory_space<vmem>>)
    %c0_93 = arith.constant 0 : index
    %c0_94 = arith.constant 0 : index
    %195 = vector.load %arg23[%c0_93, %c0_94] : memref<2048x512xbf16, #tpu.memory_space<vmem>>, vector<2048x512xbf16>
    %cst_95 = arith.constant dense<0.000000e+00> : vector<4x512xf32>
    %196 = tpu.matmul %192, %195, %cst_95 {dimension_numbers = #tpu.dot_dimension_numbers<[1], [0], [0], [1], [0, 0, 1, 1], [], []>} : vector<4x2048xbf16>, vector<2048x512xbf16>, vector<4x512xf32> -> vector<4x512xf32>
    %c0_96 = arith.constant 0 : index
    %c0_97 = arith.constant 0 : index
    %197 = vector.load %arg16[%c0_96, %c0_97] : memref<1x512xf32, #tpu.memory_space<vmem>>, vector<1x512xf32>
    %198 = vector.broadcast %197 : vector<1x512xf32> to vector<4x512xf32>
    %199 = arith.addf %196, %198 : vector<4x512xf32>
    %cst_98 = arith.constant 0.000000e+00 : f32
    %200 = vector.broadcast %cst_98 : f32 to vector<4x512xf32>
    %201 = arith.maximumf %199, %200 : vector<4x512xf32>
    %202 = arith.truncf %201 : vector<4x512xf32> to vector<4x512xbf16>
    %c1_i32_99 = arith.constant 1 : i32
    %203 = tpu.memref_slice %arg26[%c1_i32_99] : memref<3x!tpu.dma_semaphore, #tpu.memory_space<semaphore_mem>> -> memref<1x!tpu.dma_semaphore, #tpu.memory_space<semaphore_mem>>
    %204 = tpu.memref_squeeze %203 : memref<1x!tpu.dma_semaphore, #tpu.memory_space<semaphore_mem>> -> memref<!tpu.dma_semaphore, #tpu.memory_space<semaphore_mem>>
    tpu.wait_dma2 semaphore(%204 : memref<!tpu.dma_semaphore, #tpu.memory_space<semaphore_mem>>) src(%arg20 : memref<512x512xbf16, #tpu.memory_space<any>>) dst(%arg24 : memref<512x512xbf16, #tpu.memory_space<vmem>>)
    %c0_100 = arith.constant 0 : index
    %c0_101 = arith.constant 0 : index
    %205 = vector.load %arg24[%c0_100, %c0_101] : memref<512x512xbf16, #tpu.memory_space<vmem>>, vector<512x512xbf16>
    %cst_102 = arith.constant dense<0.000000e+00> : vector<4x512xf32>
    %206 = tpu.matmul %202, %205, %cst_102 {dimension_numbers = #tpu.dot_dimension_numbers<[1], [0], [0], [1], [0, 0, 1, 1], [], []>} : vector<4x512xbf16>, vector<512x512xbf16>, vector<4x512xf32> -> vector<4x512xf32>
    %c0_103 = arith.constant 0 : index
    %c0_104 = arith.constant 0 : index
    %207 = vector.load %arg17[%c0_103, %c0_104] : memref<1x512xf32, #tpu.memory_space<vmem>>, vector<1x512xf32>
    %208 = vector.broadcast %207 : vector<1x512xf32> to vector<4x512xf32>
    %209 = arith.addf %206, %208 : vector<4x512xf32>
    %cst_105 = arith.constant 0.000000e+00 : f32
    %210 = vector.broadcast %cst_105 : f32 to vector<4x512xf32>
    %211 = arith.maximumf %209, %210 : vector<4x512xf32>
    %212 = arith.truncf %211 : vector<4x512xf32> to vector<4x512xbf16>
    %c2_i32_106 = arith.constant 2 : i32
    %213 = tpu.memref_slice %arg26[%c2_i32_106] : memref<3x!tpu.dma_semaphore, #tpu.memory_space<semaphore_mem>> -> memref<1x!tpu.dma_semaphore, #tpu.memory_space<semaphore_mem>>
    %214 = tpu.memref_squeeze %213 : memref<1x!tpu.dma_semaphore, #tpu.memory_space<semaphore_mem>> -> memref<!tpu.dma_semaphore, #tpu.memory_space<semaphore_mem>>
    tpu.wait_dma2 semaphore(%214 : memref<!tpu.dma_semaphore, #tpu.memory_space<semaphore_mem>>) src(%arg21 : memref<512x128xbf16, #tpu.memory_space<any>>) dst(%arg25 : memref<512x128xbf16, #tpu.memory_space<vmem>>)
    %c0_107 = arith.constant 0 : index
    %c0_108 = arith.constant 0 : index
    %215 = vector.load %arg25[%c0_107, %c0_108] : memref<512x128xbf16, #tpu.memory_space<vmem>>, vector<512x128xbf16>
    %cst_109 = arith.constant dense<0.000000e+00> : vector<4x128xf32>
    %216 = tpu.matmul %212, %215, %cst_109 {dimension_numbers = #tpu.dot_dimension_numbers<[1], [0], [0], [1], [0, 0, 1, 1], [], []>} : vector<4x512xbf16>, vector<512x128xbf16>, vector<4x128xf32> -> vector<4x128xf32>
    %c0_110 = arith.constant 0 : index
    %c0_111 = arith.constant 0 : index
    %217 = vector.load %arg18[%c0_110, %c0_111] : memref<1x128xf32, #tpu.memory_space<vmem>>, vector<1x128xf32>
    %218 = vector.broadcast %217 : vector<1x128xf32> to vector<4x128xf32>
    %219 = arith.addf %216, %218 : vector<4x128xf32>
    %c0_112 = arith.constant 0 : index
    %c0_113 = arith.constant 0 : index
    %220 = vector.load %arg22[%c0_112, %c0_113] : memref<4x128xf32, #tpu.memory_space<vmem>>, vector<4x128xf32>
    tpu.vector_store %arg22[%c0_112, %c0_113], %219 {strides = array<i32>} : memref<4x128xf32, #tpu.memory_space<vmem>>, vector<4x128xf32>,
    return
  }
}

</mosaic_0001>

<bundles_post_ra>
// kernel: siamese_forward.1
= control target key start
LH: loop header
LB: loop body
LE: loop exit
PB: predicated region body
PF: predicated region fallthrough
CT: control target
= control target key end

     0   :  { %s8378_s0 = inlined_call_operand.hbm [shape: f32[2,16,16], index: 0, kind: input, shape index: {}]   ;;  %s8379_s1 = inlined_call_operand.hbm [shape: f32[2,16,16], index: 1, kind: input, shape index: {}]   ;;  %s8380_s2 = inlined_call_operand.hbm [shape: f32[3,18,64], index: 2, kind: input, shape index: {}]   ;;  %s8381_s3 = inlined_call_operand.hbm [shape: f32[1,64], index: 3, kind: input, shape index: {}]   ;;  %s8382_s4 = inlined_call_operand.hbm [shape: f32[1,64], index: 4, kind: input, shape index: {}]   ;;  %s8383_s5 = inlined_call_operand.hbm [shape: f32[1,64], index: 5, kind: input, shape index: {}]   ;;  %s8384_s6 = inlined_call_operand.hbm [shape: f32[3,72,128], index: 6, kind: input, shape index: {}]   ;;  %s8385_s7 = inlined_call_operand.hbm [shape: f32[1,128], index: 7, kind: input, shape index: {}]   ;;  %s8386_s8 = inlined_call_operand.hbm [shape: f32[1,128], index: 8, kind: input, shape index: {}]   ;;  %s8387_s9 = inlined_call_operand.hbm [shape: f32[1,128], index: 9, kind: input, shape index: {}]   ;;  %s8388_s10 = inlined_call_operand.hbm [shape: f32[3,144,128], index: 10, kind: input, shape index: {}]   ;;  %s8389_s11 = inlined_call_operand.hbm [shape: f32[1,128], index: 11, kind: input, shape index: {}]   ;;  %s8390_s12 = inlined_call_operand.hbm [shape: f32[1,128], index: 12, kind: input, shape index: {}]   ;;  %s8391_s13 = inlined_call_operand.hbm [shape: f32[1,128], index: 13, kind: input, shape index: {}]   ;;  %s8392_s14 = inlined_call_operand.hbm [shape: f32[64,64], index: 14, kind: input, shape index: {}]   ;;  %s8393_s15 = inlined_call_operand.hbm [shape: f32[128,128], index: 15, kind: input, shape index: {}]   ;;  %s8394_s16 = inlined_call_operand.hbm [shape: f32[1,512], index: 16, kind: input, shape index: {}]   ;;  %s8395_s17 = inlined_call_operand.hbm [shape: f32[1,512], index: 17, kind: input, shape index: {}]   ;;  %s8396_s18 = inlined_call_operand.hbm [shape: f32[1,128], index: 18, kind: input, shape index: {}]   ;;  %s8397_s19 = inlined_call_operand.hbm [shape: bf16[2048,512], index: 19, kind: input, shape index: {}]   ;;  %s8398_s20 = inlined_call_operand.hbm [shape: bf16[512,512], index: 20, kind: input, shape index: {}]   ;;  %s8399_s21 = inlined_call_operand.hbm [shape: bf16[512,128], index: 21, kind: input, shape index: {}]   ;;  %s8400_s22 = inlined_call_operand.vmem [shape: f32[4,128], index: 22, kind: output, shape index: {}]  }
   0x1   :  { %8412 = sst [smem:[#allocation56_spill]] %s8378_s0 }
   0x2   :  { %8413 = sst [smem:[#allocation57_spill]] %s8379_s1 }
   0x3   :  { %8414 = sst [smem:[#allocation58_spill]] %s8380_s2 }
   0x4   :  { %8415 = sst [smem:[#allocation59_spill]] %s8381_s3 }
   0x5   :  { %8416 = sst [smem:[#allocation60_spill]] %s8382_s4 }
   0x6   :  { %8417 = sst [smem:[#allocation61_spill]] %s8383_s5 }
   0x7   :  { %8418 = sst [smem:[#allocation62_spill]] %s8384_s6 }
   0x8   :  { %8419 = sst [smem:[#allocation63_spill]] %s8400_s22 }
   0x9   :  { %27 = vsyncpa [#allocation7], 0 }
   0xa   :  { %28 = vsyncpa [#allocation9], 0 }
   0xb   :  { %29 = vsyncpa [#allocation12], 0 }
   0xc   :  { %30 = vsyncpa [#allocation15], 0 }
   0xd   :  { %31 = vsyncpa [#allocation18], 0 }
   0xe   :  { %32 = vsyncpa [#allocation21], 0 }
   0xf   :  { %33 = vsyncpa [#allocation24], 0 }
  0x10   :  { %34 = vsyncpa [#allocation27], 0 }
  0x11   :  { %35 = vsyncpa [#allocation30], 0 }
  0x12   :  { %36 = vsyncpa [#allocation33], 0  ;;  %s6934_s3 = smov [#allocation8]   ;;  %s6935_s29 = smov [#allocation11]  }
  0x13   :  { %s54_s28 = sshll.u32 %s6934_s3, 4  ;;  %s79_s30 = sshll.u32 %s6935_s29, 4  ;;  %s55_s28 = int_to_ptr.vmem [resolvable:$true] %s54_s28  ;;  %s7093_s30 = int_to_ptr.vmem [resolvable:$true] %s79_s30 }
  0x14   :  { %s8420_s23 = sld [smem:[#allocation57_spill]] }
  0x1a   :  { %s6468_s1 = scalar_lea.hbm %s8420_s23, 512 }
  0x1b   :  { %p6469_p0 = scmp.ne.s32.totalorder %s8420_s23, %s6468_s1  ;;  %p6472_p1 = scmp.lt.u32.totalorder %s6468_s1, %s8420_s23 }
  0x1d   :  { %p6474_p2 = pnand %p6472_p1, %p6469_p0 }
  0x1f   :  { %6477 = shalt.err (!%p6474_p2)
}
  0x20   :  { %s6478_s26 = scalar_lea.vmem %s55_s28, 512  ;;  %p6483_p4 = scmp.lt.s32.totalorder %s55_s28, %s55_s28 }
  0x21   :  { %p6479_p3 = scmp.ne.s32.totalorder %s55_s28, %s6478_s26  ;;  %p6484_p5 = scmp.lt.s32.totalorder %s6478_s26, %s6478_s26 }
  0x23   :  { %p6485_p6 = por %p6484_p5, %p6483_p4 }
  0x25   :  { %p6486_p7 = pnand %p6485_p6, %p6479_p3 }
  0x27   :  { %6489 = shalt.err (!%p6486_p7)
}
  0x28   :  { %s8408_s2 = smov 128   ;;  %s8410_s27 = smov 8  }
  0x29   :  { %60 = dma.hbm_to_vmem [thread:$0]  %s8420_s23, 512, %s55_s28, [#allocation9], %s8408_s2, %s8408_s2, %s8410_s27  }
  0x2a   :  { %s8421_s1 = sld [smem:[#allocation59_spill]] }
  0x30   :  { %s6490_s5 = scalar_lea.hbm %s8421_s1, 16 }
  0x31   :  { %p6491_p8 = scmp.ne.s32.totalorder %s8421_s1, %s6490_s5  ;;  %p6494_p9 = scmp.lt.u32.totalorder %s6490_s5, %s8421_s1 }
  0x33   :  { %p6496_p10 = pnand %p6494_p9, %p6491_p8 }
  0x35   :  { %6499 = shalt.err (!%p6496_p10)
}
  0x36   :  { %s6500_s3 = scalar_lea.vmem %s7093_s30, 16  ;;  %s6504_s28 = scalar_lea.vmem %s7093_s30, 32 }
  0x37   :  { %p6501_p11 = scmp.ne.s32.totalorder %s7093_s30, %s6500_s3  ;;  %p6505_p12 = scmp.lt.s32.totalorder %s7093_s30, %s7093_s30 }
  0x38   :  { %p6506_p13 = scmp.lt.s32.totalorder %s6504_s28, %s6500_s3 }
  0x3a   :  { %p6507_p0 = por %p6506_p13, %p6505_p12 }
  0x3c   :  { %p6508_p1 = pnand %p6507_p0, %p6501_p11 }
  0x3e   :  { %6511 = shalt.err (!%p6508_p1)
}
  0x3f   :  { %82 = dma.hbm_to_vmem [thread:$0]  %s8421_s1, 16, %s7093_s30, [#allocation12]  }
  0x40   :  { %s6938_s4 = smov [#allocation14]   ;;  %s6939_s5 = smov [#allocation17]  }
  0x41   :  { %s99_s0 = sshll.u32 %s6938_s4, 4  ;;  %s121_s24 = sshll.u32 %s6939_s5, 4  ;;  %s100_s0 = int_to_ptr.vmem [resolvable:$true] %s99_s0  ;;  %s122_s24 = int_to_ptr.vmem [resolvable:$true] %s121_s24 }
  0x42   :  { %s8422_s26 = sld [smem:[#allocation61_spill]] }
  0x48   :  { %s6512_s2 = scalar_lea.hbm %s8422_s26, 16 }
  0x49   :  { %p6513_p2 = scmp.ne.s32.totalorder %s8422_s26, %s6512_s2  ;;  %p6516_p3 = scmp.lt.u32.totalorder %s6512_s2, %s8422_s26 }
  0x4b   :  { %p6518_p4 = pnand %p6516_p3, %p6513_p2 }
  0x4d   :  { %6521 = shalt.err (!%p6518_p4)
}
  0x4e   :  { %s6522_s30 = scalar_lea.vmem %s100_s0, 16  ;;  %s6526_s1 = scalar_lea.vmem %s100_s0, 32 }
  0x4f   :  { %p6523_p5 = scmp.ne.s32.totalorder %s100_s0, %s6522_s30  ;;  %p6527_p6 = scmp.lt.s32.totalorder %s100_s0, %s100_s0 }
  0x50   :  { %p6528_p7 = scmp.lt.s32.totalorder %s6526_s1, %s6522_s30 }
  0x52   :  { %p6529_p8 = por %p6528_p7, %p6527_p6 }
  0x54   :  { %p6530_p9 = pnand %p6529_p8, %p6523_p5 }
  0x56   :  { %6533 = shalt.err (!%p6530_p9)
}
  0x57   :  { %102 = dma.hbm_to_vmem [thread:$0]  %s8422_s26, 16, %s100_s0, [#allocation15]  }
  0x58   :  { %s6534_s5 = scalar_lea.hbm %s8385_s7, 16 }
  0x59   :  { %p6535_p10 = scmp.ne.s32.totalorder %s8385_s7, %s6534_s5  ;;  %p6538_p11 = scmp.lt.u32.totalorder %s6534_s5, %s8385_s7 }
  0x5b   :  { %p6540_p12 = pnand %p6538_p11, %p6535_p10 }
  0x5d   :  { %6543 = shalt.err (!%p6540_p12)
}
  0x5e   :  { %s6544_s3 = scalar_lea.vmem %s122_s24, 16  ;;  %s6548_s28 = scalar_lea.vmem %s122_s24, 32 }
  0x5f   :  { %p6545_p13 = scmp.ne.s32.totalorder %s122_s24, %s6544_s3  ;;  %p6549_p0 = scmp.lt.s32.totalorder %s122_s24, %s122_s24 }
  0x60   :  { %p6550_p1 = scmp.lt.s32.totalorder %s6548_s28, %s6544_s3 }
  0x62   :  { %p6551_p2 = por %p6550_p1, %p6549_p0 }
  0x64   :  { %p6552_p3 = pnand %p6551_p2, %p6545_p13 }
  0x66   :  { %6555 = shalt.err (!%p6552_p3)
}
  0x67   :  { %124 = dma.hbm_to_vmem [thread:$0]  %s8385_s7, 16, %s122_s24, [#allocation18]  }
  0x68   :  { %s6940_s30 = smov [#allocation20]   ;;  %s6941_s23 = smov [#allocation23]  }
  0x69   :  { %s141_s1 = sshll.u32 %s6940_s30, 4  ;;  %s163_s29 = sshll.u32 %s6941_s23, 4  ;;  %s142_s1 = int_to_ptr.vmem [resolvable:$true] %s141_s1  ;;  %s164_s29 = int_to_ptr.vmem [resolvable:$true] %s163_s29 }
  0x6a   :  { %s6556_s5 = scalar_lea.hbm %s8387_s9, 16 }
  0x6b   :  { %p6557_p4 = scmp.ne.s32.totalorder %s8387_s9, %s6556_s5  ;;  %p6560_p5 = scmp.lt.u32.totalorder %s6556_s5, %s8387_s9 }
  0x6d   :  { %p6562_p6 = pnand %p6560_p5, %p6557_p4 }
  0x6f   :  { %6565 = shalt.err (!%p6562_p6)
}
  0x70   :  { %s6566_s7 = scalar_lea.vmem %s142_s1, 16  ;;  %s6570_s24 = scalar_lea.vmem %s142_s1, 32 }
  0x71   :  { %p6567_p7 = scmp.ne.s32.totalorder %s142_s1, %s6566_s7  ;;  %p6571_p8 = scmp.lt.s32.totalorder %s142_s1, %s142_s1 }
  0x72   :  { %p6572_p9 = scmp.lt.s32.totalorder %s6570_s24, %s6566_s7 }
  0x74   :  { %p6573_p10 = por %p6572_p9, %p6571_p8 }
  0x76   :  { %p6574_p11 = pnand %p6573_p10, %p6567_p7 }
  0x78   :  { %6577 = shalt.err (!%p6574_p11)
}
  0x79   :  { %144 = dma.hbm_to_vmem [thread:$0]  %s8387_s9, 16, %s142_s1, [#allocation21]  }
  0x7a   :  { %s6578_s30 = scalar_lea.hbm %s8389_s11, 16 }
  0x7b   :  { %p6579_p12 = scmp.ne.s32.totalorder %s8389_s11, %s6578_s30  ;;  %p6582_p13 = scmp.lt.u32.totalorder %s6578_s30, %s8389_s11 }
  0x7d   :  { %p6584_p0 = pnand %p6582_p13, %p6579_p12 }
  0x7f   :  { %6587 = shalt.err (!%p6584_p0)
}
  0x80   :  { %s6588_s22 = scalar_lea.vmem %s164_s29, 16  ;;  %s6592_s2 = scalar_lea.vmem %s164_s29, 32 }
  0x81   :  { %p6589_p1 = scmp.ne.s32.totalorder %s164_s29, %s6588_s22  ;;  %p6593_p2 = scmp.lt.s32.totalorder %s164_s29, %s164_s29 }
  0x82   :  { %p6594_p3 = scmp.lt.s32.totalorder %s6592_s2, %s6588_s22 }
  0x84   :  { %p6595_p4 = por %p6594_p3, %p6593_p2 }
  0x86   :  { %p6596_p5 = pnand %p6595_p4, %p6589_p1 }
  0x88   :  { %6599 = shalt.err (!%p6596_p5)
}
  0x89   :  { %166 = dma.hbm_to_vmem [thread:$0]  %s8389_s11, 16, %s164_s29, [#allocation24]  }
  0x8a   :  { %s6942_s6 = smov [#allocation26]   ;;  %s6943_s7 = smov [#allocation29]  }
  0x8b   :  { %s183_s25 = sshll.u32 %s6942_s6, 4  ;;  %s204_s24 = sshll.u32 %s6943_s7, 4  ;;  %s184_s25 = int_to_ptr.vmem [resolvable:$true] %s183_s25  ;;  %s7176_s24 = int_to_ptr.vmem [resolvable:$true] %s204_s24 }
  0x8c   :  { %s6600_s0 = scalar_lea.hbm %s8391_s13, 16 }
  0x8d   :  { %p6601_p6 = scmp.ne.s32.totalorder %s8391_s13, %s6600_s0  ;;  %p6604_p7 = scmp.lt.u32.totalorder %s6600_s0, %s8391_s13 }
  0x8f   :  { %p6606_p8 = pnand %p6604_p7, %p6601_p6 }
  0x91   :  { %6609 = shalt.err (!%p6606_p8)
}
  0x92   :  { %s6610_s11 = scalar_lea.vmem %s184_s25, 16  ;;  %s6614_s29 = scalar_lea.vmem %s184_s25, 32 }
  0x93   :  { %p6611_p9 = scmp.ne.s32.totalorder %s184_s25, %s6610_s11  ;;  %p6615_p10 = scmp.lt.s32.totalorder %s184_s25, %s184_s25 }
  0x94   :  { %p6616_p11 = scmp.lt.s32.totalorder %s6614_s29, %s6610_s11 }
  0x96   :  { %p6617_p12 = por %p6616_p11, %p6615_p10 }
  0x98   :  { %p6618_p13 = pnand %p6617_p12, %p6611_p9 }
  0x9a   :  { %6621 = shalt.err (!%p6618_p13)
}
  0x9b   :  { %186 = dma.hbm_to_vmem [thread:$0]  %s8391_s13, 16, %s184_s25, [#allocation27]  }
  0x9c   :  { %s6622_s9 = scalar_lea.hbm %s8393_s15, 2048 }
  0x9d   :  { %p6623_p0 = scmp.ne.s32.totalorder %s8393_s15, %s6622_s9  ;;  %p6626_p1 = scmp.lt.u32.totalorder %s6622_s9, %s8393_s15 }
  0x9f   :  { %p6628_p2 = pnand %p6626_p1, %p6623_p0 }
  0xa1   :  { %6631 = shalt.err (!%p6628_p2)
}
  0xa2   :  { %s6632_s28 = scalar_lea.vmem %s7176_s24, 2048  ;;  %p6637_p4 = scmp.lt.s32.totalorder %s7176_s24, %s7176_s24 }
  0xa3   :  { %p6633_p3 = scmp.ne.s32.totalorder %s7176_s24, %s6632_s28  ;;  %p6638_p5 = scmp.lt.s32.totalorder %s6632_s28, %s6632_s28 }
  0xa5   :  { %p6639_p6 = por %p6638_p5, %p6637_p4 }
  0xa7   :  { %p6640_p7 = pnand %p6639_p6, %p6633_p3 }
  0xa9   :  { %6643 = shalt.err (!%p6640_p7)
}
  0xaa   :  { %s8423_s13 = smov 8   ;;  %s8424_s25 = smov 128  }
  0xab   :  { %210 = dma.hbm_to_vmem [thread:$0]  %s8393_s15, 2048, %s7176_s24, [#allocation30], %s8424_s25, %s8424_s25, %s8423_s13  }
  0xac   :  { %s6944_s30 = smov [#allocation32]   ;;  %s6945_s27 = smov [#allocation6]  }
  0xad   :  { %s227_s23 = sshll.u32 %s6944_s30, 4  ;;  %s42_s11 = sshll.u32 %s6945_s27, 4  ;;  %s228_s23 = int_to_ptr.vmem [resolvable:$true] %s227_s23  ;;  %s7210_s11 = int_to_ptr.vmem [resolvable:$true] %s42_s11 }
  0xae   :  { %s6644_s5 = scalar_lea.hbm %s8395_s17, 64 }
  0xaf   :  { %p6645_p8 = scmp.ne.s32.totalorder %s8395_s17, %s6644_s5  ;;  %p6648_p9 = scmp.lt.u32.totalorder %s6644_s5, %s8395_s17 }
  0xb1   :  { %p6650_p10 = pnand %p6648_p9, %p6645_p8 }
  0xb3   :  { %6653 = shalt.err (!%p6650_p10)
}
  0xb4   :  { %s6654_s15 = scalar_lea.vmem %s228_s23, 64  ;;  %p6659_p12 = scmp.lt.s32.totalorder %s228_s23, %s228_s23 }
  0xb5   :  { %p6655_p11 = scmp.ne.s32.totalorder %s228_s23, %s6654_s15  ;;  %p6660_p13 = scmp.lt.s32.totalorder %s6654_s15, %s6654_s15 }
  0xb7   :  { %p6661_p0 = por %p6660_p13, %p6659_p12 }
  0xb9   :  { %p6662_p1 = pnand %p6661_p0, %p6655_p11 }
  0xbb   :  { %6665 = shalt.err (!%p6662_p1)
}
  0xbc   :  { %230 = dma.hbm_to_vmem [thread:$0]  %s8395_s17, 64, %s228_s23, [#allocation33]  }
  0xbd   :  { %s8425_s28 = sld [smem:[#allocation56_spill]] }
  0xc3   :  { %s6666_s0 = scalar_lea.hbm %s8425_s28, 512 }
  0xc4   :  { %p6667_p2 = scmp.ne.s32.totalorder %s8425_s28, %s6666_s0  ;;  %p6670_p3 = scmp.lt.u32.totalorder %s6666_s0, %s8425_s28 }
  0xc6   :  { %p6672_p4 = pnand %p6670_p3, %p6667_p2 }
  0xc8   :  { %6675 = shalt.err (!%p6672_p4)
}
  0xc9   :  { %s6676_s4 = scalar_lea.vmem %s7210_s11, 512  ;;  %p6681_p6 = scmp.lt.s32.totalorder %s7210_s11, %s7210_s11 }
  0xca   :  { %p6677_p5 = scmp.ne.s32.totalorder %s7210_s11, %s6676_s4  ;;  %p6682_p7 = scmp.lt.s32.totalorder %s6676_s4, %s6676_s4 }
  0xcc   :  { %p6683_p8 = por %p6682_p7, %p6681_p6 }
  0xce   :  { %p6684_p9 = pnand %p6683_p8, %p6677_p5 }
  0xd0   :  { %6687 = shalt.err (!%p6684_p9)
}
  0xd1   :  { %48 = dma.hbm_to_vmem [thread:$0]  %s8425_s28, 512, %s7210_s11, [#allocation7], %s8424_s25, %s8424_s25, %s8423_s13  }
  0xd2   :  { %s6946_s5 = smov [#allocation10]   ;;  %s6947_s2 = smov [#allocation13]  }
  0xd3   :  { %s66_s22 = sshll.u32 %s6946_s5, 4  ;;  %s89_s9 = sshll.u32 %s6947_s2, 4  ;;  %s67_s22 = int_to_ptr.vmem [resolvable:$true] %s66_s22  ;;  %s90_s9 = int_to_ptr.vmem [resolvable:$true] %s89_s9 }
  0xd4   :  { %s8426_s24 = sld [smem:[#allocation58_spill]] }
  0xda   :  { %s6688_s6 = scalar_lea.hbm %s8426_s24, 1152 }
  0xdb   :  { %p6689_p10 = scmp.ne.s32.totalorder %s8426_s24, %s6688_s6  ;;  %p6692_p11 = scmp.lt.u32.totalorder %s6688_s6, %s8426_s24 }
  0xdd   :  { %p6694_p12 = pnand %p6692_p11, %p6689_p10 }
  0xdf   :  { %6697 = shalt.err (!%p6694_p12)
}
  0xe0   :  { %s6698_s11 = scalar_lea.vmem %s67_s22, 1152  ;;  %p6703_p0 = scmp.lt.s32.totalorder %s67_s22, %s67_s22 }
  0xe1   :  { %p6699_p13 = scmp.ne.s32.totalorder %s67_s22, %s6698_s11  ;;  %p6704_p1 = scmp.lt.s32.totalorder %s6698_s11, %s6698_s11 }
  0xe3   :  { %p6705_p2 = por %p6704_p1, %p6703_p0 }
  0xe5   :  { %p6706_p3 = pnand %p6705_p2, %p6699_p13 }
  0xe7   :  { %6709 = shalt.err (!%p6706_p3)
}
  0xe8   :  { %72 = dma.hbm_to_vmem [thread:$0]  %s8426_s24, 1152, %s67_s22, [#allocation9], %s8424_s25, %s8424_s25, %s8423_s13  }
  0xe9   :  { %s8427_s4 = sld [smem:[#allocation60_spill]] }
  0xef   :  { %s6710_s17 = scalar_lea.hbm %s8427_s4, 16 }
  0xf0   :  { %p6711_p4 = scmp.ne.s32.totalorder %s8427_s4, %s6710_s17  ;;  %p6714_p5 = scmp.lt.u32.totalorder %s6710_s17, %s8427_s4 }
  0xf2   :  { %p6716_p6 = pnand %p6714_p5, %p6711_p4 }
  0xf4   :  { %6719 = shalt.err (!%p6716_p6)
}
  0xf5   :  { %s6720_s15 = scalar_lea.vmem %s90_s9, 16  ;;  %s6724_s6 = scalar_lea.vmem %s90_s9, 32 }
  0xf6   :  { %p6721_p7 = scmp.ne.s32.totalorder %s90_s9, %s6720_s15  ;;  %p6725_p8 = scmp.lt.s32.totalorder %s90_s9, %s90_s9 }
  0xf7   :  { %p6726_p9 = scmp.lt.s32.totalorder %s6724_s6, %s6720_s15 }
  0xf9   :  { %p6727_p10 = por %p6726_p9, %p6725_p8 }
  0xfb   :  { %p6728_p11 = pnand %p6727_p10, %p6721_p7 }
  0xfd   :  { %6731 = shalt.err (!%p6728_p11)
}
  0xfe   :  { %92 = dma.hbm_to_vmem [thread:$0]  %s8427_s4, 16, %s90_s9, [#allocation12]  }
  0xff   :  { %s6948_s7 = smov [#allocation16]   ;;  %s6949_s0 = smov [#allocation19]  }
 0x100   :  { %s108_s3 = sshll.u32 %s6948_s7, 4  ;;  %s131_s26 = sshll.u32 %s6949_s0, 4  ;;  %s109_s3 = int_to_ptr.vmem [resolvable:$true] %s108_s3  ;;  %s132_s26 = int_to_ptr.vmem [resolvable:$true] %s131_s26 }
 0x101   :  { %s8428_s30 = sld [smem:[#allocation62_spill]] }
 0x107   :  { %s6732_s27 = scalar_lea.hbm %s8428_s30, 3456 }
 0x108   :  { %p6733_p12 = scmp.ne.s32.totalorder %s8428_s30, %s6732_s27  ;;  %p6736_p13 = scmp.lt.u32.totalorder %s6732_s27, %s8428_s30 }
 0x10a   :  { %p6738_p0 = pnand %p6736_p13, %p6733_p12 }
 0x10c   :  { %6741 = shalt.err (!%p6738_p0)
}
 0x10d   :  { %s6742_s9 = scalar_lea.vmem %s109_s3, 3456  ;;  %p6747_p2 = scmp.lt.s32.totalorder %s109_s3, %s109_s3 }
 0x10e   :  { %p6743_p1 = scmp.ne.s32.totalorder %s109_s3, %s6742_s9  ;;  %p6748_p3 = scmp.lt.s32.totalorder %s6742_s9, %s6742_s9 }
 0x110   :  { %p6749_p4 = por %p6748_p3, %p6747_p2 }
 0x112   :  { %p6750_p5 = pnand %p6749_p4, %p6743_p1 }
 0x114   :  { %6753 = shalt.err (!%p6750_p5)
}
 0x115   :  { %114 = dma.hbm_to_vmem [thread:$0]  %s8428_s30, 3456, %s109_s3, [#allocation15], %s8424_s25, %s8424_s25, %s8423_s13  }
 0x116   :  { %s6754_s6 = scalar_lea.hbm %s8386_s8, 16 }
 0x117   :  { %p6755_p6 = scmp.ne.s32.totalorder %s8386_s8, %s6754_s6  ;;  %p6758_p7 = scmp.lt.u32.totalorder %s6754_s6, %s8386_s8 }
 0x119   :  { %p6760_p8 = pnand %p6758_p7, %p6755_p6 }
 0x11b   :  { %6763 = shalt.err (!%p6760_p8)
}
 0x11c   :  { %s6764_s11 = scalar_lea.vmem %s132_s26, 16  ;;  %s6768_s28 = scalar_lea.vmem %s132_s26, 32 }
 0x11d   :  { %p6765_p9 = scmp.ne.s32.totalorder %s132_s26, %s6764_s11  ;;  %p6769_p10 = scmp.lt.s32.totalorder %s132_s26, %s132_s26 }
 0x11e   :  { %p6770_p11 = scmp.lt.s32.totalorder %s6768_s28, %s6764_s11 }
 0x120   :  { %p6771_p12 = por %p6770_p11, %p6769_p10 }
 0x122   :  { %p6772_p13 = pnand %p6771_p12, %p6765_p9 }
 0x124   :  { %6775 = shalt.err (!%p6772_p13)
}
 0x125   :  { %134 = dma.hbm_to_vmem [thread:$0]  %s8386_s8, 16, %s132_s26, [#allocation18]  }
 0x126   :  { %s6950_s27 = smov [#allocation22]   ;;  %s6951_s17 = smov [#allocation25]  }
 0x127   :  { %s150_s29 = sshll.u32 %s6950_s27, 4  ;;  %s173_s23 = sshll.u32 %s6951_s17, 4  ;;  %s151_s29 = int_to_ptr.vmem [resolvable:$true] %s150_s29  ;;  %s174_s23 = int_to_ptr.vmem [resolvable:$true] %s173_s23 }
 0x128   :  { %s6776_s4 = scalar_lea.hbm %s8388_s10, 6912 }
 0x129   :  { %p6777_p0 = scmp.ne.s32.totalorder %s8388_s10, %s6776_s4  ;;  %p6780_p1 = scmp.lt.u32.totalorder %s6776_s4, %s8388_s10 }
 0x12b   :  { %p6782_p2 = pnand %p6780_p1, %p6777_p0 }
 0x12d   :  { %6785 = shalt.err (!%p6782_p2)
}
 0x12e   :  { %s6786_s8 = scalar_lea.vmem %s151_s29, 6912  ;;  %p6791_p4 = scmp.lt.s32.totalorder %s151_s29, %s151_s29 }
 0x12f   :  { %p6787_p3 = scmp.ne.s32.totalorder %s151_s29, %s6786_s8  ;;  %p6792_p5 = scmp.lt.s32.totalorder %s6786_s8, %s6786_s8 }
 0x131   :  { %p6793_p6 = por %p6792_p5, %p6791_p4 }
 0x133   :  { %p6794_p7 = pnand %p6793_p6, %p6787_p3 }
 0x135   :  { %6797 = shalt.err (!%p6794_p7)
}
 0x136   :  { %156 = dma.hbm_to_vmem [thread:$0]  %s8388_s10, 6912, %s151_s29, [#allocation21], %s8424_s25, %s8424_s25, %s8423_s13  }
 0x137   :  { %s6798_s0 = scalar_lea.hbm %s8390_s12, 16 }
 0x138   :  { %p6799_p8 = scmp.ne.s32.totalorder %s8390_s12, %s6798_s0  ;;  %p6802_p9 = scmp.lt.u32.totalorder %s6798_s0, %s8390_s12 }
 0x13a   :  { %p6804_p10 = pnand %p6802_p9, %p6799_p8 }
 0x13c   :  { %6807 = shalt.err (!%p6804_p10)
}
 0x13d   :  { %s6808_s27 = scalar_lea.vmem %s174_s23, 16  ;;  %s6812_s17 = scalar_lea.vmem %s174_s23, 32 }
 0x13e   :  { %p6809_p11 = scmp.ne.s32.totalorder %s174_s23, %s6808_s27  ;;  %p6813_p12 = scmp.lt.s32.totalorder %s174_s23, %s174_s23 }
 0x13f   :  { %p6814_p13 = scmp.lt.s32.totalorder %s6812_s17, %s6808_s27 }
 0x141   :  { %p6815_p0 = por %p6814_p13, %p6813_p12 }
 0x143   :  { %p6816_p1 = pnand %p6815_p0, %p6809_p11 }
 0x145   :  { %6819 = shalt.err (!%p6816_p1)
}
 0x146   :  { %176 = dma.hbm_to_vmem [thread:$0]  %s8390_s12, 16, %s174_s23, [#allocation24]  }
 0x147   :  { %s6952_s5 = smov [#allocation28]   ;;  %s6953_s4 = smov [#allocation31]  }
 0x148   :  { %s192_s9 = sshll.u32 %s6952_s5, 4  ;;  %s217_s2 = sshll.u32 %s6953_s4, 4  ;;  %s193_s9 = int_to_ptr.vmem [resolvable:$true] %s192_s9  ;;  %s218_s2 = int_to_ptr.vmem [resolvable:$true] %s217_s2 }
 0x149   :  { %s6820_s6 = scalar_lea.hbm %s8392_s14, 1024 }
 0x14a   :  { %p6821_p2 = scmp.ne.s32.totalorder %s8392_s14, %s6820_s6  ;;  %p6824_p3 = scmp.lt.u32.totalorder %s6820_s6, %s8392_s14 }
 0x14c   :  { %p6826_p4 = pnand %p6824_p3, %p6821_p2 }
 0x14e   :  { %6829 = shalt.err (!%p6826_p4)
}
 0x14f   :  { %s6830_s12 = scalar_lea.vmem %s193_s9, 1024  ;;  %p6835_p6 = scmp.lt.s32.totalorder %s193_s9, %s193_s9 }
 0x150   :  { %p6831_p5 = scmp.ne.s32.totalorder %s193_s9, %s6830_s12  ;;  %p6836_p7 = scmp.lt.s32.totalorder %s6830_s12, %s6830_s12 }
 0x152   :  { %p6837_p8 = por %p6836_p7, %p6835_p6 }
 0x154   :  { %p6838_p9 = pnand %p6837_p8, %p6831_p5 }
 0x156   :  { %6841 = shalt.err (!%p6838_p9)
}
 0x157   :  { %198 = dma.hbm_to_vmem [thread:$0]  %s8392_s14, 1024, %s193_s9, [#allocation27], %s8424_s25, %s8424_s25, %s8423_s13  }
 0x158   :  { %s6842_s28 = scalar_lea.hbm %s8394_s16, 64 }
 0x159   :  { %p6843_p10 = scmp.ne.s32.totalorder %s8394_s16, %s6842_s28  ;;  %p6846_p11 = scmp.lt.u32.totalorder %s6842_s28, %s8394_s16 }
 0x15b   :  { %p6848_p12 = pnand %p6846_p11, %p6843_p10 }
 0x15d   :  { %6851 = shalt.err (!%p6848_p12)
}
 0x15e   :  { %s6852_s10 = scalar_lea.vmem %s218_s2, 64  ;;  %p6857_p0 = scmp.lt.s32.totalorder %s218_s2, %s218_s2 }
 0x15f   :  { %p6853_p13 = scmp.ne.s32.totalorder %s218_s2, %s6852_s10  ;;  %p6858_p1 = scmp.lt.s32.totalorder %s6852_s10, %s6852_s10 }
 0x161   :  { %p6859_p2 = por %p6858_p1, %p6857_p0 }
 0x163   :  { %p6860_p3 = pnand %p6859_p2, %p6853_p13 }
 0x165   :  { %6863 = shalt.err (!%p6860_p3)
}
 0x166   :  { %220 = dma.hbm_to_vmem [thread:$0]  %s8394_s16, 64, %s218_s2, [#allocation30]  }
 0x167   :  { %s6954_s5 = smov [#allocation34]   ;;  %s6864_s15 = scalar_lea.hbm %s8396_s18, 16 }
 0x168   :  { %s237_s9 = sshll.u32 %s6954_s5, 4  ;;  %p6865_p4 = scmp.ne.s32.totalorder %s8396_s18, %s6864_s15  ;;  %s238_s9 = int_to_ptr.vmem [resolvable:$true] %s237_s9 }
 0x169   :  { %p6868_p5 = scmp.lt.u32.totalorder %s6864_s15, %s8396_s18 }
 0x16b   :  { %p6870_p6 = pnand %p6868_p5, %p6865_p4 }
 0x16d   :  { %6873 = shalt.err (!%p6870_p6)
}
 0x16e   :  { %s6874_s24 = scalar_lea.vmem %s238_s9, 16  ;;  %s6878_s16 = scalar_lea.vmem %s238_s9, 32 }
 0x16f   :  { %p6875_p7 = scmp.ne.s32.totalorder %s238_s9, %s6874_s24  ;;  %p6879_p8 = scmp.lt.s32.totalorder %s238_s9, %s238_s9 }
 0x170   :  { %p6880_p9 = scmp.lt.s32.totalorder %s6878_s16, %s6874_s24 }
 0x172   :  { %p6881_p10 = por %p6880_p9, %p6879_p8 }
 0x174   :  { %p6882_p11 = pnand %p6881_p10, %p6875_p7 }
 0x176   :  { %6885 = shalt.err (!%p6882_p11)
}
 0x177   :  { %240 = dma.hbm_to_vmem [thread:$0]  %s8396_s18, 16, %s238_s9, [#allocation33]  }
 0x178   :  { %6908 = dma.done.wait [#allocation7], 512  }
 0x179   :  { %6909 = vsyncadd [#allocation7], 4294966784 }
 0x17a   :  { %6910 = dma.done.wait [#allocation9], 1664  }
 0x17b   :  { %6911 = vsyncadd [#allocation9], 4294965632 }
 0x17c   :  { %6912 = dma.done.wait [#allocation12], 32  }
 0x17d   :  { %6913 = vsyncadd [#allocation12], 4294967264 }
 0x17e   :  { %6914 = dma.done.wait [#allocation15], 3472  }
 0x17f   :  { %6915 = vsyncadd [#allocation15], 4294963824 }
 0x180   :  { %6916 = dma.done.wait [#allocation18], 32  }
 0x181   :  { %6917 = vsyncadd [#allocation18], 4294967264 }
 0x182   :  { %6918 = dma.done.wait [#allocation21], 6928  }
 0x183   :  { %6919 = vsyncadd [#allocation21], 4294960368 }
 0x184   :  { %6920 = dma.done.wait [#allocation24], 32  }
 0x185   :  { %6921 = vsyncadd [#allocation24], 4294967264 }
 0x186   :  { %6922 = dma.done.wait [#allocation27], 1040  }
 0x187   :  { %6923 = vsyncadd [#allocation27], 4294966256 }
 0x188   :  { %6924 = dma.done.wait [#allocation30], 2112  }
 0x189   :  { %6925 = vsyncadd [#allocation30], 4294965184 }
 0x18a   :  { %6926 = dma.done.wait [#allocation33], 80  }
 0x18b   :  { %6927 = vsyncadd [#allocation33], 4294967216  ;;  %s303_s18 = sld [smem:[#allocation0]]   ;;  %s6955_s23 = smov 4   ;;  %vm405_vm0 = vcmask 1040384   ;;  %vm641_vm1 = vcmask 1041408  }
 0x18c   :  { %319 = sst [smem:[#allocation36 + $0x2]] %s6955_s23  ;;  %s6956_s7 = smov [#allocation2]   ;;  %vm558_vm2 = vcmask 7168   ;;  %vm571_vm3 = vcmask 138240   ;;  %vm624_vm4 = vcmask 146432   ;;  %vm599_vm5 = vcmask 1046528  }
 0x18d   :  { %323 = sst [smem:[#allocation36 + $0x4]] %s8424_s25  ;;  %s311_s0 = sshll.u32 %s6956_s7, 4  ;;  %vm874_vm6 = vcmask 1045504   ;;  %vm6970_vm7 = vmmov 0   ;;  %vm1054_vm8 = vcmask 523264   ;;  %vm1091_vm9 = vcmask 1041409   ;;  %s312_s0 = int_to_ptr.vmem [resolvable:$true] %s311_s0 }
 0x18e   :  { %331 = sst [smem:[#allocation36 + $0x8]] %s6955_s23  ;;  %s6957_s11 = smov 512   ;;  %vm1585_vm10 = vcmask 31744   ;;  %vm1598_vm11 = vcmask 556032   ;;  %vm1662_vm12 = vcmask 588800   ;;  %vm2606_vm13 = vcmask 64512  }
 0x18f   :  { %315 = sst [smem:[#allocation36]] %s6957_s11  ;;  %s6958_s3 = smov 64   ;;  %vm2740_vm14 = vcmask 130048  }
 0x190   :  { %317 = sst [smem:[#allocation36 + $0x1]] %s6957_s11  ;;  %s6959_s27 = smov 2  }
 0x191   :  { %s5398_s28 = sshll.u32 %s303_s18, 26  ;;  %321 = sst [smem:[#allocation36 + $0x3]] %s6958_s3 }
 0x192   :  { %s5399_s30 = sadd.s32 134217728, %s5398_s28  ;;  %325 = sst [smem:[#allocation36 + $0x5]] %s6959_s27 }
 0x193   :  { %s6960_s17 = smov 256   ;;  %329 = sst [smem:[#allocation36 + $0x7]] %s6958_s3 }
 0x194   :  { %327 = sst [smem:[#allocation36 + $0x6]] %s6960_s17  ;;  %s6961_s10 = smov [#allocation5]  }
 0x195   :  { %s6962_s14 = smov [#allocation35]   ;;  %s6963_s9 = smov [#allocation3]  }
 0x196   :  { %333 = dma.general %s8397_s19, 65536, %s312_s0, %s6961_s10, %s6962_s14, [#allocation36], %s5399_s30, 0  }
 0x197   :  { %350 = sst [smem:[#allocation38]] %s6957_s11  ;;  %s346_s4 = sshll.u32 %s6963_s9, 4  ;;  %s347_s4 = int_to_ptr.vmem [resolvable:$true] %s346_s4 }
 0x198   :  { %352 = sst [smem:[#allocation38 + $0x1]] %s6957_s11  ;;  %s6964_s1 = smov [#allocation5 + $0x1]  }
 0x199   :  { %354 = sst [smem:[#allocation38 + $0x2]] %s6955_s23  ;;  %s6965_s15 = smov [#allocation37]  }
 0x19a   :  { %356 = sst [smem:[#allocation38 + $0x3]] %s6958_s3  ;;  %s6966_s19 = smov 127  }
 0x19b   :  { %358 = sst [smem:[#allocation38 + $0x4]] %s8424_s25  ;;  %s6968_s25 = smov 3  }
 0x19c   :  { %360 = sst [smem:[#allocation38 + $0x5]] %s6959_s27  ;;  %s6973_s26 = smov 124  }
 0x19d   :  { %362 = sst [smem:[#allocation38 + $0x6]] %s6960_s17  ;;  %s6974_s22 = smov 12  }
 0x19e   :  { %364 = sst [smem:[#allocation38 + $0x7]] %s6958_s3  ;;  %s6975_s24 = smov 24  }
 0x19f   :  { %366 = sst [smem:[#allocation38 + $0x8]] %s6955_s23  ;;  %s6976_s16 = smov 120  }
 0x1a0   :  { %368 = dma.general %s8398_s20, 16384, %s347_s4, %s6964_s1, %s6965_s15, [#allocation38], %s5399_s30, 0  }
 0x1a1   :  { %v381_v0 = vld [vmem:[#allocation6] sm:$0xff]  ;;  %v7376_v1 = vld [vmem:[#allocation6 + $0x8] sm:$0xff]  ;;  %v383_v9 = vld [vmem:[#allocation6 + $0x10] sm:$0xff]  ;;  %s6967_s20 = smov 1  }
 0x1a2   :  { %v406_v2 = vrot.slane %v381_v0, 7  ;;  %v407_v3 = vrot.slane %v7376_v1, 7  ;;  %v393_v4 = vrot.slane %v381_v0, 1  ;;  %v584_v7 = vld [vmem:[#allocation10] sm:$0xff]  ;;  %v585_v8 = vld [vmem:[#allocation10 + $0x8] sm:$0xff]  ;;  %v394_v12 = vrot.slane %v383_v9, 1 }
 0x1a3   :  { %v6032_v10 = vpack.c.bf16 %v585_v8, %v584_v7  ;;  %v586_v11 = vld [vmem:[#allocation10 + $0x10] sm:$0x3]  ;;  %v409_v13 = vrot.slane %v383_v9, 7  ;;  %v384_v14 = vld [vmem:[#allocation6 + $0x18] sm:$0xff]  ;;  %v385_v18 = vld [vmem:[#allocation8] sm:$0xff]  ;;  %v426_v38 = vrot.slane %v7376_v1, 5 }
 0x1a4   :  { %v408_v5 = vsel %vm405_vm0, %v406_v2, %v407_v3  ;;  %v434_v6 = vsel %vm405_vm0, %v393_v4, %v406_v2  ;;  %v410_v16 = vrot.slane %v384_v14, 7  ;;  %v395_v19 = vrot.slane %v385_v18, 1  ;;  %v386_v21 = vld [vmem:[#allocation8 + $0x8] sm:$0xff]  ;;  %v387_v25 = vld [vmem:[#allocation8 + $0x10] sm:$0xff]  ;;  %v388_v28 = vld [vmem:[#allocation8 + $0x18] sm:$0xff] }
 0x1a5   :  { %452 = vrot.lane.b32.xlu1 %v408_v5, %s6966_s19  ;;  %450 = vrot.lane.b32.xlu0 %v434_v6, %s6966_s19  ;;  %v435_v15 = vsel %vm405_vm0, %v394_v12, %v409_v13  ;;  %v412_v20 = vrot.slane %v385_v18, 7  ;;  %v413_v23 = vrot.slane %v386_v21, 7  ;;  %v396_v26 = vrot.slane %v387_v25, 1  ;;  %v896_v29 = vld [vmem:[#allocation10 + $0x30] sm:$0xff]  ;;  %v897_v30 = vld [vmem:[#allocation10 + $0x38] sm:$0xff]  ;;  %v622_v35 = vld [vmem:[#allocation10 + $0x20] sm:$0xff] }
 0x1a6   :  { %6033 = vmatprep.subr.bf16.mxu0 %v6032_v10  ;;  %v411_v17 = vsel %vm405_vm0, %v409_v13, %v410_v16  ;;  %v415_v27 = vrot.slane %v387_v25, 7  ;;  %v416_v32 = vrot.slane %v388_v28, 7  ;;  %v6036_v33 = vpack.c.bf16 %v897_v30, %v896_v29  ;;  %v621_v34 = vld [vmem:[#allocation10 + $0x18] sm:$0xff]  ;;  %v623_v39 = vld [vmem:[#allocation10 + $0x28] sm:$0x3] }
 0x1a7   :  { %6035 = vmatpush3.bf16.msra.mxu0 %v6032_v10  ;;  %v436_v22 = vsel %vm405_vm0, %v395_v19, %v412_v20  ;;  %v414_v24 = vsel %vm405_vm0, %v412_v20, %v413_v23  ;;  %v6028_v36 = vpack.c.bf16 %v622_v35, %v621_v34  ;;  %v438_v40 = vsel %vm405_vm0, %v407_v3, %v426_v38  ;;  %v898_v59 = vld [vmem:[#allocation10 + $0x40] sm:$0x3] }
 0x1a8   :  { %5728 = vmatprep.subr.msk.mxu0 %vm641_vm1, %v586_v11  ;;  %v437_v31 = vsel %vm405_vm0, %v396_v26, %v415_v27  ;;  %v417_v37 = vsel %vm405_vm0, %v415_v27, %v416_v32  ;;  %v427_v41 = vrot.slane %v384_v14, 5  ;;  %v428_v43 = vrot.slane %v386_v21, 5 }
 0x1a9   :  { %488 = vrot.lane.b32.xlu1 %v408_v5, %s6967_s20  ;;  %486 = vrot.lane.b32.xlu0 %v434_v6, %s6967_s20  ;;  %v429_v45 = vrot.slane %v388_v28, 5 }
 0x1aa   :  { %6029 = vmatprep.subr.bf16.mxu1 %v6028_v36  ;;  %v439_v42 = vsel %vm405_vm0, %v410_v16, %v427_v41  ;;  %v440_v44 = vsel %vm405_vm0, %v413_v23, %v428_v43 }
 0x1ab   :  { %5729 = vmatpush3.msk.msra.mxu0 %vm641_vm1, %v586_v11  ;;  %6031 = vmatpush3.bf16.msra.mxu1 %v6028_v36  ;;  %v441_v46 = vsel %vm405_vm0, %v416_v32, %v429_v45 }
 0x1ac   :  { %6037 = vmatprep.subr.bf16.mxu0 %v6036_v33  ;;  %5710 = vmatprep.subr.msk.mxu1 %vm641_vm1, %v623_v39 }
 0x1ad   :  { %524 = vrot.lane.b32.xlu1 %v408_v5, %s6968_s25  ;;  %522 = vrot.lane.b32.xlu0 %v434_v6, %s6968_s25 }
 0x1af   :  { %5711 = vmatpush3.msk.msra.mxu1 %vm641_vm1, %v623_v39 }
 0x1b1   :  { %492 = vrot.lane.b32.xlu1 %v435_v15, %s6967_s20  ;;  %456 = vrot.lane.b32.xlu0 %v435_v15, %s6966_s19 }
 0x1b5   :  { %494 = vrot.lane.b32.xlu1 %v411_v17, %s6967_s20  ;;  %458 = vrot.lane.b32.xlu0 %v411_v17, %s6966_s19 }
 0x1b9   :  { %530 = vrot.lane.b32.xlu1 %v411_v17, %s6968_s25  ;;  %528 = vrot.lane.b32.xlu0 %v435_v15, %s6968_s25 }
 0x1bd   :  { %498 = vrot.lane.b32.xlu1 %v436_v22, %s6967_s20  ;;  %462 = vrot.lane.b32.xlu0 %v436_v22, %s6966_s19 }
 0x1c1   :  { %500 = vrot.lane.b32.xlu1 %v414_v24, %s6967_s20  ;;  %464 = vrot.lane.b32.xlu0 %v414_v24, %s6966_s19 }
 0x1c5   :  { %536 = vrot.lane.b32.xlu1 %v414_v24, %s6968_s25  ;;  %534 = vrot.lane.b32.xlu0 %v436_v22, %s6968_s25 }
 0x1c9   :  { %504 = vrot.lane.b32.xlu1 %v437_v31, %s6967_s20  ;;  %468 = vrot.lane.b32.xlu0 %v437_v31, %s6966_s19 }
 0x1cd   :  { %506 = vrot.lane.b32.xlu1 %v417_v37, %s6967_s20  ;;  %470 = vrot.lane.b32.xlu0 %v417_v37, %s6966_s19 }
 0x1d1   :  { %454 = vrot.lane.b32.xlu1 %v438_v40, %s6966_s19  ;;  %540 = vrot.lane.b32.xlu0 %v437_v31, %s6968_s25 }
 0x1d5   :  { %542 = vrot.lane.b32.xlu1 %v417_v37, %s6968_s25  ;;  %490 = vrot.lane.b32.xlu0 %v438_v40, %s6967_s20 }
 0x1d9   :  { %460 = vrot.lane.b32.xlu1 %v439_v42, %s6966_s19  ;;  %526 = vrot.lane.b32.xlu0 %v438_v40, %s6968_s25 }
 0x1dd   :  { %532 = vrot.lane.b32.xlu1 %v439_v42, %s6968_s25  ;;  %496 = vrot.lane.b32.xlu0 %v439_v42, %s6967_s20 }
 0x1e1   :  { %502 = vrot.lane.b32.xlu1 %v440_v44, %s6967_s20  ;;  %466 = vrot.lane.b32.xlu0 %v440_v44, %s6966_s19 }
 0x1e5   :  { %538 = vrot.lane.b32.xlu0 %v440_v44, %s6968_s25  ;;  %472 = vrot.lane.b32.xlu1 %v441_v46, %s6966_s19 }
 0x1e9   :  { %508 = vrot.lane.b32.xlu0 %v441_v46, %s6967_s20  ;;  %544 = vrot.lane.b32.xlu1 %v441_v46, %s6968_s25 }
 0x217   :  { %v453_v47 = vpop.permute.xlu1 %452  ;;  %v451_v48 = vpop.permute.xlu0 %450 }
 0x21b   :  { %v489_v49 = vpop.permute.xlu1 %488  ;;  %v487_v50 = vpop.permute.xlu0 %486 }
 0x21c   :  { %v560_v51 = vsel %vm558_vm2, %v453_v47, %v489_v49  ;;  %v559_v52 = vsel %vm558_vm2, %v451_v48, %v487_v50 }
 0x21f   :  { %v525_v53 = vpop.permute.xlu1 %524  ;;  %v523_v54 = vpop.permute.xlu0 %522 }
 0x220   :  { %v7439_v55 = vsel %vm571_vm3, %v560_v51, %v525_v53  ;;  %v572_v56 = vsel %vm571_vm3, %v559_v52, %v523_v54 }
 0x221   :  { %v601_v57 = vrot.slane %v7439_v55, 1  ;;  %v600_v58 = vrot.slane %v572_v56, 1  ;;  %5730 = vmatprep.mubr.msk.f32.mxu0 %vm624_vm4, %v572_v56  ;;  %v876_v25 = vrot.slane %v7439_v55, 2  ;;  %v875_v26 = vrot.slane %v572_v56, 2 }
 0x222   :  { %5731 = vmatmul.mubr.msk.f32.vlgmr.msra.gmra.mrb[0].mxu0 %vm624_vm4, %v7439_v55 }
 0x223   :  { %v493_v60 = vpop.permute.xlu1 %492  ;;  %v457_v61 = vpop.permute.xlu0 %456  ;;  %v602_v62 = vsel %vm599_vm5, %v600_v58, %v601_v57  ;;  %6039 = vmatpush3.bf16.msra.mxu0 %v6036_v33  ;;  %v877_v31 = vsel %vm874_vm6, %v875_v26, %v876_v25 }
 0x224   :  { %5712 = vmatprep.mubr.msk.f32.mxu1 %vm624_vm4, %v602_v62  ;;  %5746 = vmatprep.subr.msk.mxu0 %vm641_vm1, %v898_v59  ;;  %v562_v1 = vsel %vm558_vm2, %v457_v61, %v493_v60 }
 0x227   :  { %v495_v63 = vpop.permute.xlu1 %494  ;;  %v459_v0 = vpop.permute.xlu0 %458  ;;  %5747 = vmatpush3.msk.msra.mxu0 %vm641_vm1, %v898_v59 }
 0x228   :  { %v563_v2 = vsel %vm558_vm2, %v459_v0, %v495_v63 }
 0x22b   :  { %v531_v3 = vpop.permute.xlu1 %530  ;;  %v529_v4 = vpop.permute.xlu0 %528 }
 0x22c   :  { %v7455_v5 = vsel %vm571_vm3, %v563_v2, %v531_v3  ;;  %v575_v6 = vsel %vm571_vm3, %v562_v1, %v529_v4 }
 0x22d   :  { %5733 = vmatprep.mubr.msk.f32.mxu0 %vm624_vm4, %v575_v6  ;;  %v606_v32 = vrot.slane %v7455_v5, 1  ;;  %v881_v36 = vrot.slane %v7455_v5, 2  ;;  %v605_v37 = vrot.slane %v575_v6, 1  ;;  %v880_v38 = vrot.slane %v575_v6, 2 }
 0x22e   :  { %5734 = vmatmul.mubr.msk.f32.gmra.mrb[2].mxu0 %vm624_vm4, %v7455_v5 }
 0x22f   :  { %v499_v7 = vpop.permute.xlu1 %498  ;;  %v463_v8 = vpop.permute.xlu0 %462  ;;  %v607_v48 = vsel %vm599_vm5, %v605_v37, %v606_v32  ;;  %v882_v49 = vsel %vm874_vm6, %v880_v38, %v881_v36 }
 0x230   :  { %v565_v11 = vsel %vm558_vm2, %v463_v8, %v499_v7 }
 0x233   :  { %v501_v9 = vpop.permute.xlu1 %500  ;;  %v465_v10 = vpop.permute.xlu0 %464 }
 0x234   :  { %v566_v12 = vsel %vm558_vm2, %v465_v10, %v501_v9 }
 0x237   :  { %v537_v13 = vpop.permute.xlu1 %536  ;;  %v535_v14 = vpop.permute.xlu0 %534 }
 0x238   :  { %v7464_v15 = vsel %vm571_vm3, %v566_v12, %v537_v13  ;;  %v578_v16 = vsel %vm571_vm3, %v565_v11, %v535_v14 }
 0x239   :  { %5736 = vmatprep.mubr.msk.f32.mxu0 %vm624_vm4, %v578_v16  ;;  %v611_v46 = vrot.slane %v7464_v15, 1  ;;  %v886_v50 = vrot.slane %v7464_v15, 2  ;;  %v610_v51 = vrot.slane %v578_v16, 1  ;;  %v885_v52 = vrot.slane %v578_v16, 2 }
 0x23a   :  { %5737 = vmatmul.mubr.msk.f32.gmra.mrb[4].mxu0 %vm624_vm4, %v7464_v15 }
 0x23b   :  { %v505_v17 = vpop.permute.xlu1 %504  ;;  %v469_v18 = vpop.permute.xlu0 %468  ;;  %v612_v60 = vsel %vm599_vm5, %v610_v51, %v611_v46  ;;  %v887_v61 = vsel %vm874_vm6, %v885_v52, %v886_v50 }
 0x23c   :  { %v568_v21 = vsel %vm558_vm2, %v469_v18, %v505_v17 }
 0x23f   :  { %v507_v19 = vpop.permute.xlu1 %506  ;;  %v471_v20 = vpop.permute.xlu0 %470 }
 0x240   :  { %v569_v27 = vsel %vm558_vm2, %v471_v20, %v507_v19  ;;  %v1081_v20 = vld [vmem:[#allocation28] sm:$0xff] }
 0x243   :  { %v455_v22 = vpop.permute.xlu1 %454  ;;  %v541_v23 = vpop.permute.xlu0 %540 }
 0x244   :  { %v7472_v24 = vsel %vm571_vm3, %v568_v21, %v541_v23  ;;  %v1082_v21 = vld [vmem:[#allocation28 + $0x8] sm:$0xff]  ;;  %v6969_v23 = vmov 0.0|0.0  }
 0x245   :  { %5739 = vmatprep.mubr.msk.f32.mxu0 %vm624_vm4, %v7472_v24  ;;  %v615_v6 = vrot.slane %v7472_v24, 1  ;;  %v890_v7 = vrot.slane %v7472_v24, 2  ;;  %6040 = vmatprep.subr.bf16.mxu0 %v6969_v23  ;;  %v1083_v24 = vld [vmem:[#allocation28 + $0x10] sm:$0xff] }
 0x246   :  { %6052 = vmatprep.subr.bf16.mxu1 %v6969_v23 }
 0x247   :  { %v543_v28 = vpop.permute.xlu1 %542  ;;  %v491_v29 = vpop.permute.xlu0 %490 }
 0x248   :  { %v7479_v30 = vsel %vm571_vm3, %v569_v27, %v543_v28  ;;  %v561_v33 = vsel %vm558_vm2, %v455_v22, %v491_v29  ;;  %v6041_v22 = vpack.c.bf16 %v1082_v21, %v1081_v20  ;;  %v1085_v27 = vld [vmem:[#allocation28 + $0x20] sm:$0xff]  ;;  %v1086_v28 = vld [vmem:[#allocation28 + $0x28] sm:$0xff] }
 0x249   :  { %5740 = vmatmul.mubr.msk.f32.gmra.mrb[6].mxu0 %vm624_vm4, %v7479_v30  ;;  %v616_v1 = vrot.slane %v7479_v30, 1  ;;  %v891_v2 = vrot.slane %v7479_v30, 2  ;;  %v6047_v29 = vpack.c.bf16 %v1086_v28, %v1085_v27  ;;  %v1087_v30 = vld [vmem:[#allocation28 + $0x30] sm:$0xff] }
 0x24a   :  { %5748 = vmatprep.mubr.msk.f32.mxu0 %vm624_vm4, %v877_v31  ;;  %v1088_v31 = vld [vmem:[#allocation28 + $0x38] sm:$0xff] }
 0x24b   :  { %v461_v34 = vpop.permute.xlu1 %460  ;;  %v527_v35 = vpop.permute.xlu0 %526  ;;  %v617_v13 = vsel %vm599_vm5, %v615_v6, %v616_v1  ;;  %v892_v14 = vsel %vm874_vm6, %v890_v7, %v891_v2 }
 0x24c   :  { %v574_v39 = vsel %vm571_vm3, %v561_v33, %v527_v35  ;;  %v6971_v33 = vmov 0.0  }
 0x24d   :  { %v603_v40 = vrot.slane %v574_v39, 1  ;;  %v878_v41 = vrot.slane %v574_v39, 2 }
 0x24f   :  { %v879_v42 = vsel %vm874_vm6, %v876_v25, %v878_v41  ;;  %v533_v43 = vpop.permute.xlu1 %532  ;;  %v497_v44 = vpop.permute.xlu0 %496  ;;  %v604_v45 = vsel %vm599_vm5, %v601_v57, %v603_v40  ;;  %v1084_v25 = vld [vmem:[#allocation28 + $0x18] sm:$0xff] }
 0x250   :  { %v564_v47 = vsel %vm558_vm2, %v461_v34, %v497_v44  ;;  %5713 = vmatmul.mubr.msk.f32.vlgmr.msra.gmra.mrb[0].mxu1 %vm624_vm4, %v604_v45  ;;  %5749 = vmatmul.mubr.msk.f32.vlgmr.msra.gmra.mrb[0].mxu0 %vm624_vm4, %v879_v42  ;;  %v6044_v26 = vpack.c.bf16 %v1084_v25, %v1083_v24 }
 0x251   :  { %v577_v53 = vsel %vm571_vm3, %v564_v47, %v533_v43  ;;  %5715 = vmatprep.mubr.msk.f32.mxu1 %vm624_vm4, %v607_v48  ;;  %5751 = vmatprep.mubr.msk.f32.mxu0 %vm624_vm4, %v882_v49 }
 0x252   :  { %v608_v54 = vrot.slane %v577_v53, 1  ;;  %v883_v55 = vrot.slane %v577_v53, 2  ;;  %6042 = vmatpush3.bf16.msra.mxu0 %v6041_v22  ;;  %6054 = vmatpush3.bf16.msra.mxu1 %v6041_v22 }
 0x253   :  { %v503_v56 = vpop.permute.xlu1 %502  ;;  %v467_v57 = vpop.permute.xlu0 %466  ;;  %6043 = vmatprep.subr.bf16.mxu0 %v6969_v23  ;;  %6055 = vmatprep.subr.bf16.mxu1 %v6969_v23 }
 0x254   :  { %v609_v58 = vsel %vm599_vm5, %v606_v32, %v608_v54  ;;  %v884_v59 = vsel %vm874_vm6, %v881_v36, %v883_v55  ;;  %v567_v62 = vsel %vm558_vm2, %v467_v57, %v503_v56  ;;  %v6050_v32 = vpack.c.bf16 %v1088_v31, %v1087_v30  ;;  %v5429_v36 = vld [vmem:[#allocation11] ss:$0 sm:$0xff] }
 0x255   :  { %5716 = vmatmul.mubr.msk.f32.gmra.mrb[2].mxu1 %vm624_vm4, %v609_v58  ;;  %5752 = vmatmul.mubr.msk.f32.gmra.mrb[2].mxu0 %vm624_vm4, %v884_v59 }
 0x256   :  { %5718 = vmatprep.mubr.msk.f32.mxu1 %vm624_vm4, %v612_v60  ;;  %5754 = vmatprep.mubr.msk.f32.mxu0 %vm624_vm4, %v887_v61 }
 0x257   :  { %v539_v63 = vpop.permute.xlu0 %538  ;;  %v473_v0 = vpop.permute.xlu1 %472  ;;  %6045 = vmatpush3.bf16.msra.mxu0 %v6044_v26  ;;  %6057 = vmatpush3.bf16.msra.mxu1 %v6044_v26 }
 0x258   :  { %v580_v3 = vsel %vm571_vm3, %v567_v62, %v539_v63  ;;  %6046 = vmatprep.subr.bf16.mxu0 %v6969_v23  ;;  %6058 = vmatprep.subr.bf16.mxu1 %v6969_v23 }
 0x259   :  { %v613_v4 = vrot.slane %v580_v3, 1  ;;  %v888_v5 = vrot.slane %v580_v3, 2 }
 0x25b   :  { %v509_v8 = vpop.permute.xlu0 %508  ;;  %v545_v9 = vpop.permute.xlu1 %544  ;;  %v614_v10 = vsel %vm599_vm5, %v611_v46, %v613_v4  ;;  %v889_v11 = vsel %vm874_vm6, %v886_v50, %v888_v5  ;;  %6048 = vmatpush3.bf16.msra.mxu0 %v6047_v29  ;;  %6060 = vmatpush3.bf16.msra.mxu1 %v6047_v29 }
 0x25c   :  { %v570_v12 = vsel %vm558_vm2, %v473_v0, %v509_v8  ;;  %5719 = vmatmul.mubr.msk.f32.gmra.mrb[4].mxu1 %vm624_vm4, %v614_v10  ;;  %5755 = vmatmul.mubr.msk.f32.gmra.mrb[4].mxu0 %vm624_vm4, %v889_v11 }
 0x25d   :  { %v583_v15 = vsel %vm571_vm3, %v570_v12, %v545_v9  ;;  %5721 = vmatprep.mubr.msk.f32.mxu1 %vm624_vm4, %v617_v13  ;;  %5757 = vmatprep.mubr.msk.f32.mxu0 %vm624_vm4, %v892_v14 }
 0x25e   :  { %v618_v16 = vrot.slane %v583_v15, 1  ;;  %v893_v17 = vrot.slane %v583_v15, 2  ;;  %6049 = vmatprep.subr.bf16.mxu0 %v6969_v23  ;;  %6061 = vmatprep.subr.bf16.mxu1 %v6969_v23 }
 0x25f   :  { %6051 = vmatpush3.bf16.msra.mxu0 %v6050_v32  ;;  %6063 = vmatpush3.bf16.msra.mxu1 %v6050_v32 }
 0x260   :  { %v619_v18 = vsel %vm599_vm5, %v616_v1, %v618_v16  ;;  %v894_v19 = vsel %vm874_vm6, %v891_v2, %v893_v17  ;;  %6112 = vmatprep.subr.bf16.mxu0 %v6969_v23 }
 0x261   :  { %5722 = vmatmul.mubr.msk.f32.gmra.mrb[6].mxu1 %vm624_vm4, %v619_v18  ;;  %5758 = vmatmul.mubr.msk.f32.gmra.mrb[6].mxu0 %vm624_vm4, %v894_v19 }
 0x262   :  { %5776 = vmatprep.mubr.msk.f32.mxu0 %vm6970_vm7, %v6971_v33  ;;  %5795 = vmatprep.mubr.msk.f32.mxu1 %vm6970_vm7, %v6971_v33 }
 0x323   :  { %v5714_v34 = vpop.f32.mrb[0].mxu1  ;;  %v5750_v35 = vpop.f32.mrb[0].mxu0 }
 0x324   :  { %v6289_v37 = vadd.f32 %v5750_v35, %v5714_v34  ;;  %v711_v38 = vpop.f32.mrb[1].mxu1  ;;  %v984_v39 = vpop.f32.mrb[1].mxu0 }
 0x325   :  { %v6290_v40 = vadd.f32 %v984_v39, %v711_v38 }
 0x326   :  { %v1039_v41 = vadd.f32 %v6289_v37, %v5429_v36 }
 0x327   :  { %v1038_v42 = vadd.f32 %v6290_v40, %v5429_v36  ;;  %v6972_v40 = vmov 1966171168  }
 0x328   :  { %v7544_v43 = vmax.f32 %v1039_v41, 0.0  ;;  %v5717_v44 = vpop.f32.mrb[2].mxu1  ;;  %v5753_v45 = vpop.f32.mrb[2].mxu0  ;;  %v1167_v41 = vunpack.c.l.s4 %v6972_v40 }
 0x329   :  { %v7546_v46 = vmax.f32 %v1038_v42, 0.0  ;;  %v6291_v47 = vadd.f32 %v5753_v45, %v5717_v44  ;;  %v721_v48 = vpop.f32.mrb[3].mxu1  ;;  %v994_v49 = vpop.f32.mrb[3].mxu0  ;;  %v1169_v42 = vlaneseq }
 0x32a   :  { %v6292_v50 = vadd.f32 %v994_v49, %v721_v48  ;;  %v1056_v52 = vsel %vm1054_vm8, %v7544_v43, 0.0  ;;  %v1168_v44 = vunpack.c.0.s8 %v1167_v41 }
 0x32b   :  { %v1041_v51 = vadd.f32 %v6291_v47, %v5429_v36  ;;  %v1055_v53 = vsel %vm1054_vm8, %v7546_v46, 0.0  ;;  %v7580_v45 = vshrl.u32 %v1169_v42, 7 }
 0x32c   :  { %v1040_v54 = vadd.f32 %v6292_v50, %v5429_v36  ;;  %v1057_v57 = vadd.f32 %v1056_v52, %v1055_v53 }
 0x32d   :  { %v7552_v55 = vmax.f32 %v1041_v51, 0.0  ;;  %v7583_v47 = vsub.s32 %v1168_v44, %v7580_v45  ;;  %v7587_v50 = vsub.s32 0, %v7580_v45 }
 0x32e   :  { %v7554_v56 = vmax.f32 %v1040_v54, 0.0 }
 0x32f   :  { %v5720_v58 = vpop.f32.mrb[4].mxu1  ;;  %v5756_v59 = vpop.f32.mrb[4].mxu0  ;;  %v1060_v2 = vsel %vm1054_vm8, %v7552_v55, 0.0 }
 0x330   :  { %v1058_v60 = vsel %vm1054_vm8, %v7554_v56, 0.0  ;;  %v6293_v61 = vadd.f32 %v5756_v59, %v5720_v58  ;;  %v731_v62 = vpop.f32.mrb[5].mxu1  ;;  %v1004_v63 = vpop.f32.mrb[5].mxu0 }
 0x331   :  { %v1059_v0 = vadd.f32 %v1058_v60, %v1057_v57  ;;  %v6294_v1 = vadd.f32 %v1004_v63, %v731_v62 }
 0x332   :  { %v1043_v3 = vadd.f32 %v6293_v61, %v5429_v36 }
 0x333   :  { %v1061_v4 = vadd.f32 %v1060_v2, %v1059_v0  ;;  %v1042_v5 = vadd.f32 %v6294_v1, %v5429_v36 }
 0x334   :  { %v7560_v6 = vmax.f32 %v1043_v3, 0.0  ;;  %v5723_v7 = vpop.f32.mrb[6].mxu1  ;;  %v5759_v8 = vpop.f32.mrb[6].mxu0 }
 0x335   :  { %v7562_v9 = vmax.f32 %v1042_v5, 0.0  ;;  %v6295_v10 = vadd.f32 %v5759_v8, %v5723_v7  ;;  %v741_v11 = vpop.f32.mrb[7].mxu1  ;;  %v1014_v12 = vpop.f32.mrb[7].mxu0  ;;  %v1062_v14 = vrot.slane %v1061_v4, 4 }
 0x336   :  { %v6296_v13 = vadd.f32 %v1014_v12, %v741_v11  ;;  %v1069_v16 = vsel %vm1054_vm8, %v7560_v6, 0.0 }
 0x337   :  { %v1045_v15 = vadd.f32 %v6295_v10, %v5429_v36  ;;  %v1068_v17 = vsel %vm1054_vm8, %v7562_v9, 0.0  ;;  %v1063_v21 = vadd.f32 %v1062_v14, %v1061_v4 }
 0x338   :  { %v1044_v18 = vadd.f32 %v6296_v13, %v5429_v36  ;;  %v1070_v22 = vadd.f32 %v1069_v16, %v1068_v17 }
 0x339   :  { %v7568_v19 = vmax.f32 %v1045_v15, 0.0  ;;  %v1064_v27 = vrot.slane %v1063_v21, 2 }
 0x33a   :  { %v7570_v20 = vmax.f32 %v1044_v18, 0.0 }
 0x33b   :  { %v1073_v26 = vsel %vm1054_vm8, %v7568_v19, 0.0  ;;  %v1065_v30 = vadd.f32 %v1064_v27, %v1063_v21 }
 0x33c   :  { %v1071_v24 = vsel %vm1054_vm8, %v7570_v20, 0.0 }
 0x33d   :  { %v1072_v25 = vadd.f32 %v1071_v24, %v1070_v22  ;;  %v1066_v35 = vrot.slane %v1065_v30, 1 }
 0x33f   :  { %v1074_v28 = vadd.f32 %v1073_v26, %v1072_v25  ;;  %v1067_v37 = vadd.f32 %v1066_v35, %v1065_v30 }
 0x341   :  { %v1075_v29 = vrot.slane %v1074_v28, 4 }
 0x343   :  { %v1076_v31 = vadd.f32 %v1075_v29, %v1074_v28 }
 0x345   :  { %v1077_v32 = vrot.slane %v1076_v31, 2 }
 0x347   :  { %v1078_v34 = vadd.f32 %v1077_v32, %v1076_v31 }
 0x349   :  { %v1079_v36 = vrot.slane %v1078_v34, 1 }
 0x34b   :  { %v1080_v38 = vadd.f32 %v1079_v36, %v1078_v34 }
 0x34d   :  { %v1092_v39 = vsel %vm1091_vm9, %v1080_v38, %v1067_v37 }
 0x34e   :  { %5777 = vmatmul.mubr.msk.f32.vlgmr.msra.gmra.mrb[8].mxu0 %vm1054_vm8, %v1092_v39 }
 0x34f   :  { %5920 = vmatprep.mubr.msk.f32.mxu0 %vm6970_vm7, %v6971_v33 }
 0x421   :  { %v1161_v48 = vpop.f32.mrb[8].mxu0 }
 0x422   :  { %v1172_v49 = vrot.slane %v1161_v48, %v7583_v47  ;;  %v5778_v51 = vpop.f32.mrb[9].mxu0 }
 0x424   :  { %v1173_v52 = vcombine.high %v1172_v49, %v1172_v49  ;;  %v1180_v53 = vrot.slane %v1172_v49, %v7583_v47 }
 0x426   :  { %v1187_v54 = vrot.slane %v1173_v52, %v7583_v47  ;;  %v1191_v57 = vrot.slane %v1180_v53, %v7587_v50 }
 0x428   :  { %v1195_v58 = vrot.slane %v1187_v54, %v7587_v50  ;;  %v1198_v59 = vsub.f32 %v7546_v46, %v1191_v57  ;;  %v1199_v60 = vsub.f32 %v7544_v43, %v1191_v57  ;;  %v1200_v61 = vsub.f32 %v7554_v56, %v1191_v57  ;;  %v5432_v54 = vld [vmem:[#allocation13] ss:$0 sm:$0xff] }
 0x429   :  { %v1201_v62 = vsub.f32 %v7552_v55, %v1191_v57 }
 0x42a   :  { %v1202_v63 = vsub.f32 %v7562_v9, %v1195_v58  ;;  %v1203_v0 = vsub.f32 %v7560_v6, %v1195_v58  ;;  %v1204_v1 = vsub.f32 %v7570_v20, %v1195_v58  ;;  %v1205_v2 = vsub.f32 %v7568_v19, %v1195_v58 }
 0x42b   :  { %v1206_v3 = vmul.f32 %v1198_v59, %v1198_v59  ;;  %v1207_v4 = vmul.f32 %v1199_v60, %v1199_v60  ;;  %v1208_v5 = vmul.f32 %v1200_v61, %v1200_v61  ;;  %v1209_v11 = vmul.f32 %v1201_v62, %v1201_v62  ;;  %v5433_v59 = vld [vmem:[#allocation14] ss:$0 sm:$0xff]  ;;  %v1653_v62 = vld [vmem:[#allocation16 + $0x48] sm:$0xff] }
 0x42c   :  { %v1210_v7 = vmul.f32 %v1202_v63, %v1202_v63  ;;  %v1211_v8 = vmul.f32 %v1203_v0, %v1203_v0  ;;  %v1212_v10 = vmul.f32 %v1204_v1, %v1204_v1  ;;  %v1213_v14 = vmul.f32 %v1205_v2, %v1205_v2  ;;  %v1654_v63 = vld [vmem:[#allocation16 + $0x50] sm:$0xff] }
 0x42d   :  { %v1214_v12 = vsel %vm1054_vm8, %v1206_v3, 0.0  ;;  %v1215_v13 = vsel %vm1054_vm8, %v1207_v4, 0.0  ;;  %v1217_v18 = vsel %vm1054_vm8, %v1208_v5, 0.0  ;;  %v1219_v25 = vsel %vm1054_vm8, %v1209_v11, 0.0 }
 0x42e   :  { %v1216_v15 = vadd.f32 %v1215_v13, %v1214_v12  ;;  %v1227_v16 = vsel %vm1054_vm8, %v1210_v7, 0.0  ;;  %v1228_v17 = vsel %vm1054_vm8, %v1211_v8, 0.0  ;;  %v1230_v24 = vsel %vm1054_vm8, %v1212_v10, 0.0  ;;  %v1656_v10 = vld [vmem:[#allocation16 + $0x60] sm:$0xff] }
 0x42f   :  { %v1229_v21 = vadd.f32 %v1228_v17, %v1227_v16  ;;  %v1232_v28 = vsel %vm1054_vm8, %v1213_v14, 0.0  ;;  %v6064_v3 = vpack.c.bf16 %v1654_v63, %v1653_v62 }
 0x430   :  { %v1218_v22 = vadd.f32 %v1217_v18, %v1216_v15 }
 0x431   :  { %v1231_v26 = vadd.f32 %v1230_v24, %v1229_v21  ;;  %6065 = vmatprep.subr.bf16.mxu1 %v6064_v3 }
 0x432   :  { %v1220_v27 = vadd.f32 %v1219_v25, %v1218_v22 }
 0x433   :  { %v1233_v29 = vadd.f32 %v1232_v28, %v1231_v26 }
 0x434   :  { %v1221_v30 = vrot.slane %v1220_v27, 4 }
 0x435   :  { %v1234_v31 = vrot.slane %v1233_v29, 4 }
 0x436   :  { %v1222_v32 = vadd.f32 %v1221_v30, %v1220_v27 }
 0x437   :  { %v1235_v34 = vadd.f32 %v1234_v31, %v1233_v29 }
 0x438   :  { %v1223_v35 = vrot.slane %v1222_v32, 2 }
 0x439   :  { %v1236_v36 = vrot.slane %v1235_v34, 2 }
 0x43a   :  { %v1224_v37 = vadd.f32 %v1223_v35, %v1222_v32 }
 0x43b   :  { %v1237_v38 = vadd.f32 %v1236_v36, %v1235_v34 }
 0x43c   :  { %v1225_v39 = vrot.slane %v1224_v37, 1 }
 0x43d   :  { %v1238_v40 = vrot.slane %v1237_v38, 1 }
 0x43e   :  { %v1226_v41 = vadd.f32 %v1225_v39, %v1224_v37 }
 0x43f   :  { %v1239_v42 = vadd.f32 %v1238_v40, %v1237_v38  ;;  %v1659_v40 = vld [vmem:[#allocation16 + $0x78] sm:$0xff] }
 0x441   :  { %v1242_v44 = vsel %vm1091_vm9, %v1239_v42, %v1226_v41 }
 0x442   :  { %5796 = vmatmul.mubr.msk.f32.vlgmr.msra.gmra.mrb[8].mxu1 %vm1054_vm8, %v1242_v44 }
 0x443   :  { %6067 = vmatpush3.bf16.msra.mxu1 %v6064_v3 }
 0x515   :  { %v1311_v49 = vpop.f32.mrb[8].mxu1 }
 0x516   :  { %v1315_v51 = vmax.f32 %v1311_v49, 0.0  ;;  %v5797_v52 = vpop.f32.mrb[9].mxu1 }
 0x518   :  { %v1316_v53 = vadd.f32 1e-05, %v1315_v51 }
 0x51a   :  { %6462 = vrsqrt.f32 %v1316_v53 }
 0x524   :  { %v6463_v57 = vpop.eup %6462 }
 0x525   :  { %v1325_v58 = vmul.f32 %v6463_v57, %v5432_v54 }
 0x527   :  { %v1327_v60 = vmul.f32 %v1325_v58, %v1161_v48  ;;  %v1342_v61 = vrot.slane %v1325_v58, %v7583_v47  ;;  %v1655_v48 = vld [vmem:[#allocation16 + $0x58] sm:$0xff]  ;;  %v1661_v58 = vld [vmem:[#allocation16 + $0x88] sm:$0xff] }
 0x528   :  { %v6068_v14 = vpack.c.bf16 %v1656_v10, %v1655_v48 }
 0x529   :  { %v1334_v0 = vsub.f32 %v5433_v59, %v1327_v60  ;;  %v1343_v1 = vcombine.high %v1342_v61, %v1342_v61  ;;  %v1350_v2 = vrot.slane %v1342_v61, %v7583_v47 }
 0x52a   :  { %6069 = vmatprep.subr.bf16.mxu1 %v6068_v14 }
 0x52b   :  { %v1357_v4 = vrot.slane %v1343_v1, %v7583_v47  ;;  %v1383_v5 = vrot.slane %v1334_v0, %v7583_v47  ;;  %v1361_v7 = vrot.slane %v1350_v2, %v7587_v50  ;;  %6071 = vmatpush3.bf16.msra.mxu1 %v6068_v14 }
 0x52d   :  { %v1391_v8 = vrot.slane %v1383_v5, %v7583_v47  ;;  %v1368_v11 = vmul.f32 %v1361_v7, %v7546_v46  ;;  %v1369_v12 = vmul.f32 %v1361_v7, %v7544_v43  ;;  %v1384_v13 = vcombine.high %v1383_v5, %v1383_v5  ;;  %v1657_v46 = vld [vmem:[#allocation16 + $0x68] sm:$0xff]  ;;  %v1658_v43 = vld [vmem:[#allocation16 + $0x70] sm:$0xff] }
 0x52e   :  { %v1370_v16 = vmul.f32 %v1361_v7, %v7554_v56  ;;  %v1371_v17 = vmul.f32 %v1361_v7, %v7552_v55  ;;  %v1365_v18 = vrot.slane %v1357_v4, %v7587_v50  ;;  %v6072_v28 = vpack.c.bf16 %v1658_v43, %v1657_v46  ;;  %v1611_v4 = vld [vmem:[#allocation16] sm:$0xff]  ;;  %v1612_v5 = vld [vmem:[#allocation16 + $0x8] sm:$0xff] }
 0x52f   :  { %v1402_v15 = vrot.slane %v1391_v8, %v7587_v50  ;;  %v1398_v21 = vrot.slane %v1384_v13, %v7583_v47  ;;  %v6080_v7 = vpack.c.bf16 %v1612_v5, %v1611_v4 }
 0x530   :  { %v1372_v55 = vmul.f32 %v1365_v18, %v7562_v9  ;;  %v1373_v34 = vmul.f32 %v1365_v18, %v7560_v6  ;;  %6073 = vmatprep.subr.bf16.mxu1 %v6072_v28  ;;  %v1374_v38 = vmul.f32 %v1365_v18, %v7570_v20  ;;  %v1375_v39 = vmul.f32 %v1365_v18, %v7568_v19  ;;  %v1660_v6 = vld [vmem:[#allocation16 + $0x80] sm:$0xff] }
 0x531   :  { %v1409_v22 = vadd.f32 %v1402_v15, %v1368_v11  ;;  %v1410_v24 = vadd.f32 %v1402_v15, %v1369_v12  ;;  %v1411_v25 = vadd.f32 %v1402_v15, %v1370_v16  ;;  %v1412_v26 = vadd.f32 %v1402_v15, %v1371_v17  ;;  %6075 = vmatpush3.bf16.msra.mxu1 %v6072_v28 }
 0x532   :  { %v1406_v27 = vrot.slane %v1398_v21, %v7587_v50  ;;  %v6076_v51 = vpack.c.bf16 %v1660_v6, %v1659_v40 }
 0x533   :  { %v1433_v29 = vrot.slane %v1409_v22, 7  ;;  %v1434_v30 = vrot.slane %v1410_v24, 7  ;;  %v1421_v56 = vrot.slane %v1409_v22, 1  ;;  %v1436_v31 = vrot.slane %v1411_v25, 7 }
 0x534   :  { %v1437_v32 = vrot.slane %v1412_v26, 7  ;;  %v1413_v37 = vadd.f32 %v1406_v27, %v1372_v55  ;;  %v1414_v41 = vadd.f32 %v1406_v27, %v1373_v34  ;;  %v1415_v44 = vadd.f32 %v1406_v27, %v1374_v38  ;;  %6077 = vmatprep.subr.bf16.mxu1 %v6076_v51 }
 0x535   :  { %v1435_v35 = vsel %vm405_vm0, %v1433_v29, %v1434_v30  ;;  %v1461_v36 = vsel %vm405_vm0, %v1421_v56, %v1433_v29  ;;  %v1416_v49 = vadd.f32 %v1406_v27, %v1375_v39  ;;  %v1453_v52 = vrot.slane %v1410_v24, 5  ;;  %6079 = vmatpush3.bf16.msra.mxu1 %v6076_v51 }
 0x536   :  { %1479 = vrot.lane.b32.xlu1 %v1435_v35, %s6973_s26  ;;  %1477 = vrot.lane.b32.xlu0 %v1461_v36, %s6973_s26  ;;  %v1438_v9 = vsel %vm405_vm0, %v1436_v31, %v1437_v32  ;;  %v1439_v42 = vrot.slane %v1413_v37, 7  ;;  %v1440_v53 = vrot.slane %v1414_v41, 7  ;;  %v1442_v20 = vrot.slane %v1415_v44, 7 }
 0x537   :  { %v1443_v54 = vrot.slane %v1416_v49, 7  ;;  %v1465_v59 = vsel %vm405_vm0, %v1434_v30, %v1453_v52  ;;  %5814 = vmatprep.subr.mxu1 %v1661_v58  ;;  %v1422_v60 = vrot.slane %v1411_v25, 1  ;;  %v1454_v62 = vrot.slane %v1412_v26, 5  ;;  %v1617_v52 = vld [vmem:[#allocation16 + $0x30] sm:$0xff] }
 0x538   :  { %v1441_v57 = vsel %vm405_vm0, %v1439_v42, %v1440_v53  ;;  %v1423_v0 = vrot.slane %v1413_v37, 1  ;;  %v1455_v2 = vrot.slane %v1414_v41, 5  ;;  %v1424_v8 = vrot.slane %v1415_v44, 1  ;;  %v1615_v41 = vld [vmem:[#allocation16 + $0x20] sm:$0xff] }
 0x539   :  { %v1444_v19 = vsel %vm405_vm0, %v1442_v20, %v1443_v54  ;;  %5815 = vmatpush3.msra.mxu1 %v1661_v58  ;;  %v1462_v61 = vsel %vm405_vm0, %v1422_v60, %v1436_v31  ;;  %v1466_v63 = vsel %vm405_vm0, %v1437_v32, %v1454_v62  ;;  %v1456_v10 = vrot.slane %v1416_v49, 5  ;;  %v1613_v31 = vld [vmem:[#allocation16 + $0x10] sm:$0xff]  ;;  %v1614_v32 = vld [vmem:[#allocation16 + $0x18] sm:$0xff] }
 0x53a   :  { %1515 = vrot.lane.b32.xlu1 %v1435_v35, %s6955_s23  ;;  %1513 = vrot.lane.b32.xlu0 %v1461_v36, %s6955_s23  ;;  %v1463_v1 = vsel %vm405_vm0, %v1423_v0, %v1439_v42  ;;  %v1467_v3 = vsel %vm405_vm0, %v1440_v53, %v1455_v2  ;;  %v1464_v48 = vsel %vm405_vm0, %v1424_v8, %v1442_v20  ;;  %v1616_v42 = vld [vmem:[#allocation16 + $0x28] sm:$0xff]  ;;  %v1618_v53 = vld [vmem:[#allocation16 + $0x38] sm:$0xff]  ;;  %v1926_v2 = vld [vmem:[#allocation16 + $0x90] sm:$0xff] }
 0x53b   :  { %6081 = vmatprep.subr.bf16.mxu1 %v6080_v7  ;;  %v1468_v11 = vsel %vm405_vm0, %v1443_v54, %v1456_v10  ;;  %v6084_v38 = vpack.c.bf16 %v1614_v32, %v1613_v31  ;;  %v6088_v44 = vpack.c.bf16 %v1616_v42, %v1615_v41  ;;  %v6092_v20 = vpack.c.bf16 %v1618_v53, %v1617_v52 }
 0x53e   :  { %1517 = vrot.lane.b32.xlu1 %v1465_v59, %s6955_s23  ;;  %1481 = vrot.lane.b32.xlu0 %v1465_v59, %s6973_s26 }
 0x542   :  { %1551 = vrot.lane.b32.xlu1 %v1435_v35, %s6974_s22  ;;  %1549 = vrot.lane.b32.xlu0 %v1461_v36, %s6974_s22 }
 0x546   :  { %1483 = vrot.lane.b32.xlu1 %v1462_v61, %s6973_s26  ;;  %1553 = vrot.lane.b32.xlu0 %v1465_v59, %s6974_s22 }
 0x54a   :  { %1519 = vrot.lane.b32.xlu1 %v1462_v61, %s6955_s23  ;;  %1485 = vrot.lane.b32.xlu0 %v1438_v9, %s6973_s26 }
 0x54e   :  { %1487 = vrot.lane.b32.xlu1 %v1466_v63, %s6973_s26  ;;  %1521 = vrot.lane.b32.xlu0 %v1438_v9, %s6955_s23 }
 0x552   :  { %1555 = vrot.lane.b32.xlu1 %v1462_v61, %s6974_s22  ;;  %1523 = vrot.lane.b32.xlu0 %v1466_v63, %s6955_s23 }
 0x556   :  { %1559 = vrot.lane.b32.xlu1 %v1466_v63, %s6974_s22  ;;  %1557 = vrot.lane.b32.xlu0 %v1438_v9, %s6974_s22  ;;  %v1619_v63 = vld [vmem:[#allocation16 + $0x40] sm:$0xff] }
 0x55a   :  { %1491 = vrot.lane.b32.xlu1 %v1441_v57, %s6973_s26  ;;  %1489 = vrot.lane.b32.xlu0 %v1463_v1, %s6973_s26 }
 0x55e   :  { %1527 = vrot.lane.b32.xlu1 %v1441_v57, %s6955_s23  ;;  %1525 = vrot.lane.b32.xlu0 %v1463_v1, %s6955_s23 }
 0x562   :  { %1529 = vrot.lane.b32.xlu1 %v1467_v3, %s6955_s23  ;;  %1493 = vrot.lane.b32.xlu0 %v1467_v3, %s6973_s26 }
 0x566   :  { %1563 = vrot.lane.b32.xlu1 %v1441_v57, %s6974_s22  ;;  %1561 = vrot.lane.b32.xlu0 %v1463_v1, %s6974_s22 }
 0x56a   :  { %1495 = vrot.lane.b32.xlu1 %v1464_v48, %s6973_s26  ;;  %1565 = vrot.lane.b32.xlu0 %v1467_v3, %s6974_s22  ;;  %v1927_v3 = vld [vmem:[#allocation16 + $0x98] sm:$0xff] }
 0x56e   :  { %1531 = vrot.lane.b32.xlu1 %v1464_v48, %s6955_s23  ;;  %1497 = vrot.lane.b32.xlu0 %v1444_v19, %s6973_s26 }
 0x572   :  { %1499 = vrot.lane.b32.xlu1 %v1468_v11, %s6973_s26  ;;  %1533 = vrot.lane.b32.xlu0 %v1444_v19, %s6955_s23 }
 0x576   :  { %1567 = vrot.lane.b32.xlu1 %v1464_v48, %s6974_s22  ;;  %1535 = vrot.lane.b32.xlu0 %v1468_v11, %s6955_s23  ;;  %s6886_s23 = scalar_lea.hbm %s8399_s21, 4096 }
 0x577   :  { %p6887_p12 = scmp.ne.s32.totalorder %s8399_s21, %s6886_s23  ;;  %p6890_p13 = scmp.lt.u32.totalorder %s6886_s23, %s8399_s21 }
 0x579   :  { %p6892_p0 = pnand %p6890_p13, %p6887_p12 }
 0x57a   :  { %1571 = vrot.lane.b32.xlu1 %v1468_v11, %s6974_s22  ;;  %1569 = vrot.lane.b32.xlu0 %v1444_v19, %s6974_s22 }
 0x5a8   :  { %v1480_v12 = vpop.permute.xlu1 %1479  ;;  %v1478_v13 = vpop.permute.xlu0 %1477 }
 0x5ac   :  { %v1516_v14 = vpop.permute.xlu1 %1515  ;;  %v1514_v15 = vpop.permute.xlu0 %1513 }
 0x5ad   :  { %v1587_v18 = vsel %vm1585_vm10, %v1480_v12, %v1516_v14  ;;  %v1586_v21 = vsel %vm1585_vm10, %v1478_v13, %v1514_v15  ;;  %v6096_v12 = vpack.c.bf16 %v1927_v3, %v1926_v2  ;;  %v1931_v2 = vld [vmem:[#allocation16 + $0xb8] sm:$0xff] }
 0x5b0   :  { %v1518_v16 = vpop.permute.xlu1 %1517  ;;  %v1482_v17 = vpop.permute.xlu0 %1481 }
 0x5b1   :  { %v1588_v29 = vsel %vm1585_vm10, %v1482_v17, %v1518_v16 }
 0x5b4   :  { %v1552_v22 = vpop.permute.xlu1 %1551  ;;  %v1550_v24 = vpop.permute.xlu0 %1549 }
 0x5b5   :  { %v7680_v25 = vsel %vm1598_vm11, %v1587_v18, %v1552_v22  ;;  %v7683_v26 = vsel %vm1598_vm11, %v1586_v21, %v1550_v24 }
 0x5b6   :  { %v1633_v46 = vrot.slane %v7680_v25, 1  ;;  %v1906_v43 = vrot.slane %v7680_v25, 2  ;;  %v1632_v27 = vrot.slane %v7683_v26, 1  ;;  %v1905_v28 = vrot.slane %v7683_v26, 2 }
 0x5b8   :  { %v1484_v30 = vpop.permute.xlu1 %1483  ;;  %v1554_v56 = vpop.permute.xlu0 %1553  ;;  %v1634_v55 = vsel %vm599_vm5, %v1632_v27, %v1633_v46  ;;  %v7692_v34 = vsel %vm874_vm6, %v1905_v28, %v1906_v43 }
 0x5b9   :  { %v1601_v35 = vsel %vm1598_vm11, %v1588_v29, %v1554_v56  ;;  %5816 = vmatprep.mubr.msk.f32.mxu1 %vm1662_vm12, %v1634_v55 }
 0x5ba   :  { %v1635_v36 = vrot.slane %v1601_v35, 1  ;;  %v1908_v37 = vrot.slane %v1601_v35, 2 }
 0x5bc   :  { %v7697_v9 = vsel %vm874_vm6, %v1906_v43, %v1908_v37  ;;  %v1520_v39 = vpop.permute.xlu1 %1519  ;;  %v1486_v40 = vpop.permute.xlu0 %1485  ;;  %v1636_v6 = vsel %vm599_vm5, %v1633_v46, %v1635_v36 }
 0x5bd   :  { %5817 = vmatmul.mubr.msk.f32.vlgmr.msra.gmra.mrb[10].mxu1 %vm1662_vm12, %v1636_v6  ;;  %v1589_v19 = vsel %vm1585_vm10, %v1484_v30, %v1520_v39 }
 0x5be   :  { %6083 = vmatpush3.bf16.msra.mxu1 %v6080_v7 }
 0x5bf   :  { %6085 = vmatprep.subr.bf16.mxu1 %v6084_v38 }
 0x5c0   :  { %v1488_v49 = vpop.permute.xlu1 %1487  ;;  %v1522_v51 = vpop.permute.xlu0 %1521 }
 0x5c1   :  { %v1590_v59 = vsel %vm1585_vm10, %v1486_v40, %v1522_v51 }
 0x5c2   :  { %6087 = vmatpush3.bf16.msra.mxu1 %v6084_v38 }
 0x5c3   :  { %6089 = vmatprep.subr.bf16.mxu1 %v6088_v44 }
 0x5c4   :  { %v1556_v54 = vpop.permute.xlu1 %1555  ;;  %v1524_v57 = vpop.permute.xlu0 %1523 }
 0x5c5   :  { %v7703_v58 = vsel %vm1598_vm11, %v1589_v19, %v1556_v54  ;;  %v1591_v60 = vsel %vm1585_vm10, %v1488_v49, %v1524_v57 }
 0x5c6   :  { %6091 = vmatpush3.bf16.msra.mxu1 %v6088_v44  ;;  %v1637_v4 = vrot.slane %v7703_v58, 1 }
 0x5c7   :  { %6093 = vmatprep.subr.bf16.mxu1 %v6092_v20 }
 0x5c8   :  { %v1560_v61 = vpop.permute.xlu1 %1559  ;;  %v1558_v62 = vpop.permute.xlu0 %1557 }
 0x5c9   :  { %v7708_v0 = vsel %vm1598_vm11, %v1591_v60, %v1560_v61  ;;  %v7711_v1 = vsel %vm1598_vm11, %v1590_v59, %v1558_v62  ;;  %v1928_v60 = vld [vmem:[#allocation16 + $0xa0] sm:$0xff]  ;;  %v1929_v61 = vld [vmem:[#allocation16 + $0xa8] sm:$0xff] }
 0x5ca   :  { %v1640_v5 = vrot.slane %v7708_v0, 1  ;;  %v1638_v7 = vrot.slane %v7711_v1, 1  ;;  %6095 = vmatpush3.bf16.msra.mxu1 %v6092_v20  ;;  %v6100_v62 = vpack.c.bf16 %v1929_v61, %v1928_v60 }
 0x5cb   :  { %5844 = vmatprep.subr.mxu1 %v1619_v63 }
 0x5cc   :  { %v1492_v8 = vpop.permute.xlu1 %1491  ;;  %v1490_v48 = vpop.permute.xlu0 %1489  ;;  %v1639_v10 = vsel %vm599_vm5, %v1637_v4, %v1638_v7  ;;  %v1641_v11 = vsel %vm599_vm5, %v1638_v7, %v1640_v5  ;;  %v1932_v4 = vld [vmem:[#allocation16 + $0xc0] sm:$0xff]  ;;  %v1933_v5 = vld [vmem:[#allocation16 + $0xc8] sm:$0xff]  ;;  %v1911_v7 = vrot.slane %v7711_v1, 2 }
 0x5cd   :  { %5819 = vmatprep.mubr.msk.f32.mxu1 %vm1662_vm12, %v1639_v10 }
 0x5ce   :  { %5820 = vmatmul.mubr.msk.f32.gmra.mrb[12].mxu1 %vm1662_vm12, %v1641_v11 }
 0x5cf   :  { %5845 = vmatpush3.msra.mxu1 %v1619_v63  ;;  %v1930_v63 = vld [vmem:[#allocation16 + $0xb0] sm:$0xff] }
 0x5d0   :  { %v1528_v13 = vpop.permute.xlu1 %1527  ;;  %v1526_v14 = vpop.permute.xlu0 %1525  ;;  %6097 = vmatprep.subr.bf16.mxu1 %v6096_v12  ;;  %v6104_v3 = vpack.c.bf16 %v1931_v2, %v1930_v63 }
 0x5d1   :  { %v1593_v17 = vsel %vm1585_vm10, %v1492_v8, %v1528_v13  ;;  %v1592_v18 = vsel %vm1585_vm10, %v1490_v48, %v1526_v14  ;;  %v1910_v8 = vrot.slane %v7703_v58, 2  ;;  %v1913_v48 = vrot.slane %v7708_v0, 2 }
 0x5d4   :  { %v1530_v15 = vpop.permute.xlu1 %1529  ;;  %v1494_v16 = vpop.permute.xlu0 %1493 }
 0x5d5   :  { %v1594_v28 = vsel %vm1585_vm10, %v1494_v16, %v1530_v15 }
 0x5d8   :  { %v1564_v21 = vpop.permute.xlu1 %1563  ;;  %v1562_v22 = vpop.permute.xlu0 %1561 }
 0x5d9   :  { %v7723_v24 = vsel %vm1598_vm11, %v1593_v17, %v1564_v21  ;;  %v7726_v46 = vsel %vm1598_vm11, %v1592_v18, %v1562_v22  ;;  %v2105_v17 = vld [vmem:[#allocation29] sm:$0xff]  ;;  %v2106_v18 = vld [vmem:[#allocation29 + $0x8] sm:$0xff]  ;;  %v2107_v22 = vld [vmem:[#allocation29 + $0x10] sm:$0xff] }
 0x5da   :  { %v1643_v43 = vrot.slane %v7723_v24, 1  ;;  %v1642_v27 = vrot.slane %v7726_v46, 1  ;;  %v1916_v10 = vrot.slane %v7723_v24, 2  ;;  %v1915_v11 = vrot.slane %v7726_v46, 2 }
 0x5db   :  { %v7791_v21 = vpack.c.bf16 %v2106_v18, %v2105_v17 }
 0x5dc   :  { %v1496_v29 = vpop.permute.xlu1 %1495  ;;  %v1566_v30 = vpop.permute.xlu0 %1565  ;;  %v1644_v56 = vsel %vm599_vm5, %v1642_v27, %v1643_v43  ;;  %v1917_v0 = vsel %vm874_vm6, %v1915_v11, %v1916_v10  ;;  %v2110_v27 = vld [vmem:[#allocation29 + $0x28] sm:$0xff] }
 0x5dd   :  { %v7733_v55 = vsel %vm1598_vm11, %v1594_v28, %v1566_v30  ;;  %5822 = vmatprep.mubr.msk.f32.mxu1 %vm1662_vm12, %v1644_v56  ;;  %6114 = vmatpush3.bf16.msra.mxu0 %v7791_v21  ;;  %v2112_v30 = vld [vmem:[#allocation29 + $0x38] sm:$0xff] }
 0x5de   :  { %v1645_v31 = vrot.slane %v7733_v55, 1  ;;  %6115 = vmatprep.subr.bf16.mxu0 %v6969_v23 }
 0x5e0   :  { %v1532_v32 = vpop.permute.xlu1 %1531  ;;  %v1498_v35 = vpop.permute.xlu0 %1497  ;;  %v1646_v36 = vsel %vm599_vm5, %v1643_v43, %v1645_v31  ;;  %v2109_v43 = vld [vmem:[#allocation29 + $0x20] sm:$0xff]  ;;  %v2114_v31 = vld [vmem:[#allocation29 + $0x48] sm:$0xff] }
 0x5e1   :  { %5823 = vmatmul.mubr.msk.f32.gmra.mrb[14].mxu1 %vm1662_vm12, %v1646_v36  ;;  %v1595_v6 = vsel %vm1585_vm10, %v1496_v29, %v1532_v32  ;;  %v7799_v28 = vpack.c.bf16 %v2110_v27, %v2109_v43  ;;  %v2111_v29 = vld [vmem:[#allocation29 + $0x30] sm:$0xff]  ;;  %v2116_v36 = vld [vmem:[#allocation29 + $0x58] sm:$0xff] }
 0x5e2   :  { %v7803_v56 = vpack.c.bf16 %v2112_v30, %v2111_v29 }
 0x5e4   :  { %v1500_v37 = vpop.permute.xlu1 %1499  ;;  %v1534_v38 = vpop.permute.xlu0 %1533 }
 0x5e5   :  { %v1596_v42 = vsel %vm1585_vm10, %v1498_v35, %v1534_v38  ;;  %v2115_v35 = vld [vmem:[#allocation29 + $0x50] sm:$0xff]  ;;  %v2117_v38 = vld [vmem:[#allocation29 + $0x60] sm:$0xff] }
 0x5e8   :  { %v1568_v39 = vpop.permute.xlu1 %1567  ;;  %v1536_v40 = vpop.permute.xlu0 %1535 }
 0x5e9   :  { %v7741_v41 = vsel %vm1598_vm11, %v1595_v6, %v1568_v39  ;;  %v1597_v44 = vsel %vm1585_vm10, %v1500_v37, %v1536_v40  ;;  %v7811_v37 = vpack.c.bf16 %v2116_v36, %v2115_v35  ;;  %v2118_v39 = vld [vmem:[#allocation29 + $0x68] sm:$0xff]  ;;  %v2119_v6 = vld [vmem:[#allocation29 + $0x70] sm:$0xff] }
 0x5ea   :  { %v1647_v20 = vrot.slane %v7741_v41, 1  ;;  %v1920_v13 = vrot.slane %v7741_v41, 2  ;;  %v7814_v40 = vpack.c.bf16 %v2118_v39, %v2117_v38 }
 0x5ec   :  { %v1572_v49 = vpop.permute.xlu1 %1571  ;;  %v1570_v51 = vpop.permute.xlu0 %1569 }
 0x5ed   :  { %v1610_v52 = vsel %vm1598_vm11, %v1597_v44, %v1572_v49  ;;  %v1609_v53 = vsel %vm1598_vm11, %v1596_v42, %v1570_v51  ;;  %v5458_v44 = vld [vmem:[#allocation17] ss:$0 sm:$0xff] }
 0x5ee   :  { %v1650_v54 = vrot.slane %v1610_v52, 1  ;;  %v1648_v57 = vrot.slane %v1609_v53, 1 }
 0x5f0   :  { %v1649_v19 = vsel %vm599_vm5, %v1647_v20, %v1648_v57  ;;  %v1651_v59 = vsel %vm599_vm5, %v1648_v57, %v1650_v54 }
 0x5f1   :  { %5825 = vmatprep.mubr.msk.f32.mxu1 %vm1662_vm12, %v1649_v19 }
 0x5f2   :  { %5826 = vmatmul.mubr.msk.f32.gmra.mrb[16].mxu1 %vm1662_vm12, %v1651_v59 }
 0x5f3   :  { %5846 = vmatprep.mubr.msk.f32.mxu1 %vm1662_vm12, %v7683_v26  ;;  %v6108_v26 = vpack.c.bf16 %v1933_v5, %v1932_v4 }
 0x5f6   :  { %5847 = vmatmul.mubr.msk.f32.vlgmr.msra.gmra.mrb[10].mxu1 %vm1662_vm12, %v7680_v25  ;;  %v1934_v25 = vld [vmem:[#allocation16 + $0xd0] sm:$0xff] }
 0x5f7   :  { %6099 = vmatpush3.bf16.msra.mxu1 %v6096_v12  ;;  %5849 = vmatprep.mubr.msk.f32.mxu1 %vm1662_vm12, %v7703_v58  ;;  %v1912_v12 = vsel %vm874_vm6, %v1910_v8, %v1911_v7  ;;  %v1914_v58 = vsel %vm874_vm6, %v1911_v7, %v1913_v48 }
 0x5f8   :  { %6101 = vmatprep.subr.bf16.mxu1 %v6100_v62 }
 0x5fa   :  { %5850 = vmatmul.mubr.msk.f32.gmra.mrb[12].mxu1 %vm1662_vm12, %v7711_v1  ;;  %v1921_v1 = vrot.slane %v1609_v53, 2 }
 0x5fb   :  { %6103 = vmatpush3.bf16.msra.mxu1 %v6100_v62  ;;  %5852 = vmatprep.mubr.msk.f32.mxu1 %vm1662_vm12, %v7726_v46 }
 0x5fc   :  { %6105 = vmatprep.subr.bf16.mxu1 %v6104_v3  ;;  %v1922_v15 = vsel %vm874_vm6, %v1920_v13, %v1921_v1 }
 0x5fe   :  { %5853 = vmatmul.mubr.msk.f32.gmra.mrb[14].mxu1 %vm1662_vm12, %v7723_v24  ;;  %v2108_v24 = vld [vmem:[#allocation29 + $0x18] sm:$0xff] }
 0x5ff   :  { %6107 = vmatpush3.bf16.msra.mxu1 %v6104_v3  ;;  %5855 = vmatprep.mubr.msk.f32.mxu1 %vm1662_vm12, %v7741_v41  ;;  %v7795_v46 = vpack.c.bf16 %v2108_v24, %v2107_v22  ;;  %v2120_v41 = vld [vmem:[#allocation29 + $0x78] sm:$0xff] }
 0x600   :  { %6109 = vmatprep.subr.bf16.mxu1 %v6108_v26  ;;  %v7818_v42 = vpack.c.bf16 %v2120_v41, %v2119_v6 }
 0x601   :  { %6117 = vmatpush3.bf16.msra.mxu0 %v7795_v46 }
 0x602   :  { %5856 = vmatmul.mubr.msk.f32.gmra.mrb[16].mxu1 %vm1662_vm12, %v1609_v53  ;;  %6118 = vmatprep.subr.bf16.mxu0 %v6969_v23 }
 0x603   :  { %6111 = vmatpush3.bf16.msra.mxu1 %v6108_v26  ;;  %5876 = vmatprep.mubr.msk.f32.mxu1 %vm1662_vm12, %v7692_v34  ;;  %v1918_v34 = vrot.slane %v7733_v55, 2  ;;  %v2113_v55 = vld [vmem:[#allocation29 + $0x40] sm:$0xff] }
 0x604   :  { %5874 = vmatprep.subr.mxu1 %v1934_v25  ;;  %v7807_v32 = vpack.c.bf16 %v2114_v31, %v2113_v55 }
 0x605   :  { %v1919_v14 = vsel %vm874_vm6, %v1916_v10, %v1918_v34  ;;  %6120 = vmatpush3.bf16.msra.mxu0 %v7799_v28 }
 0x606   :  { %6121 = vmatprep.subr.bf16.mxu0 %v6969_v23 }
 0x607   :  { %5875 = vmatpush3.msra.mxu1 %v1934_v25 }
 0x608   :  { %5877 = vmatmul.mubr.msk.f32.vlgmr.msra.gmra.mrb[10].mxu1 %vm1662_vm12, %v7697_v9  ;;  %6160 = vmatprep.subr.bf16.mxu1 %v6969_v23  ;;  %v1923_v9 = vrot.slane %v1610_v52, 2 }
 0x609   :  { %5879 = vmatprep.mubr.msk.f32.mxu1 %vm1662_vm12, %v1912_v12  ;;  %6123 = vmatpush3.bf16.msra.mxu0 %v7803_v56 }
 0x60a   :  { %v1924_v16 = vsel %vm874_vm6, %v1921_v1, %v1923_v9  ;;  %6124 = vmatprep.subr.bf16.mxu0 %v6969_v23 }
 0x60c   :  { %5880 = vmatmul.mubr.msk.f32.gmra.mrb[12].mxu1 %vm1662_vm12, %v1914_v58 }
 0x60d   :  { %5882 = vmatprep.mubr.msk.f32.mxu1 %vm1662_vm12, %v1917_v0  ;;  %6126 = vmatpush3.bf16.msra.mxu0 %v7807_v32 }
 0x60e   :  { %6127 = vmatprep.subr.bf16.mxu0 %v6969_v23 }
 0x610   :  { %5883 = vmatmul.mubr.msk.f32.gmra.mrb[14].mxu1 %vm1662_vm12, %v1919_v14 }
 0x611   :  { %5885 = vmatprep.mubr.msk.f32.mxu1 %vm1662_vm12, %v1922_v15  ;;  %6129 = vmatpush3.bf16.msra.mxu0 %v7811_v37 }
 0x612   :  { %6130 = vmatprep.subr.bf16.mxu0 %v6969_v23 }
 0x614   :  { %5886 = vmatmul.mubr.msk.f32.gmra.mrb[16].mxu1 %vm1662_vm12, %v1924_v16 }
 0x615   :  { %6132 = vmatpush3.bf16.msra.mxu0 %v7814_v40 }
 0x616   :  { %6133 = vmatprep.subr.bf16.mxu0 %v6969_v23 }
 0x619   :  { %6135 = vmatpush3.bf16.msra.mxu0 %v7818_v42 }
 0x61a   :  { %6136 = vmatprep.subr.bf16.mxu0 %v6969_v23 }
 0x6db   :  { %v5878_v49 = vpop.f32.mrb[10].mxu1 }
 0x6dc   :  { %v2072_v51 = vadd.f32 %v5878_v49, %v5458_v44  ;;  %v2017_v52 = vpop.f32.mrb[11].mxu1 }
 0x6dd   :  { %v2071_v53 = vadd.f32 %v5458_v44, %v2017_v52 }
 0x6de   :  { %v7823_v20 = vmax.f32 %v2072_v51, 0.0 }
 0x6df   :  { %v7825_v54 = vmax.f32 %v2071_v53, 0.0  ;;  %v5881_v57 = vpop.f32.mrb[12].mxu1 }
 0x6e0   :  { %v2027_v19 = vpop.f32.mrb[13].mxu1  ;;  %v2074_v59 = vadd.f32 %v5881_v57, %v5458_v44 }
 0x6e1   :  { %v2073_v60 = vadd.f32 %v5458_v44, %v2027_v19  ;;  %v2087_v61 = vadd.f32 %v7823_v20, %v7825_v54 }
 0x6e2   :  { %v7831_v4 = vmax.f32 %v2074_v59, 0.0 }
 0x6e3   :  { %v7829_v62 = vmax.f32 %v2073_v60, 0.0  ;;  %v5884_v63 = vpop.f32.mrb[14].mxu1 }
 0x6e4   :  { %v2076_v2 = vadd.f32 %v5884_v63, %v5458_v44  ;;  %v2037_v3 = vpop.f32.mrb[15].mxu1 }
 0x6e5   :  { %v2088_v5 = vadd.f32 %v2087_v61, %v7829_v62  ;;  %v2075_v26 = vadd.f32 %v5458_v44, %v2037_v3 }
 0x6e6   :  { %v7835_v7 = vmax.f32 %v2076_v2, 0.0 }
 0x6e7   :  { %v2089_v25 = vadd.f32 %v2088_v5, %v7831_v4  ;;  %v7837_v8 = vmax.f32 %v2075_v26, 0.0  ;;  %v5887_v48 = vpop.f32.mrb[16].mxu1 }
 0x6e8   :  { %v2047_v10 = vpop.f32.mrb[17].mxu1  ;;  %v2078_v12 = vadd.f32 %v5887_v48, %v5458_v44 }
 0x6e9   :  { %v2090_v11 = vrot.slane %v2089_v25, 4  ;;  %v2077_v34 = vadd.f32 %v5458_v44, %v2047_v10  ;;  %v2096_v1 = vadd.f32 %v7835_v7, %v7837_v8 }
 0x6ea   :  { %v7843_v13 = vmax.f32 %v2078_v12, 0.0 }
 0x6eb   :  { %v2091_v58 = vadd.f32 %v2090_v11, %v2089_v25  ;;  %v7841_v0 = vmax.f32 %v2077_v34, 0.0 }
 0x6ed   :  { %v2097_v9 = vadd.f32 %v2096_v1, %v7841_v0  ;;  %v2092_v14 = vrot.slane %v2091_v58, 2 }
 0x6ef   :  { %v2098_v15 = vadd.f32 %v2097_v9, %v7843_v13  ;;  %v2093_v18 = vadd.f32 %v2092_v14, %v2091_v58 }
 0x6f1   :  { %v2099_v16 = vrot.slane %v2098_v15, 4  ;;  %v2094_v24 = vrot.slane %v2093_v18, 1 }
 0x6f3   :  { %v2100_v17 = vadd.f32 %v2099_v16, %v2098_v15  ;;  %v2095_v29 = vadd.f32 %v2094_v24, %v2093_v18 }
 0x6f5   :  { %v2101_v22 = vrot.slane %v2100_v17, 2 }
 0x6f7   :  { %v2102_v43 = vadd.f32 %v2101_v22, %v2100_v17 }
 0x6f9   :  { %v2103_v27 = vrot.slane %v2102_v43, 1 }
 0x6fb   :  { %v2104_v30 = vadd.f32 %v2103_v27, %v2102_v43 }
 0x6fd   :  { %v2123_v55 = vsel %vm1091_vm9, %v2104_v30, %v2095_v29 }
 0x6fe   :  { %5921 = vmatmul.mubr.f32.vlgmr.msra.gmra.mrb[10].mxu0 %v2123_v55 }
 0x6ff   :  { %6138 = vmatpush3.bf16.msra.mxu0 %v7791_v21  ;;  %5955 = vmatprep.mubr.msk.f32.mxu0 %vm6970_vm7, %v6971_v33 }
 0x700   :  { %6139 = vmatprep.subr.bf16.mxu0 %v6969_v23 }
 0x703   :  { %6141 = vmatpush3.bf16.msra.mxu0 %v7795_v46 }
 0x704   :  { %6142 = vmatprep.subr.bf16.mxu0 %v6969_v23 }
 0x707   :  { %6144 = vmatpush3.bf16.msra.mxu0 %v7799_v28 }
 0x708   :  { %6145 = vmatprep.subr.bf16.mxu0 %v6969_v23 }
 0x70b   :  { %6147 = vmatpush3.bf16.msra.mxu0 %v7803_v56 }
 0x70c   :  { %6148 = vmatprep.subr.bf16.mxu0 %v6969_v23 }
 0x70f   :  { %6150 = vmatpush3.bf16.msra.mxu0 %v7807_v32 }
 0x710   :  { %6151 = vmatprep.subr.bf16.mxu0 %v6969_v23 }
 0x713   :  { %6153 = vmatpush3.bf16.msra.mxu0 %v7811_v37 }
 0x714   :  { %6154 = vmatprep.subr.bf16.mxu0 %v6969_v23 }
 0x717   :  { %6156 = vmatpush3.bf16.msra.mxu0 %v7814_v40 }
 0x718   :  { %6157 = vmatprep.subr.bf16.mxu0 %v6969_v23 }
 0x71b   :  { %6159 = vmatpush3.bf16.msra.mxu0 %v7818_v42 }
 0x71c   :  { %6187 = vmatprep.subr.bf16.mxu0 %v6969_v23 }
 0x7d1   :  { %v7866_v31 = vpop.f32.mrb[10].mxu0 }
 0x7d2   :  { %v2202_v35 = vrot.slane %v7866_v31, %v7583_v47  ;;  %v5922_v36 = vpop.f32.mrb[11].mxu0 }
 0x7d3   :  { %v2632_v36 = vld [vmem:[#allocation22 + $0x8] sm:$0xff] }
 0x7d4   :  { %v2203_v38 = vcombine.high %v2202_v35, %v2202_v35  ;;  %v2210_v39 = vrot.slane %v2202_v35, %v7583_v47  ;;  %v2631_v35 = vld [vmem:[#allocation22] sm:$0xff] }
 0x7d6   :  { %v2217_v6 = vrot.slane %v2203_v38, %v7583_v47  ;;  %v2221_v41 = vrot.slane %v2210_v39, %v7587_v50  ;;  %v2722_v38 = vld [vmem:[#allocation22 + $0x90] sm:$0xff]  ;;  %v6188_v39 = vpack.c.bf16 %v2632_v36, %v2631_v35  ;;  %v5460_v36 = vld [vmem:[#allocation20] ss:$0 sm:$0xff] }
 0x7d8   :  { %v2225_v44 = vrot.slane %v2217_v6, %v7587_v50  ;;  %v2228_v49 = vsub.f32 %v7825_v54, %v2221_v41  ;;  %v2229_v51 = vsub.f32 %v7823_v20, %v2221_v41  ;;  %v2230_v52 = vsub.f32 %v7829_v62, %v2221_v41  ;;  %v2723_v6 = vld [vmem:[#allocation22 + $0x98] sm:$0xff] }
 0x7d9   :  { %v2231_v59 = vsub.f32 %v7831_v4, %v2221_v41  ;;  %v2633_v41 = vld [vmem:[#allocation22 + $0x10] sm:$0xff] }
 0x7da   :  { %v2232_v53 = vsub.f32 %v7837_v8, %v2225_v44  ;;  %v2233_v57 = vsub.f32 %v7835_v7, %v2225_v44  ;;  %v2234_v19 = vsub.f32 %v7841_v0, %v2225_v44  ;;  %v2236_v60 = vmul.f32 %v2228_v49, %v2228_v49 }
 0x7db   :  { %v2237_v61 = vmul.f32 %v2229_v51, %v2229_v51  ;;  %v2235_v63 = vsub.f32 %v7843_v13, %v2225_v44  ;;  %v2238_v5 = vmul.f32 %v2230_v52, %v2230_v52  ;;  %v2239_v10 = vmul.f32 %v2231_v59, %v2231_v59  ;;  %v2634_v44 = vld [vmem:[#allocation22 + $0x18] sm:$0xff]  ;;  %v2724_v51 = vld [vmem:[#allocation22 + $0xa0] sm:$0xff]  ;;  %v2725_v52 = vld [vmem:[#allocation22 + $0xa8] sm:$0xff] }
 0x7dc   :  { %v2240_v2 = vmul.f32 %v2232_v53, %v2232_v53  ;;  %v2241_v3 = vmul.f32 %v2233_v57, %v2233_v57  ;;  %v2242_v25 = vmul.f32 %v2234_v19, %v2234_v19  ;;  %v6161_v49 = vpack.c.bf16 %v2723_v6, %v2722_v38  ;;  %v2635_v19 = vld [vmem:[#allocation22 + $0x20] sm:$0xff]  ;;  %v2636_v59 = vld [vmem:[#allocation22 + $0x28] sm:$0xff] }
 0x7dd   :  { %v2244_v26 = vadd.f32 %v2237_v61, %v2236_v60  ;;  %v2243_v12 = vmul.f32 %v2235_v63, %v2235_v63  ;;  %v6191_v53 = vpack.c.bf16 %v2634_v44, %v2633_v41  ;;  %v6164_v57 = vpack.c.bf16 %v2725_v52, %v2724_v51  ;;  %v2726_v60 = vld [vmem:[#allocation22 + $0xb0] sm:$0xff]  ;;  %v2727_v61 = vld [vmem:[#allocation22 + $0xb8] sm:$0xff]  ;;  %v2643_v6 = vld [vmem:[#allocation22 + $0x60] sm:$0xff] }
 0x7de   :  { %v2253_v48 = vadd.f32 %v2241_v3, %v2240_v2  ;;  %6162 = vmatpush1.bf16.msra.mxu1 %v6161_v49  ;;  %v6194_v63 = vpack.c.bf16 %v2636_v59, %v2635_v19  ;;  %v6167_v2 = vpack.c.bf16 %v2727_v61, %v2726_v60  ;;  %v2637_v3 = vld [vmem:[#allocation22 + $0x30] sm:$0xff]  ;;  %v2644_v41 = vld [vmem:[#allocation22 + $0x68] sm:$0xff] }
 0x7df   :  { %v2245_v11 = vadd.f32 %v2244_v26, %v2238_v5  ;;  %6163 = vmatprep.subr.bf16.mxu1 %v6969_v23  ;;  %v2638_v5 = vld [vmem:[#allocation22 + $0x38] sm:$0xff]  ;;  %v2728_v26 = vld [vmem:[#allocation22 + $0xc0] sm:$0xff]  ;;  %v2734_v44 = vld [vmem:[#allocation22 + $0xf0] sm:$0xff] }
 0x7e0   :  { %v2254_v34 = vadd.f32 %v2253_v48, %v2242_v25  ;;  %v2729_v25 = vld [vmem:[#allocation22 + $0xc8] sm:$0xff]  ;;  %v6197_v48 = vpack.c.bf16 %v2638_v5, %v2637_v3 }
 0x7e1   :  { %v2246_v58 = vadd.f32 %v2245_v11, %v2239_v10  ;;  %v6170_v10 = vpack.c.bf16 %v2729_v25, %v2728_v26  ;;  %v2639_v11 = vld [vmem:[#allocation22 + $0x40] sm:$0xff]  ;;  %v2645_v26 = vld [vmem:[#allocation22 + $0x70] sm:$0xff]  ;;  %v2646_v25 = vld [vmem:[#allocation22 + $0x78] sm:$0xff] }
 0x7e2   :  { %v2255_v1 = vadd.f32 %v2254_v34, %v2243_v12  ;;  %6165 = vmatpush1.bf16.msra.mxu1 %v6164_v57  ;;  %v2640_v12 = vld [vmem:[#allocation22 + $0x48] sm:$0xff]  ;;  %v2730_v34 = vld [vmem:[#allocation22 + $0xd0] sm:$0xff]  ;;  %v2735_v57 = vld [vmem:[#allocation22 + $0xf8] sm:$0xff] }
 0x7e3   :  { %v2247_v9 = vrot.slane %v2246_v58, 4  ;;  %6166 = vmatprep.subr.bf16.mxu1 %v6969_v23  ;;  %v6179_v19 = vpack.c.bf16 %v2735_v57, %v2734_v44  ;;  %v2738_v44 = vld [vmem:[#allocation22 + $0x110] sm:$0xff] }
 0x7e4   :  { %v2256_v14 = vrot.slane %v2255_v1, 4 }
 0x7e5   :  { %v2248_v15 = vadd.f32 %v2247_v9, %v2246_v58  ;;  %v2731_v58 = vld [vmem:[#allocation22 + $0xd8] sm:$0xff] }
 0x7e6   :  { %v2257_v16 = vadd.f32 %v2256_v14, %v2255_v1  ;;  %6168 = vmatpush1.bf16.msra.mxu1 %v6167_v2  ;;  %v6200_v1 = vpack.c.bf16 %v2640_v12, %v2639_v11  ;;  %v6173_v9 = vpack.c.bf16 %v2731_v58, %v2730_v34  ;;  %v2641_v14 = vld [vmem:[#allocation22 + $0x50] sm:$0xff]  ;;  %v6209_v12 = vpack.c.bf16 %v2646_v25, %v2645_v26  ;;  %v2736_v34 = vld [vmem:[#allocation22 + $0x100] sm:$0xff]  ;;  %v2737_v58 = vld [vmem:[#allocation22 + $0x108] sm:$0xff] }
 0x7e7   :  { %v2249_v17 = vrot.slane %v2248_v15, 2  ;;  %6169 = vmatprep.subr.bf16.mxu1 %v6969_v23 }
 0x7e8   :  { %v2258_v18 = vrot.slane %v2257_v16, 2 }
 0x7e9   :  { %v2250_v22 = vadd.f32 %v2249_v17, %v2248_v15  ;;  %v2642_v15 = vld [vmem:[#allocation22 + $0x58] sm:$0xff]  ;;  %v2733_v17 = vld [vmem:[#allocation22 + $0xe8] sm:$0xff] }
 0x7ea   :  { %v2259_v24 = vadd.f32 %v2258_v18, %v2257_v16  ;;  %6171 = vmatpush1.bf16.msra.mxu1 %v6170_v10  ;;  %v2732_v16 = vld [vmem:[#allocation22 + $0xe0] sm:$0xff]  ;;  %v6203_v18 = vpack.c.bf16 %v2642_v15, %v2641_v14 }
 0x7eb   :  { %v2251_v43 = vrot.slane %v2250_v22, 1  ;;  %6172 = vmatprep.subr.bf16.mxu1 %v6969_v23 }
 0x7ec   :  { %v2260_v27 = vrot.slane %v2259_v24, 1 }
 0x7ed   :  { %v2252_v29 = vadd.f32 %v2251_v43, %v2250_v22  ;;  %v6176_v22 = vpack.c.bf16 %v2733_v17, %v2732_v16 }
 0x7ee   :  { %v2261_v30 = vadd.f32 %v2260_v27, %v2259_v24  ;;  %6174 = vmatpush1.bf16.msra.mxu1 %v6173_v9 }
 0x7ef   :  { %6175 = vmatprep.subr.bf16.mxu1 %v6969_v23 }
 0x7f0   :  { %v2264_v55 = vsel %vm1091_vm9, %v2261_v30, %v2252_v29  ;;  %v5459_v30 = vld [vmem:[#allocation19] ss:$0 sm:$0xff] }
 0x7f1   :  { %5956 = vmatmul.mubr.f32.vlgmr.msra.gmra.mrb[12].mxu0 %v2264_v55 }
 0x7f2   :  { %6189 = vmatpush1.bf16.msra.mxu0 %v6188_v39  ;;  %6177 = vmatpush1.bf16.msra.mxu1 %v6176_v22 }
 0x7f3   :  { %6190 = vmatprep.subr.bf16.mxu0 %v6969_v23  ;;  %6178 = vmatprep.subr.bf16.mxu1 %v6969_v23 }
 0x7f6   :  { %6192 = vmatpush1.bf16.msra.mxu0 %v6191_v53  ;;  %v6206_v53 = vpack.c.bf16 %v2644_v41, %v2643_v6  ;;  %6180 = vmatpush1.bf16.msra.mxu1 %v6179_v19  ;;  %v2648_v41 = vld [vmem:[#allocation22 + $0x88] sm:$0xff] }
 0x7f7   :  { %6193 = vmatprep.subr.bf16.mxu0 %v6969_v23  ;;  %6181 = vmatprep.subr.bf16.mxu1 %v6969_v23 }
 0x7fa   :  { %6195 = vmatpush1.bf16.msra.mxu0 %v6194_v63 }
 0x7fb   :  { %6196 = vmatprep.subr.bf16.mxu0 %v6969_v23 }
 0x7fe   :  { %6198 = vmatpush1.bf16.msra.mxu0 %v6197_v48 }
 0x7ff   :  { %6199 = vmatprep.subr.bf16.mxu0 %v6969_v23 }
 0x802   :  { %6201 = vmatpush1.bf16.msra.mxu0 %v6200_v1 }
 0x803   :  { %6202 = vmatprep.subr.bf16.mxu0 %v6969_v23 }
 0x806   :  { %6204 = vmatpush1.bf16.msra.mxu0 %v6203_v18  ;;  %v6182_v18 = vpack.c.bf16 %v2737_v58, %v2736_v34 }
 0x807   :  { %6205 = vmatprep.subr.bf16.mxu0 %v6969_v23 }
 0x808   :  { %6183 = vmatpush1.bf16.msra.mxu1 %v6182_v18 }
 0x809   :  { %6184 = vmatprep.subr.bf16.mxu1 %v6969_v23 }
 0x80a   :  { %6207 = vmatpush1.bf16.msra.mxu0 %v6206_v53 }
 0x80b   :  { %6208 = vmatprep.subr.bf16.mxu0 %v6969_v23 }
 0x80e   :  { %6210 = vmatpush1.bf16.msra.mxu0 %v6209_v12 }
 0x80f   :  { %6211 = vmatprep.subr.bf16.mxu0 %v6969_v23 }
 0x8c4   :  { %v2332_v24 = vpop.f32.mrb[12].mxu0 }
 0x8c5   :  { %v2336_v43 = vmax.f32 %v2332_v24, 0.0  ;;  %v5957_v27 = vpop.f32.mrb[13].mxu0 }
 0x8c7   :  { %v2337_v29 = vadd.f32 1e-05, %v2336_v43 }
 0x8c9   :  { %6464 = vrsqrt.f32 %v2337_v29 }
 0x8d3   :  { %v6465_v55 = vpop.eup %6464 }
 0x8d4   :  { %v2346_v35 = vmul.f32 %v6465_v55, %v5459_v30 }
 0x8d6   :  { %v2348_v38 = vmul.f32 %v2346_v35, %v7866_v31  ;;  %v2363_v39 = vrot.slane %v2346_v35, %v7583_v47 }
 0x8d8   :  { %v2355_v49 = vsub.f32 %v5460_v36, %v2348_v38  ;;  %v2364_v51 = vcombine.high %v2363_v39, %v2363_v39  ;;  %v2371_v52 = vrot.slane %v2363_v39, %v7583_v47 }
 0x8da   :  { %v2378_v59 = vrot.slane %v2364_v51, %v7583_v47  ;;  %v2404_v60 = vrot.slane %v2355_v49, %v7583_v47  ;;  %v2382_v61 = vrot.slane %v2371_v52, %v7587_v50  ;;  %v2739_v49 = vld [vmem:[#allocation22 + $0x118] sm:$0xff] }
 0x8dc   :  { %v2412_v31 = vrot.slane %v2404_v60, %v7583_v47  ;;  %v2389_v63 = vmul.f32 %v2382_v61, %v7825_v54  ;;  %v2390_v2 = vmul.f32 %v2382_v61, %v7823_v20  ;;  %v2386_v3 = vrot.slane %v2378_v59, %v7587_v50 }
 0x8dd   :  { %v2405_v5 = vcombine.high %v2404_v60, %v2404_v60  ;;  %v2391_v10 = vmul.f32 %v2382_v61, %v7829_v62  ;;  %v2392_v11 = vmul.f32 %v2382_v61, %v7831_v4 }
 0x8de   :  { %v2423_v48 = vrot.slane %v2412_v31, %v7587_v50  ;;  %v2393_v1 = vmul.f32 %v2386_v3, %v7837_v8  ;;  %v2394_v20 = vmul.f32 %v2386_v3, %v7835_v7  ;;  %v2395_v62 = vmul.f32 %v2386_v3, %v7841_v0 }
 0x8df   :  { %v2419_v54 = vrot.slane %v2405_v5, %v7583_v47  ;;  %v2396_v4 = vmul.f32 %v2386_v3, %v7843_v13  ;;  %v2647_v13 = vld [vmem:[#allocation22 + $0x80] sm:$0xff] }
 0x8e0   :  { %v2430_v9 = vadd.f32 %v2423_v48, %v2389_v63  ;;  %v2431_v14 = vadd.f32 %v2423_v48, %v2390_v2  ;;  %v2432_v15 = vadd.f32 %v2423_v48, %v2391_v10  ;;  %v2433_v16 = vadd.f32 %v2423_v48, %v2392_v11 }
 0x8e1   :  { %v2427_v17 = vrot.slane %v2419_v54, %v7587_v50  ;;  %v6212_v63 = vpack.c.bf16 %v2648_v41, %v2647_v13  ;;  %v6185_v2 = vpack.c.bf16 %v2739_v49, %v2738_v44  ;;  %v3034_v41 = vld [vmem:[#allocation22 + $0x130] sm:$0xff]  ;;  %v3035_v44 = vld [vmem:[#allocation22 + $0x138] sm:$0xff] }
 0x8e2   :  { %v2454_v22 = vrot.slane %v2430_v9, 7  ;;  %v2455_v8 = vrot.slane %v2431_v14, 7  ;;  %v2442_v24 = vrot.slane %v2430_v9, 1  ;;  %v2474_v43 = vrot.slane %v2431_v14, 5 }
 0x8e3   :  { %v2443_v27 = vrot.slane %v2432_v15, 1  ;;  %v2457_v7 = vrot.slane %v2432_v15, 7  ;;  %v2458_v29 = vrot.slane %v2433_v16, 7  ;;  %v2475_v30 = vrot.slane %v2433_v16, 5  ;;  %6213 = vmatpush1.bf16.msra.mxu0 %v6212_v63  ;;  %6186 = vmatpush1.bf16.msra.mxu1 %v6185_v2 }
 0x8e4   :  { %v2456_v55 = vsel %vm405_vm0, %v2454_v22, %v2455_v8  ;;  %v2482_v35 = vsel %vm405_vm0, %v2442_v24, %v2454_v22  ;;  %v2486_v0 = vsel %vm405_vm0, %v2455_v8, %v2474_v43  ;;  %v2434_v36 = vadd.f32 %v2427_v17, %v2393_v1  ;;  %6214 = vmatprep.subr.bf16.mxu1 %v6969_v23 }
 0x8e5   :  { %2536 = vrot.lane.b32.xlu1 %v2456_v55, %s8423_s13  ;;  %2534 = vrot.lane.b32.xlu0 %v2482_v35, %s8423_s13  ;;  %v6437_v38 = vpack.i.bf16 %v2456_v55, %v2482_v35  ;;  %v2483_v39 = vsel %vm405_vm0, %v2443_v27, %v2457_v7  ;;  %v2459_v6 = vsel %vm405_vm0, %v2457_v7, %v2458_v29  ;;  %v3032_v7 = vld [vmem:[#allocation22 + $0x120] sm:$0xff] }
 0x8e6   :  { %v6442_v51 = vpack.i.bf16 %v2483_v39, %v2486_v0  ;;  %v2487_v52 = vsel %vm405_vm0, %v2458_v29, %v2475_v30  ;;  %v2444_v53 = vrot.slane %v2434_v36, 1  ;;  %v2460_v57 = vrot.slane %v2434_v36, 7  ;;  %6241 = vmatprep.subr.bf16.mxu0 %v6969_v23  ;;  %v3033_v29 = vld [vmem:[#allocation22 + $0x128] sm:$0xff] }
 0x8e7   :  { %v6447_v19 = vpack.i.bf16 %v2487_v52, %v2459_v6  ;;  %v2435_v59 = vadd.f32 %v2427_v17, %v2394_v20  ;;  %v2436_v60 = vadd.f32 %v2427_v17, %v2395_v62  ;;  %v2437_v61 = vadd.f32 %v2427_v17, %v2396_v4 }
 0x8e8   :  { %v2484_v31 = vsel %vm405_vm0, %v2444_v53, %v2460_v57 }
 0x8e9   :  { %2572 = vrot.lane.b32.xlu1 %v2456_v55, %s6975_s24  ;;  %2570 = vrot.lane.b32.xlu0 %v2482_v35, %s6975_s24  ;;  %v2461_v3 = vrot.slane %v2435_v59, 7  ;;  %v2476_v5 = vrot.slane %v2435_v59, 5  ;;  %v2445_v26 = vrot.slane %v2436_v60, 1  ;;  %v2463_v25 = vrot.slane %v2436_v60, 7 }
 0x8ea   :  { %v2464_v48 = vrot.slane %v2437_v61, 7  ;;  %v2477_v54 = vrot.slane %v2437_v61, 5  ;;  %v6218_v60 = vpack.c.bf16 %v3035_v44, %v3034_v41  ;;  %v3036_v61 = vld [vmem:[#allocation22 + $0x140] sm:$0xff] }
 0x8eb   :  { %v2462_v10 = vsel %vm405_vm0, %v2460_v57, %v2461_v3  ;;  %v2488_v11 = vsel %vm405_vm0, %v2461_v3, %v2476_v5  ;;  %v2485_v12 = vsel %vm405_vm0, %v2445_v26, %v2463_v25 }
 0x8ec   :  { %v6452_v34 = vpack.i.bf16 %v2462_v10, %v2484_v31  ;;  %v6457_v58 = vpack.i.bf16 %v2485_v12, %v2488_v11  ;;  %v2465_v1 = vsel %vm405_vm0, %v2463_v25, %v2464_v48  ;;  %v2489_v20 = vsel %vm405_vm0, %v2464_v48, %v2477_v54 }
 0x8ed   :  { %2538 = vrot.lane.b32.xlu1 %v2486_v0, %s8423_s13  ;;  %6438 = vrot.lane.b32.xlu0 %v6437_v38, %s6976_s16  ;;  %v6215_v38 = vpack.c.bf16 %v3033_v29, %v3032_v7 }
 0x8f1   :  { %6443 = vrot.lane.b32.xlu1 %v6442_v51, %s6976_s16  ;;  %2574 = vrot.lane.b32.xlu0 %v2486_v0, %s6975_s24 }
 0x8f5   :  { %2542 = vrot.lane.b32.xlu1 %v2459_v6, %s8423_s13  ;;  %2540 = vrot.lane.b32.xlu0 %v2483_v39, %s8423_s13 }
 0x8f9   :  { %2578 = vrot.lane.b32.xlu1 %v2459_v6, %s6975_s24  ;;  %2576 = vrot.lane.b32.xlu0 %v2483_v39, %s6975_s24 }
 0x8fd   :  { %2544 = vrot.lane.b32.xlu1 %v2487_v52, %s8423_s13  ;;  %6448 = vrot.lane.b32.xlu0 %v6447_v19, %s6976_s16 }
 0x901   :  { %2580 = vrot.lane.b32.xlu0 %v2487_v52, %s6975_s24  ;;  %2546 = vrot.lane.b32.xlu1 %v2484_v31, %s8423_s13 }
 0x905   :  { %2548 = vrot.lane.b32.xlu0 %v2462_v10, %s8423_s13  ;;  %2582 = vrot.lane.b32.xlu1 %v2484_v31, %s6975_s24  ;;  %v3037_v31 = vld [vmem:[#allocation22 + $0x148] sm:$0xff] }
 0x906   :  { %v6221_v26 = vpack.c.bf16 %v3037_v31, %v3036_v61 }
 0x909   :  { %2584 = vrot.lane.b32.xlu0 %v2462_v10, %s6975_s24  ;;  %6453 = vrot.lane.b32.xlu1 %v6452_v34, %s6976_s16  ;;  %v3038_v10 = vld [vmem:[#allocation22 + $0x150] sm:$0xff] }
 0x90d   :  { %2550 = vrot.lane.b32.xlu0 %v2488_v11, %s8423_s13  ;;  %2586 = vrot.lane.b32.xlu1 %v2488_v11, %s6975_s24  ;;  %v3039_v11 = vld [vmem:[#allocation22 + $0x158] sm:$0xff] }
 0x911   :  { %6458 = vrot.lane.b32.xlu0 %v6457_v58, %s6976_s16  ;;  %2552 = vrot.lane.b32.xlu1 %v2485_v12, %s8423_s13 }
 0x915   :  { %2554 = vrot.lane.b32.xlu0 %v2465_v1, %s8423_s13  ;;  %2588 = vrot.lane.b32.xlu1 %v2485_v12, %s6975_s24 }
 0x919   :  { %2590 = vrot.lane.b32.xlu0 %v2465_v1, %s6975_s24  ;;  %2518 = vrot.lane.b32.xlu1 %v2465_v1, %s6976_s16 }
 0x91d   :  { %2556 = vrot.lane.b32.xlu0 %v2489_v20, %s8423_s13  ;;  %2592 = vrot.lane.b32.xlu1 %v2489_v20, %s6975_s24  ;;  %s6977_s13 = smov [#allocation4]  }
 0x91e   :  { %s377_s2 = sshll.u32 %s6977_s13, 4  ;;  %s378_s2 = int_to_ptr.vmem [resolvable:$true] %s377_s2 }
 0x921   :  { %2520 = vrot.lane.b32.xlu0 %v2489_v20, %s6976_s16 }
 0x957   :  { %v2537_v9 = vpop.permute.xlu1 %2536  ;;  %v2535_v14 = vpop.permute.xlu0 %2534 }
 0x95b   :  { %v2573_v15 = vpop.permute.xlu1 %2572  ;;  %v2571_v16 = vpop.permute.xlu0 %2570 }
 0x95c   :  { %v7957_v17 = vsel %vm2606_vm13, %v2537_v9, %v2573_v15  ;;  %v7960_v62 = vsel %vm2606_vm13, %v2535_v14, %v2571_v16  ;;  %v3040_v16 = vld [vmem:[#allocation22 + $0x160] sm:$0xff] }
 0x95d   :  { %v2677_v4 = vrot.slane %v7957_v17, 1  ;;  %v2676_v18 = vrot.slane %v7960_v62, 1  ;;  %5469 = vmatprep.mubr.msk.f32.mxu0 %vm2740_vm14, %v7960_v62 }
 0x95f   :  { %v2539_v22 = vpop.permute.xlu1 %2538  ;;  %v6439_v8 = vpop.permute.xlu0 %6438  ;;  %v2678_v24 = vsel %vm599_vm5, %v2676_v18, %v2677_v4 }
 0x960   :  { %v6441_v43 = vunpack.i.h.bf16 %v6439_v8  ;;  %v6440_v27 = vunpack.i.l.bf16 %v6439_v8  ;;  %5461 = vmatprep.mubr.msk.f32.mxu1 %vm2740_vm14, %v2678_v24 }
 0x962   :  { %v7969_v30 = vsel %vm2606_vm13, %v6441_v43, %v2537_v9  ;;  %v7972_v55 = vsel %vm2606_vm13, %v6440_v27, %v2535_v14  ;;  %v6224_v9 = vpack.c.bf16 %v3039_v11, %v3038_v10 }
 0x963   :  { %v2674_v35 = vrot.slane %v7969_v30, 1  ;;  %v6444_v0 = vpop.permute.xlu1 %6443  ;;  %v2575_v36 = vpop.permute.xlu0 %2574  ;;  %v2673_v13 = vrot.slane %v7972_v55, 1  ;;  %2943 = vmatmul.mubr.f32.vlgmr.msra.gmra.mrb[14].mxu0 %v7972_v55 }
 0x964   :  { %v6445_v39 = vunpack.i.l.bf16 %v6444_v0  ;;  %v7978_v6 = vsel %vm2606_vm13, %v2539_v22, %v2575_v36  ;;  %5470 = vmatprep.mubr.msk.f32.mxu0 %vm2740_vm14, %v7957_v17  ;;  %6243 = vmatpush3.bf16.msra.mxu0 %v7791_v21  ;;  %v6446_v2 = vunpack.i.h.bf16 %v6444_v0  ;;  %v3043_v0 = vld [vmem:[#allocation22 + $0x178] sm:$0xff] }
 0x965   :  { %v2681_v49 = vrot.slane %v7978_v6, 1  ;;  %v2675_v51 = vsel %vm599_vm5, %v2673_v13, %v2674_v35  ;;  %6244 = vmatprep.subr.bf16.mxu0 %v6969_v23 }
 0x966   :  { %v7987_v52 = vsel %vm2606_vm13, %v6445_v39, %v2539_v22  ;;  %2822 = vmatmul.mubr.f32.vlgmr.msra.gmra.mrb[18].mxu1 %v2675_v51 }
 0x967   :  { %v2543_v53 = vpop.permute.xlu1 %2542  ;;  %v2541_v57 = vpop.permute.xlu0 %2540  ;;  %2948 = vmatmul.mubr.f32.gmra.mrb[16].mxu0 %v7969_v30  ;;  %v2682_v19 = vsel %vm599_vm5, %v2677_v4, %v2681_v49  ;;  %v2679_v59 = vrot.slane %v7987_v52, 1  ;;  %6216 = vmatpush1.bf16.msra.mxu1 %v6215_v38  ;;  %v3041_v4 = vld [vmem:[#allocation22 + $0x168] sm:$0xff] }
 0x968   :  { %5462 = vmatprep.mubr.msk.f32.mxu1 %vm2740_vm14, %v2682_v19  ;;  %6217 = vmatprep.subr.bf16.mxu1 %v6969_v23  ;;  %v8009_v58 = vsel %vm2606_vm13, %v6446_v2, %v2541_v57  ;;  %v6227_v7 = vpack.c.bf16 %v3041_v4, %v3040_v16  ;;  %v3048_v16 = vld [vmem:[#allocation22 + $0x1a0] sm:$0xff]  ;;  %v3049_v4 = vld [vmem:[#allocation22 + $0x1a8] sm:$0xff] }
 0x969   :  { %v2680_v63 = vsel %vm599_vm5, %v2674_v35, %v2679_v59  ;;  %6246 = vmatpush3.bf16.msra.mxu0 %v7795_v46  ;;  %v2683_v8 = vrot.slane %v8009_v58, 1  ;;  %v3042_v35 = vld [vmem:[#allocation22 + $0x170] sm:$0xff] }
 0x96a   :  { %2827 = vmatmul.mubr.f32.gmra.mrb[20].mxu1 %v2680_v63  ;;  %6247 = vmatprep.subr.bf16.mxu0 %v6969_v23  ;;  %v6230_v49 = vpack.c.bf16 %v3043_v0, %v3042_v35  ;;  %v6239_v35 = vpack.c.bf16 %v3049_v4, %v3048_v16  ;;  %v2986_v16 = vrot.slane %v7960_v62, 2 }
 0x96b   :  { %v2579_v3 = vpop.permute.xlu1 %2578  ;;  %v2577_v5 = vpop.permute.xlu0 %2576  ;;  %6219 = vmatpush1.bf16.msra.mxu1 %v6218_v60 }
 0x96c   :  { %v7998_v25 = vsel %vm2606_vm13, %v2543_v53, %v2579_v3  ;;  %v8001_v48 = vsel %vm2606_vm13, %v2541_v57, %v2577_v5  ;;  %6220 = vmatprep.subr.bf16.mxu1 %v6969_v23  ;;  %v3045_v57 = vld [vmem:[#allocation22 + $0x188] sm:$0xff]  ;;  %v3046_v3 = vld [vmem:[#allocation22 + $0x190] sm:$0xff]  ;;  %v3047_v5 = vld [vmem:[#allocation22 + $0x198] sm:$0xff] }
 0x96d   :  { %v2687_v12 = vrot.slane %v7998_v25, 1  ;;  %v2686_v34 = vrot.slane %v8001_v48, 1  ;;  %5471 = vmatprep.mubr.msk.f32.mxu0 %vm2740_vm14, %v8001_v48  ;;  %6249 = vmatpush3.bf16.msra.mxu0 %v7799_v28 }
 0x96e   :  { %2953 = vmatmul.mubr.f32.gmra.mrb[18].mxu0 %v8009_v58  ;;  %6250 = vmatprep.subr.bf16.mxu0 %v6969_v23 }
 0x96f   :  { %v2545_v1 = vpop.permute.xlu1 %2544  ;;  %v6449_v54 = vpop.permute.xlu0 %6448  ;;  %5472 = vmatprep.mubr.msk.f32.mxu0 %vm2740_vm14, %v7998_v25  ;;  %v2688_v20 = vsel %vm599_vm5, %v2686_v34, %v2687_v12  ;;  %6222 = vmatpush1.bf16.msra.mxu1 %v6221_v26 }
 0x970   :  { %v6451_v14 = vunpack.i.h.bf16 %v6449_v54  ;;  %v6450_v15 = vunpack.i.l.bf16 %v6449_v54  ;;  %5463 = vmatprep.mubr.msk.f32.mxu1 %vm2740_vm14, %v2688_v20  ;;  %6223 = vmatprep.subr.bf16.mxu1 %v6969_v23 }
 0x971   :  { %6252 = vmatpush3.bf16.msra.mxu0 %v7803_v56 }
 0x972   :  { %v8021_v18 = vsel %vm2606_vm13, %v6451_v14, %v2545_v1  ;;  %v8024_v22 = vsel %vm2606_vm13, %v6450_v15, %v2543_v53  ;;  %6253 = vmatprep.subr.bf16.mxu0 %v6969_v23  ;;  %v3044_v53 = vld [vmem:[#allocation22 + $0x180] sm:$0xff]  ;;  %v6236_v14 = vpack.c.bf16 %v3047_v5, %v3046_v3 }
 0x973   :  { %v2581_v24 = vpop.permute.xlu0 %2580  ;;  %v2684_v43 = vrot.slane %v8024_v22, 1  ;;  %2958 = vmatmul.mubr.f32.gmra.mrb[20].mxu0 %v8024_v22  ;;  %v2547_v27 = vpop.permute.xlu1 %2546  ;;  %6225 = vmatpush1.bf16.msra.mxu1 %v6224_v9  ;;  %v2689_v38 = vrot.slane %v8021_v18, 1  ;;  %v6233_v61 = vpack.c.bf16 %v3045_v57, %v3044_v53 }
 0x974   :  { %v8031_v29 = vsel %vm2606_vm13, %v2545_v1, %v2581_v24  ;;  %6226 = vmatprep.subr.bf16.mxu1 %v6969_v23 }
 0x975   :  { %v2691_v36 = vrot.slane %v8031_v29, 1  ;;  %v2685_v13 = vsel %vm599_vm5, %v2683_v8, %v2684_v43  ;;  %6255 = vmatpush3.bf16.msra.mxu0 %v7807_v32  ;;  %v2690_v19 = vsel %vm599_vm5, %v2684_v43, %v2689_v38 }
 0x976   :  { %2832 = vmatmul.mubr.f32.gmra.mrb[22].mxu1 %v2685_v13  ;;  %6256 = vmatprep.subr.bf16.mxu0 %v6969_v23 }
 0x977   :  { %v2549_v39 = vpop.permute.xlu0 %2548  ;;  %v2583_v41 = vpop.permute.xlu1 %2582  ;;  %v2692_v44 = vsel %vm599_vm5, %v2687_v12, %v2691_v36  ;;  %6228 = vmatpush1.bf16.msra.mxu1 %v6227_v7 }
 0x978   :  { %v8041_v51 = vsel %vm2606_vm13, %v2547_v27, %v2583_v41  ;;  %5464 = vmatprep.mubr.msk.f32.mxu1 %vm2740_vm14, %v2692_v44  ;;  %6229 = vmatprep.subr.bf16.mxu1 %v6969_v23 }
 0x979   :  { %5473 = vmatprep.mubr.msk.f32.mxu0 %vm2740_vm14, %v8041_v51  ;;  %6258 = vmatpush3.bf16.msra.mxu0 %v7811_v37  ;;  %v2696_v26 = vrot.slane %v8041_v51, 1 }
 0x97a   :  { %2837 = vmatmul.mubr.f32.gmra.mrb[24].mxu1 %v2690_v19  ;;  %6259 = vmatprep.subr.bf16.mxu0 %v6969_v23 }
 0x97b   :  { %v2585_v59 = vpop.permute.xlu0 %2584  ;;  %v6454_v60 = vpop.permute.xlu1 %6453  ;;  %6231 = vmatpush1.bf16.msra.mxu1 %v6230_v49 }
 0x97c   :  { %v8051_v31 = vsel %vm2606_vm13, %v2549_v39, %v2585_v59  ;;  %v6456_v63 = vunpack.i.h.bf16 %v6454_v60  ;;  %v6455_v2 = vunpack.i.l.bf16 %v6454_v60  ;;  %6232 = vmatprep.subr.bf16.mxu1 %v6969_v23 }
 0x97d   :  { %v2697_v10 = vrot.slane %v8051_v31, 1  ;;  %6261 = vmatpush3.bf16.msra.mxu0 %v7814_v40 }
 0x97e   :  { %v8058_v11 = vsel %vm2606_vm13, %v6456_v63, %v2549_v39  ;;  %v8061_v12 = vsel %vm2606_vm13, %v6455_v2, %v2547_v27  ;;  %6262 = vmatprep.subr.bf16.mxu0 %v6969_v23 }
 0x97f   :  { %v2551_v34 = vpop.permute.xlu0 %2550  ;;  %v2587_v1 = vpop.permute.xlu1 %2586  ;;  %v2693_v54 = vrot.slane %v8061_v12, 1  ;;  %2963 = vmatmul.mubr.f32.gmra.mrb[22].mxu0 %v8061_v12  ;;  %v2698_v20 = vsel %vm599_vm5, %v2696_v26, %v2697_v10  ;;  %v2694_v9 = vrot.slane %v8058_v11, 1  ;;  %6234 = vmatpush1.bf16.msra.mxu1 %v6233_v61 }
 0x980   :  { %v8069_v15 = vsel %vm2606_vm13, %v2551_v34, %v2587_v1  ;;  %5465 = vmatprep.mubr.msk.f32.mxu1 %vm2740_vm14, %v2698_v20  ;;  %5474 = vmatprep.mubr.msk.f32.mxu0 %vm2740_vm14, %v8051_v31 }
 0x981   :  { %v2701_v8 = vrot.slane %v8069_v15, 1  ;;  %v2695_v24 = vsel %vm599_vm5, %v2693_v54, %v2694_v9  ;;  %6235 = vmatprep.subr.bf16.mxu1 %v6969_v23  ;;  %6264 = vmatpush3.bf16.msra.mxu0 %v7818_v42 }
 0x982   :  { %2842 = vmatmul.mubr.f32.gmra.mrb[26].mxu1 %v2695_v24  ;;  %v2984_v24 = vrot.slane %v7969_v30, 2 }
 0x983   :  { %v6459_v43 = vpop.permute.xlu0 %6458  ;;  %v2553_v27 = vpop.permute.xlu1 %2552  ;;  %2968 = vmatmul.mubr.f32.gmra.mrb[24].mxu0 %v8058_v11  ;;  %v2702_v7 = vsel %vm599_vm5, %v2697_v10, %v2701_v8  ;;  %6237 = vmatpush1.bf16.msra.mxu1 %v6236_v14  ;;  %v2987_v14 = vrot.slane %v7957_v17, 2 }
 0x984   :  { %v6460_v0 = vunpack.i.l.bf16 %v6459_v43  ;;  %5466 = vmatprep.mubr.msk.f32.mxu1 %vm2740_vm14, %v2702_v7  ;;  %6238 = vmatprep.subr.bf16.mxu1 %v6969_v23  ;;  %v6461_v36 = vunpack.i.h.bf16 %v6459_v43  ;;  %v2983_v43 = vrot.slane %v7972_v55, 2  ;;  %v2991_v7 = vrot.slane %v7978_v6, 2 }
 0x985   :  { %v2988_v17 = vsel %vm874_vm6, %v2986_v16, %v2987_v14  ;;  %v2994_v55 = vrot.slane %v8024_v22, 2  ;;  %v3007_v22 = vrot.slane %v8051_v31, 2 }
 0x986   :  { %v8083_v13 = vsel %vm2606_vm13, %v6460_v0, %v2551_v34  ;;  %v8094_v53 = vsel %vm2606_vm13, %v6461_v36, %v2553_v27  ;;  %v2985_v62 = vsel %vm874_vm6, %v2983_v43, %v2984_v24  ;;  %v2997_v0 = vrot.slane %v7998_v25, 2 }
 0x987   :  { %v2555_v38 = vpop.permute.xlu0 %2554  ;;  %v2589_v39 = vpop.permute.xlu1 %2588  ;;  %v2699_v41 = vrot.slane %v8083_v13, 1  ;;  %6240 = vmatpush1.bf16.msra.mxu1 %v6239_v35  ;;  %v2703_v63 = vrot.slane %v8094_v53, 1  ;;  %v2989_v35 = vrot.slane %v7987_v52, 2  ;;  %v2996_v36 = vrot.slane %v8001_v48, 2 }
 0x988   :  { %v8087_v44 = vsel %vm2606_vm13, %v2553_v27, %v2589_v39  ;;  %6265 = vmatprep.subr.bf16.mxu1 %v6969_v23  ;;  %v2992_v30 = vsel %vm874_vm6, %v2987_v14, %v2991_v7  ;;  %v2993_v25 = vrot.slane %v8009_v58, 2  ;;  %v2999_v48 = vrot.slane %v8021_v18, 2 }
 0x989   :  { %5475 = vmatprep.mubr.msk.f32.mxu0 %vm2740_vm14, %v8087_v44  ;;  %v2700_v49 = vsel %vm599_vm5, %v2694_v9, %v2699_v41  ;;  %v2706_v61 = vrot.slane %v8087_v44, 1  ;;  %v2990_v6 = vsel %vm874_vm6, %v2984_v24, %v2989_v35  ;;  %v2998_v52 = vsel %vm874_vm6, %v2996_v36, %v2997_v0 }
 0x98a   :  { %2847 = vmatmul.mubr.f32.gmra.mrb[28].mxu1 %v2700_v49  ;;  %2973 = vmatmul.mubr.f32.gmra.mrb[26].mxu0 %v8094_v53  ;;  %v3006_v58 = vrot.slane %v8041_v51, 2  ;;  %v3000_v39 = vsel %vm874_vm6, %v2994_v55, %v2999_v48  ;;  %v3004_v41 = vrot.slane %v8058_v11, 2  ;;  %v3011_v18 = vrot.slane %v8069_v15, 2 }
 0x98b   :  { %v2591_v57 = vpop.permute.xlu0 %2590  ;;  %v2519_v19 = vpop.permute.xlu1 %2518  ;;  %v3009_v51 = vrot.slane %v8083_v13, 2  ;;  %v3016_v15 = vrot.slane %v8087_v44, 2 }
 0x98c   :  { %v8098_v59 = vsel %vm2606_vm13, %v2555_v38, %v2591_v57  ;;  %v8101_v60 = vsel %vm2606_vm13, %v2519_v19, %v2555_v38  ;;  %v3001_v38 = vrot.slane %v8031_v29, 2  ;;  %v3008_v31 = vsel %vm874_vm6, %v3006_v58, %v3007_v22 }
 0x98d   :  { %v2707_v2 = vrot.slane %v8098_v59, 1  ;;  %5476 = vmatprep.mubr.msk.f32.mxu0 %vm2740_vm14, %v8098_v59  ;;  %v2704_v3 = vrot.slane %v8101_v60, 1  ;;  %v3012_v11 = vsel %vm874_vm6, %v3007_v22, %v3011_v18  ;;  %v3010_v49 = vsel %vm874_vm6, %v3004_v41, %v3009_v51 }
 0x98e   :  { %2978 = vmatmul.mubr.f32.gmra.mrb[28].mxu0 %v8101_v60  ;;  %v3002_v29 = vsel %vm874_vm6, %v2997_v0, %v3001_v38  ;;  %v3013_v19 = vrot.slane %v8094_v53, 2 }
 0x98f   :  { %v2557_v5 = vpop.permute.xlu0 %2556  ;;  %v2593_v26 = vpop.permute.xlu1 %2592  ;;  %v2708_v10 = vsel %vm599_vm5, %v2706_v61, %v2707_v2  ;;  %v2705_v34 = vsel %vm599_vm5, %v2703_v63, %v2704_v3  ;;  %5990 = vmatprep.mubr.msk.f32.mxu0 %vm6970_vm7, %v6971_v33 }
 0x990   :  { %v8115_v1 = vsel %vm2606_vm13, %v2557_v5, %v2593_v26  ;;  %5467 = vmatprep.mubr.msk.f32.mxu1 %vm2740_vm14, %v2708_v10 }
 0x991   :  { %v2711_v54 = vrot.slane %v8115_v1, 1  ;;  %2852 = vmatmul.mubr.f32.gmra.mrb[30].mxu1 %v2705_v34  ;;  %v3021_v57 = vrot.slane %v8115_v1, 2 }
 0x993   :  { %v2521_v20 = vpop.permute.xlu0 %2520  ;;  %v2712_v9 = vsel %vm599_vm5, %v2707_v2, %v2711_v54 }
 0x994   :  { %v8123_v4 = vsel %vm2606_vm13, %v2521_v20, %v2557_v5  ;;  %5468 = vmatprep.mubr.msk.f32.mxu1 %vm2740_vm14, %v2712_v9 }
 0x995   :  { %v2709_v8 = vrot.slane %v8123_v4, 1 }
 0x997   :  { %v2710_v27 = vsel %vm599_vm5, %v2704_v3, %v2709_v8 }
 0x998   :  { %2857 = vmatmul.mubr.f32.gmra.mrb[32].mxu1 %v2710_v27 }
 0x999   :  { %5477 = vmatprep.mubr.msk.f32.mxu1 %vm2740_vm14, %v2988_v17 }
 0x99c   :  { %3131 = vmatmul.mubr.f32.vlgmr.msra.gmra.mrb[34].mxu1 %v2985_v62 }
 0x99d   :  { %5478 = vmatprep.mubr.msk.f32.mxu1 %vm2740_vm14, %v2992_v30  ;;  %6267 = vmatpush3.bf16.msra.mxu1 %v7791_v21  ;;  %v2995_v21 = vsel %vm874_vm6, %v2993_v25, %v2994_v55 }
 0x99e   :  { %6268 = vmatprep.subr.bf16.mxu1 %v6969_v23 }
 0x9a0   :  { %3136 = vmatmul.mubr.f32.gmra.mrb[36].mxu1 %v2990_v6 }
 0x9a1   :  { %5479 = vmatprep.mubr.msk.f32.mxu1 %vm2740_vm14, %v2998_v52  ;;  %6270 = vmatpush3.bf16.msra.mxu1 %v7795_v46  ;;  %v3003_v46 = vrot.slane %v8061_v12, 2  ;;  %v3017_v12 = vrot.slane %v8098_v59, 2 }
 0x9a2   :  { %6271 = vmatprep.subr.bf16.mxu1 %v6969_v23 }
 0x9a3   :  { %v3018_v13 = vsel %vm874_vm6, %v3016_v15, %v3017_v12  ;;  %v3022_v59 = vsel %vm874_vm6, %v3017_v12, %v3021_v57  ;;  %v5485_v12 = vld [vmem:[#allocation23] ss:$0 sm:$0xff] }
 0x9a4   :  { %3141 = vmatmul.mubr.f32.gmra.mrb[38].mxu1 %v2995_v21 }
 0x9a5   :  { %5480 = vmatprep.mubr.msk.f32.mxu1 %vm2740_vm14, %v3002_v29  ;;  %6273 = vmatpush3.bf16.msra.mxu1 %v7799_v28  ;;  %v3005_v28 = vsel %vm874_vm6, %v3003_v46, %v3004_v41 }
 0x9a6   :  { %6274 = vmatprep.subr.bf16.mxu1 %v6969_v23 }
 0x9a8   :  { %3146 = vmatmul.mubr.f32.gmra.mrb[40].mxu1 %v3000_v39 }
 0x9a9   :  { %5481 = vmatprep.mubr.msk.f32.mxu1 %vm2740_vm14, %v3008_v31  ;;  %6276 = vmatpush3.bf16.msra.mxu1 %v7803_v56  ;;  %v3014_v56 = vrot.slane %v8101_v60, 2 }
 0x9aa   :  { %6277 = vmatprep.subr.bf16.mxu1 %v6969_v23 }
 0x9ab   :  { %v3015_v44 = vsel %vm874_vm6, %v3013_v19, %v3014_v56 }
 0x9ac   :  { %3151 = vmatmul.mubr.f32.gmra.mrb[42].mxu1 %v3005_v28 }
 0x9ad   :  { %5482 = vmatprep.mubr.msk.f32.mxu1 %vm2740_vm14, %v3012_v11  ;;  %6279 = vmatpush3.bf16.msra.mxu1 %v7807_v32  ;;  %v3019_v32 = vrot.slane %v8123_v4, 2 }
 0x9ae   :  { %6280 = vmatprep.subr.bf16.mxu1 %v6969_v23 }
 0x9af   :  { %v3020_v53 = vsel %vm874_vm6, %v3014_v56, %v3019_v32 }
 0x9b0   :  { %3156 = vmatmul.mubr.f32.gmra.mrb[44].mxu1 %v3010_v49 }
 0x9b1   :  { %5483 = vmatprep.mubr.msk.f32.mxu1 %vm2740_vm14, %v3018_v13  ;;  %6282 = vmatpush3.bf16.msra.mxu1 %v7811_v37 }
 0x9b2   :  { %6283 = vmatprep.subr.bf16.mxu1 %v6969_v23 }
 0x9b4   :  { %3161 = vmatmul.mubr.f32.gmra.mrb[46].mxu1 %v3015_v44 }
 0x9b5   :  { %5484 = vmatprep.mubr.msk.f32.mxu1 %vm2740_vm14, %v3022_v59  ;;  %6285 = vmatpush3.bf16.msra.mxu1 %v7814_v40 }
 0x9b6   :  { %6286 = vmatprep.subr.bf16.mxu1 %v6969_v23 }
 0x9b8   :  { %3166 = vmatmul.mubr.f32.gmra.mrb[48].mxu1 %v3020_v53 }
 0x9b9   :  { %6288 = vmatpush3.bf16.msra.mxu1 %v7818_v42  ;;  %6025 = vmatprep.mubr.msk.f32.mxu1 %vm6970_vm7, %v6971_v33 }
 0xa36   :  { %v2944_v37 = vpop.f32.mrb[14].mxu0 }
 0xa37   :  { %v2946_v60 = vpop.f32.mrb[15].mxu0 }
 0xa39   :  { %v2823_v61 = vpop.f32.mrb[18].mxu1 }
 0xa3a   :  { %v2945_v63 = vadd.f32 %v2944_v37, %v2823_v61  ;;  %v2825_v2 = vpop.f32.mrb[19].mxu1  ;;  %v2949_v3 = vpop.f32.mrb[16].mxu0 }
 0xa3b   :  { %v2951_v5 = vpop.f32.mrb[17].mxu0 }
 0xa3d   :  { %v2828_v26 = vpop.f32.mrb[20].mxu1 }
 0xa3e   :  { %v2950_v10 = vadd.f32 %v2949_v3, %v2828_v26  ;;  %v2830_v40 = vpop.f32.mrb[21].mxu1 }
 0xa41   :  { %v2954_v34 = vpop.f32.mrb[18].mxu0 }
 0xa42   :  { %v2956_v23 = vpop.f32.mrb[19].mxu0 }
 0xa46   :  { %v2959_v1 = vpop.f32.mrb[20].mxu0 }
 0xa47   :  { %v2961_v54 = vpop.f32.mrb[21].mxu0 }
 0xa49   :  { %v2833_v20 = vpop.f32.mrb[22].mxu1 }
 0xa4a   :  { %v2955_v9 = vadd.f32 %v2954_v34, %v2833_v20  ;;  %v2835_v42 = vpop.f32.mrb[23].mxu1 }
 0xa4d   :  { %v2838_v14 = vpop.f32.mrb[24].mxu1 }
 0xa4e   :  { %v2960_v16 = vadd.f32 %v2959_v1, %v2838_v14  ;;  %v2840_v33 = vpop.f32.mrb[25].mxu1 }
 0xa52   :  { %v2964_v4 = vpop.f32.mrb[22].mxu0 }
 0xa53   :  { %v2966_v8 = vpop.f32.mrb[23].mxu0 }
 0xa55   :  { %v2843_v24 = vpop.f32.mrb[26].mxu1 }
 0xa56   :  { %v2965_v43 = vadd.f32 %v2964_v4, %v2843_v24  ;;  %v2845_v27 = vpop.f32.mrb[27].mxu1  ;;  %v2969_v7 = vpop.f32.mrb[24].mxu0 }
 0xa57   :  { %v2971_v17 = vpop.f32.mrb[25].mxu0 }
 0xa5d   :  { %v2848_v62 = vpop.f32.mrb[28].mxu1  ;;  %v2974_v35 = vpop.f32.mrb[26].mxu0 }
 0xa5e   :  { %v2970_v0 = vadd.f32 %v2969_v7, %v2848_v62  ;;  %v2850_v36 = vpop.f32.mrb[29].mxu1  ;;  %v2976_v30 = vpop.f32.mrb[27].mxu0 }
 0xa61   :  { %v2979_v55 = vpop.f32.mrb[28].mxu0 }
 0xa62   :  { %v2981_v6 = vpop.f32.mrb[29].mxu0 }
 0xa64   :  { %v2853_v38 = vpop.f32.mrb[30].mxu1 }
 0xa65   :  { %v2975_v52 = vadd.f32 %v2974_v35, %v2853_v38  ;;  %v2855_v25 = vpop.f32.mrb[31].mxu1 }
 0xa6b   :  { %v2858_v21 = vpop.f32.mrb[32].mxu1 }
 0xa6c   :  { %v2980_v48 = vadd.f32 %v2979_v55, %v2858_v21  ;;  %v2860_v22 = vpop.f32.mrb[33].mxu1 }
 0xa6f   :  { %v3132_v29 = vpop.f32.mrb[34].mxu1 }
 0xa70   :  { %v3171_v58 = vadd.f32 %v3132_v29, %v2945_v63  ;;  %v3134_v46 = vpop.f32.mrb[35].mxu1 }
 0xa72   :  { %v3186_v56 = vadd.f32 %v5485_v12, %v3171_v58 }
 0xa73   :  { %v3137_v39 = vpop.f32.mrb[36].mxu1 }
 0xa74   :  { %v3172_v41 = vadd.f32 %v3137_v39, %v2950_v10  ;;  %v3139_v18 = vpop.f32.mrb[37].mxu1  ;;  %v8193_v59 = vmax.f32 %v3186_v56, 0.0 }
 0xa76   :  { %v3187_v11 = vadd.f32 %v5485_v12, %v3172_v41 }
 0xa77   :  { %v3142_v31 = vpop.f32.mrb[38].mxu1 }
 0xa78   :  { %v3173_v28 = vadd.f32 %v3142_v31, %v2955_v9  ;;  %v3144_v51 = vpop.f32.mrb[39].mxu1  ;;  %v8191_v19 = vmax.f32 %v3187_v11, 0.0 }
 0xa7a   :  { %v3188_v49 = vadd.f32 %v5485_v12, %v3173_v28  ;;  %v3202_v61 = vadd.f32 %v8191_v19, %v8193_v59 }
 0xa7b   :  { %v3147_v15 = vpop.f32.mrb[40].mxu1 }
 0xa7c   :  { %v3174_v57 = vadd.f32 %v3147_v15, %v2960_v16  ;;  %v3149_v13 = vpop.f32.mrb[41].mxu1  ;;  %v8195_v53 = vmax.f32 %v3188_v49, 0.0 }
 0xa7e   :  { %v3189_v32 = vadd.f32 %v5485_v12, %v3174_v57  ;;  %v3203_v3 = vadd.f32 %v3202_v61, %v8195_v53 }
 0xa7f   :  { %v3152_v44 = vpop.f32.mrb[42].mxu1 }
 0xa80   :  { %v3175_v37 = vadd.f32 %v3152_v44, %v2965_v43  ;;  %v3154_v60 = vpop.f32.mrb[43].mxu1  ;;  %v8199_v63 = vmax.f32 %v3189_v32, 0.0 }
 0xa82   :  { %v3204_v10 = vadd.f32 %v3203_v3, %v8199_v63  ;;  %v3190_v23 = vadd.f32 %v5485_v12, %v3175_v37 }
 0xa83   :  { %v3157_v2 = vpop.f32.mrb[44].mxu1 }
 0xa84   :  { %v3176_v5 = vadd.f32 %v3157_v2, %v2970_v0  ;;  %v3159_v26 = vpop.f32.mrb[45].mxu1  ;;  %v3205_v20 = vrot.slane %v3204_v10, 4  ;;  %v8205_v16 = vmax.f32 %v3190_v23, 0.0 }
 0xa86   :  { %v3191_v40 = vadd.f32 %v5485_v12, %v3176_v5  ;;  %v3206_v24 = vadd.f32 %v3205_v20, %v3204_v10 }
 0xa87   :  { %v3162_v34 = vpop.f32.mrb[46].mxu1 }
 0xa88   :  { %v3177_v1 = vadd.f32 %v3162_v34, %v2975_v52  ;;  %v3164_v54 = vpop.f32.mrb[47].mxu1  ;;  %v8203_v9 = vmax.f32 %v3191_v40, 0.0  ;;  %v3207_v62 = vrot.slane %v3206_v24, 2 }
 0xa8a   :  { %v3192_v42 = vadd.f32 %v5485_v12, %v3177_v1  ;;  %v3211_v43 = vadd.f32 %v8203_v9, %v8205_v16  ;;  %v3208_v36 = vadd.f32 %v3207_v62, %v3206_v24 }
 0xa8b   :  { %v3167_v14 = vpop.f32.mrb[48].mxu1 }
 0xa8c   :  { %v8207_v33 = vmax.f32 %v3192_v42, 0.0  ;;  %v3178_v4 = vadd.f32 %v3167_v14, %v2980_v48  ;;  %v3169_v8 = vpop.f32.mrb[49].mxu1  ;;  %v3209_v38 = vrot.slane %v3208_v36, 1 }
 0xa8e   :  { %v3193_v27 = vadd.f32 %v5485_v12, %v3178_v4  ;;  %v3212_v7 = vadd.f32 %v3211_v43, %v8207_v33  ;;  %v3210_v25 = vadd.f32 %v3209_v38, %v3208_v36 }
 0xa90   :  { %v8212_v17 = vmax.f32 %v3193_v27, 0.0 }
 0xa92   :  { %v3213_v35 = vadd.f32 %v3212_v7, %v8212_v17 }
 0xa94   :  { %v3214_v0 = vrot.slane %v3213_v35, 4 }
 0xa96   :  { %v3215_v30 = vadd.f32 %v3214_v0, %v3213_v35 }
 0xa98   :  { %v3216_v55 = vrot.slane %v3215_v30, 2 }
 0xa9a   :  { %v3217_v6 = vadd.f32 %v3216_v55, %v3215_v30 }
 0xa9c   :  { %v3218_v52 = vrot.slane %v3217_v6, 1 }
 0xa9e   :  { %v3219_v21 = vadd.f32 %v3218_v52, %v3217_v6 }
 0xaa0   :  { %v3222_v48 = vsel %vm1091_vm9, %v3219_v21, %v3210_v25 }
 0xaa1   :  { %5991 = vmatmul.mubr.f32.vlgmr.msra.gmra.mrb[30].mxu0 %v3222_v48 }
 0xb74   :  { %v8216_v22 = vpop.f32.mrb[30].mxu0 }
 0xb75   :  { %v3301_v29 = vrot.slane %v8216_v22, %v7583_v47  ;;  %v5992_v58 = vpop.f32.mrb[31].mxu0 }
 0xb77   :  { %v3302_v46 = vcombine.high %v3301_v29, %v3301_v29  ;;  %v3309_v39 = vrot.slane %v3301_v29, %v7583_v47 }
 0xb79   :  { %v3316_v41 = vrot.slane %v3302_v46, %v7583_v47  ;;  %v3320_v18 = vrot.slane %v3309_v39, %v7587_v50 }
 0xb7b   :  { %v3324_v31 = vrot.slane %v3316_v41, %v7587_v50  ;;  %v3327_v28 = vsub.f32 %v8193_v59, %v3320_v18  ;;  %v3328_v51 = vsub.f32 %v8191_v19, %v3320_v18  ;;  %v3329_v12 = vsub.f32 %v8195_v53, %v3320_v18 }
 0xb7c   :  { %v3330_v49 = vsub.f32 %v8199_v63, %v3320_v18 }
 0xb7d   :  { %v3331_v11 = vsub.f32 %v8205_v16, %v3324_v31  ;;  %v3332_v15 = vsub.f32 %v8203_v9, %v3324_v31  ;;  %v3333_v56 = vsub.f32 %v8207_v33, %v3324_v31  ;;  %v3335_v57 = vmul.f32 %v3327_v28, %v3327_v28 }
 0xb7e   :  { %v3336_v13 = vmul.f32 %v3328_v51, %v3328_v51  ;;  %v3334_v32 = vsub.f32 %v8212_v17, %v3324_v31  ;;  %v3337_v60 = vmul.f32 %v3329_v12, %v3329_v12  ;;  %v3338_v5 = vmul.f32 %v3330_v49, %v3330_v49 }
 0xb7f   :  { %v3339_v44 = vmul.f32 %v3331_v11, %v3331_v11  ;;  %v3340_v37 = vmul.f32 %v3332_v15, %v3332_v15  ;;  %v3341_v2 = vmul.f32 %v3333_v56, %v3333_v56 }
 0xb80   :  { %v3343_v61 = vadd.f32 %v3336_v13, %v3335_v57  ;;  %v3342_v10 = vmul.f32 %v3334_v32, %v3334_v32 }
 0xb81   :  { %v3352_v3 = vadd.f32 %v3340_v37, %v3339_v44 }
 0xb82   :  { %v3344_v26 = vadd.f32 %v3343_v61, %v3337_v60 }
 0xb83   :  { %v3353_v40 = vadd.f32 %v3352_v3, %v3341_v2 }
 0xb84   :  { %v3345_v34 = vadd.f32 %v3344_v26, %v3338_v5 }
 0xb85   :  { %v3354_v23 = vadd.f32 %v3353_v40, %v3342_v10 }
 0xb86   :  { %v3346_v1 = vrot.slane %v3345_v34, 4 }
 0xb87   :  { %v3355_v54 = vrot.slane %v3354_v23, 4 }
 0xb88   :  { %v3347_v20 = vadd.f32 %v3346_v1, %v3345_v34 }
 0xb89   :  { %v3356_v42 = vadd.f32 %v3355_v54, %v3354_v23 }
 0xb8a   :  { %v3348_v14 = vrot.slane %v3347_v20, 2 }
 0xb8b   :  { %v3357_v4 = vrot.slane %v3356_v42, 2 }
 0xb8c   :  { %v3349_v8 = vadd.f32 %v3348_v14, %v3347_v20 }
 0xb8d   :  { %v3358_v24 = vadd.f32 %v3357_v4, %v3356_v42 }
 0xb8e   :  { %v3350_v43 = vrot.slane %v3349_v8, 1 }
 0xb8f   :  { %v3359_v27 = vrot.slane %v3358_v24, 1 }
 0xb90   :  { %v3351_v7 = vadd.f32 %v3350_v43, %v3349_v8 }
 0xb91   :  { %v3360_v62 = vadd.f32 %v3359_v27, %v3358_v24 }
 0xb93   :  { %v3363_v35 = vsel %vm1091_vm9, %v3360_v62, %v3351_v7 }
 0xb94   :  { %6026 = vmatmul.mubr.f32.vlgmr.msra.gmra.mrb[50].mxu1 %v3363_v35 }
 0xb95   :  { %6895 = shalt.err (!%p6892_p0)  }
 0xb96   :  { %s6896_s3 = scalar_lea.vmem %s378_s2, 4096  ;;  %p6901_p2 = scmp.lt.s32.totalorder %s378_s2, %s378_s2 }
 0xb97   :  { %p6897_p1 = scmp.ne.s32.totalorder %s378_s2, %s6896_s3  ;;  %p6902_p3 = scmp.lt.s32.totalorder %s6896_s3, %s6896_s3 }
 0xb99   :  { %p6903_p4 = por %p6902_p3, %p6901_p2 }
 0xb9b   :  { %p6904_p5 = pnand %p6903_p4, %p6897_p1 }
 0xb9d   :  { %6907 = shalt.err (!%p6904_p5)  }
 0xb9e   :  { %380 = dma.hbm_to_vmem [thread:$0]  %s8399_s21, 4096, %s378_s2, [#allocation5 + $0x2]  ;;  %v5486_v6 = vld [vmem:[#allocation25] ss:$0 sm:$0xff]  ;;  %v5487_v25 = vld [vmem:[#allocation26] ss:$0 sm:$0xff] }
 0xc67   :  { %v3431_v0 = vpop.f32.mrb[50].mxu1 }
 0xc68   :  { %v3435_v36 = vmax.f32 %v3431_v0, 0.0  ;;  %v6027_v30 = vpop.f32.mrb[51].mxu1 }
 0xc6a   :  { %v3436_v55 = vadd.f32 1e-05, %v3435_v36 }
 0xc6c   :  { %6466 = vrsqrt.f32 %v3436_v55 }
 0xc76   :  { %v6467_v38 = vpop.eup %6466 }
 0xc77   :  { %v3445_v52 = vmul.f32 %v6467_v38, %v5486_v6 }
 0xc79   :  { %v3447_v21 = vmul.f32 %v3445_v52, %v8216_v22  ;;  %v3462_v48 = vrot.slane %v3445_v52, %v7583_v47 }
 0xc7b   :  { %v3454_v29 = vsub.f32 %v5487_v25, %v3447_v21  ;;  %v3463_v58 = vcombine.high %v3462_v48, %v3462_v48  ;;  %v3470_v46 = vrot.slane %v3462_v48, %v7583_v47 }
 0xc7d   :  { %v3477_v39 = vrot.slane %v3463_v58, %v7583_v47  ;;  %v3481_v41 = vrot.slane %v3470_v46, %v7587_v50  ;;  %v3503_v18 = vrot.slane %v3454_v29, %v7583_v47 }
 0xc7f   :  { %v3485_v31 = vrot.slane %v3477_v39, %v7587_v50  ;;  %v3504_v28 = vcombine.high %v3503_v18, %v3503_v18  ;;  %v3511_v51 = vrot.slane %v3503_v18, %v7583_v47  ;;  %v3488_v12 = vmul.f32 %v3481_v41, %v8193_v59 }
 0xc80   :  { %v3489_v22 = vmul.f32 %v3481_v41, %v8191_v19  ;;  %v3490_v11 = vmul.f32 %v3481_v41, %v8195_v53  ;;  %v3491_v15 = vmul.f32 %v3481_v41, %v8199_v63 }
 0xc81   :  { %v3518_v56 = vrot.slane %v3504_v28, %v7583_v47  ;;  %v3522_v49 = vrot.slane %v3511_v51, %v7587_v50  ;;  %v3492_v57 = vmul.f32 %v3485_v31, %v8205_v16  ;;  %v3493_v13 = vmul.f32 %v3485_v31, %v8203_v9 }
 0xc82   :  { %v3494_v32 = vmul.f32 %v3485_v31, %v8207_v33  ;;  %v3495_v44 = vmul.f32 %v3485_v31, %v8212_v17 }
 0xc83   :  { %v3526_v59 = vrot.slane %v3518_v56, %v7587_v50  ;;  %v3529_v37 = vadd.f32 %v3522_v49, %v3488_v12  ;;  %v3530_v19 = vadd.f32 %v3522_v49, %v3489_v22  ;;  %v3531_v60 = vadd.f32 %v3522_v49, %v3490_v11 }
 0xc84   :  { %v3532_v53 = vadd.f32 %v3522_v49, %v3491_v15 }
 0xc85   :  { %v3533_v61 = vadd.f32 %v3526_v59, %v3492_v57  ;;  %v3534_v63 = vadd.f32 %v3526_v59, %v3493_v13  ;;  %v3535_v2 = vadd.f32 %v3526_v59, %v3494_v32  ;;  %v3536_v3 = vadd.f32 %v3526_v59, %v3495_v44 }
 0xc86   :  { %v3545_v5 = vcombine.low %v3529_v37, %v3531_v60  ;;  %v3546_v26 = vcombine.high %v3529_v37, %v3531_v60  ;;  %v3613_v10 = vcombine.low %v3530_v19, %v3532_v53  ;;  %v3614_v16 = vcombine.high %v3530_v19, %v3532_v53 }
 0xc87   :  { %v3547_v40 = vcombine.low %v3533_v61, %v3535_v2  ;;  %v3548_v9 = vcombine.high %v3533_v61, %v3535_v2  ;;  %v3615_v34 = vcombine.low %v3534_v63, %v3536_v3  ;;  %v3616_v33 = vcombine.high %v3534_v63, %v3536_v3 }
 0xc88   :  { %v3555_v17 = vrot.slane %v3545_v5, %v7583_v47  ;;  %v3562_v23 = vrot.slane %v3546_v26, %v7583_v47  ;;  %v3623_v14 = vrot.slane %v3613_v10, %v7583_v47  ;;  %v3630_v4 = vrot.slane %v3614_v16, %v7583_v47 }
 0xc89   :  { %v3569_v1 = vrot.slane %v3547_v40, %v7583_v47  ;;  %v3576_v54 = vrot.slane %v3548_v9, %v7583_v47  ;;  %v3637_v20 = vrot.slane %v3615_v34, %v7583_v47  ;;  %v3644_v42 = vrot.slane %v3616_v33, %v7583_v47 }
 0xc8b   :  { %v3577_v8 = vcombine.low %v3555_v17, %v3569_v1  ;;  %v3578_v24 = vcombine.high %v3555_v17, %v3569_v1  ;;  %v3579_v43 = vcombine.low %v3562_v23, %v3576_v54  ;;  %v3580_v27 = vcombine.high %v3562_v23, %v3576_v54 }
 0xc8c   :  { %v3645_v7 = vcombine.low %v3623_v14, %v3637_v20  ;;  %v3646_v62 = vcombine.high %v3623_v14, %v3637_v20  ;;  %v3647_v35 = vcombine.low %v3630_v4, %v3644_v42  ;;  %v3648_v0 = vcombine.high %v3630_v4, %v3644_v42 }
 0xc8d   :  { %v3587_v36 = vrot.slane %v3577_v8, %v7583_v47  ;;  %v3594_v30 = vrot.slane %v3579_v43, %v7583_v47  ;;  %v3601_v55 = vrot.slane %v3578_v24, %v7583_v47  ;;  %v3608_v6 = vrot.slane %v3580_v27, %v7583_v47 }
 0xc8e   :  { %v3655_v38 = vrot.slane %v3645_v7, %v7583_v47  ;;  %v3662_v52 = vrot.slane %v3647_v35, %v7583_v47  ;;  %v3669_v25 = vrot.slane %v3646_v62, %v7583_v47  ;;  %v3676_v21 = vrot.slane %v3648_v0, %v7583_v47 }
 0xc8f   :  { %v3609_v48 = vcombine.high %v3587_v36, %v3587_v36  ;;  %v3610_v29 = vcombine.high %v3594_v30, %v3594_v30  ;;  %v3611_v58 = vcombine.high %v3601_v55, %v3601_v55  ;;  %v3612_v46 = vcombine.high %v3608_v6, %v3608_v6 }
 0xc90   :  { %v3677_v39 = vcombine.high %v3655_v38, %v3655_v38  ;;  %v3678_v41 = vcombine.high %v3662_v52, %v3662_v52  ;;  %v3679_v18 = vcombine.high %v3669_v25, %v3669_v25  ;;  %v3680_v31 = vcombine.high %v3676_v21, %v3676_v21 }
 0xc91   :  { %v8280_v28 = vpack.c.bf16 %v3587_v36, %v3587_v36  ;;  %v3698_v51 = vpack.c.bf16 %v3601_v55, %v3601_v55  ;;  %v8282_v12 = vpack.c.bf16 %v3609_v48, %v3609_v48  ;;  %v8284_v22 = vpack.c.bf16 %v3611_v58, %v3611_v58 }
 0xc92   :  { %v8286_v11 = vpack.c.bf16 %v3594_v30, %v3594_v30  ;;  %v8288_v15 = vpack.c.bf16 %v3608_v6, %v3608_v6  ;;  %v8290_v47 = vpack.c.bf16 %v3610_v29, %v3610_v29  ;;  %v8292_v56 = vpack.c.bf16 %v3612_v46, %v3612_v46 }
 0xc93   :  { %v8294_v49 = vpack.c.bf16 %v3655_v38, %v3655_v38  ;;  %v8296_v57 = vpack.c.bf16 %v3669_v25, %v3669_v25  ;;  %v8298_v13 = vpack.c.bf16 %v3677_v39, %v3677_v39  ;;  %v8300_v32 = vpack.c.bf16 %v3679_v18, %v3679_v18 }
 0xc94   :  { %v8302_v44 = vpack.c.bf16 %v3662_v52, %v3662_v52  ;;  %v8304_v59 = vpack.c.bf16 %v3676_v21, %v3676_v21  ;;  %v8306_v37 = vpack.c.bf16 %v3678_v41, %v3678_v41  ;;  %v8308_v19 = vpack.c.bf16 %v3680_v31, %v3680_v31 }
 0xc95   :  { %6928 = dma.done.wait [#allocation5], 65536 }
 0xc96   :  { %6929 = vsyncadd [#allocation5], 4294901760  ;;  %4283 = vmatprep.mubr.bf16.mxu0 %v3698_v51  ;;  %4611 = vmatprep.mubr.bf16.mxu1 %v3698_v51  ;;  %v3718_v60 = vld [vmem:[#allocation2 + $0x8] sm:$0xff]  ;;  %v3720_v53 = vld [vmem:[#allocation2 + $0x18] sm:$0xff] }
 0xc97   :  { %v3717_v61 = vld [vmem:[#allocation2] sm:$0xff]  ;;  %4251 = vmatprep.subr.bf16.mxu0 %v3718_v60  ;;  %4579 = vmatprep.subr.bf16.mxu1 %v3720_v53  ;;  %v3719_v63 = vld [vmem:[#allocation2 + $0x10] sm:$0xff]  ;;  %v3722_v2 = vld [vmem:[#allocation2 + $0x28] sm:$0xff] }
 0xc98   :  { %v3724_v3 = vld [vmem:[#allocation2 + $0x38] sm:$0xff]  ;;  %4252 = vmatpush1.bf16.msra.mxu0 %v3717_v61  ;;  %4580 = vmatpush1.bf16.msra.mxu1 %v3719_v63  ;;  %v3721_v5 = vld [vmem:[#allocation2 + $0x20] sm:$0xff]  ;;  %v3723_v26 = vld [vmem:[#allocation2 + $0x30] sm:$0xff] }
 0xc99   :  { %4253 = vmatprep.subr.bf16.mxu0 %v3722_v2  ;;  %4581 = vmatprep.subr.bf16.mxu1 %v3724_v3  ;;  %v3726_v10 = vld [vmem:[#allocation2 + $0x48] sm:$0xff]  ;;  %v3728_v16 = vld [vmem:[#allocation2 + $0x58] sm:$0xff]  ;;  %v3725_v40 = vld [vmem:[#allocation2 + $0x40] sm:$0xff] }
 0xc9a   :  { %v3727_v9 = vld [vmem:[#allocation2 + $0x50] sm:$0xff]  ;;  %v3730_v34 = vld [vmem:[#allocation2 + $0x68] sm:$0xff]  ;;  %v3732_v33 = vld [vmem:[#allocation2 + $0x78] sm:$0xff] }
 0xc9b   :  { %v3729_v17 = vld [vmem:[#allocation2 + $0x60] sm:$0xff]  ;;  %v3731_v23 = vld [vmem:[#allocation2 + $0x70] sm:$0xff]  ;;  %v3734_v1 = vld [vmem:[#allocation2 + $0x88] sm:$0xff] }
 0xc9c   :  { %4254 = vmatpush1.bf16.msra.mxu0 %v3721_v5  ;;  %4582 = vmatpush1.bf16.msra.mxu1 %v3723_v26  ;;  %v3736_v54 = vld [vmem:[#allocation2 + $0x98] sm:$0xff]  ;;  %v3733_v20 = vld [vmem:[#allocation2 + $0x80] sm:$0xff]  ;;  %v3735_v42 = vld [vmem:[#allocation2 + $0x90] sm:$0xff] }
 0xc9d   :  { %4255 = vmatprep.subr.bf16.mxu0 %v3726_v10  ;;  %4583 = vmatprep.subr.bf16.mxu1 %v3728_v16  ;;  %v3738_v14 = vld [vmem:[#allocation2 + $0xa8] sm:$0xff]  ;;  %v3740_v4 = vld [vmem:[#allocation2 + $0xb8] sm:$0xff]  ;;  %v3737_v8 = vld [vmem:[#allocation2 + $0xa0] sm:$0xff] }
 0xc9e   :  { %v3739_v24 = vld [vmem:[#allocation2 + $0xb0] sm:$0xff]  ;;  %v3742_v43 = vld [vmem:[#allocation2 + $0xc8] sm:$0xff]  ;;  %v3744_v27 = vld [vmem:[#allocation2 + $0xd8] sm:$0xff] }
 0xc9f   :  { %v3741_v7 = vld [vmem:[#allocation2 + $0xc0] sm:$0xff]  ;;  %v3743_v62 = vld [vmem:[#allocation2 + $0xd0] sm:$0xff]  ;;  %v3746_v35 = vld [vmem:[#allocation2 + $0xe8] sm:$0xff] }
 0xca0   :  { %4256 = vmatpush1.bf16.msra.mxu0 %v3725_v40  ;;  %4584 = vmatpush1.bf16.msra.mxu1 %v3727_v9  ;;  %v3748_v0 = vld [vmem:[#allocation2 + $0xf8] sm:$0xff]  ;;  %v3745_v36 = vld [vmem:[#allocation2 + $0xe0] sm:$0xff]  ;;  %v3747_v30 = vld [vmem:[#allocation2 + $0xf0] sm:$0xff] }
 0xca1   :  { %4257 = vmatprep.subr.bf16.mxu0 %v3730_v34  ;;  %4585 = vmatprep.subr.bf16.mxu1 %v3732_v33  ;;  %v3750_v55 = vld [vmem:[#allocation2 + $0x108] sm:$0xff]  ;;  %v3752_v6 = vld [vmem:[#allocation2 + $0x118] sm:$0xff]  ;;  %v3749_v38 = vld [vmem:[#allocation2 + $0x100] sm:$0xff] }
 0xca2   :  { %v3751_v52 = vld [vmem:[#allocation2 + $0x110] sm:$0xff]  ;;  %v3754_v25 = vld [vmem:[#allocation2 + $0x128] sm:$0xff]  ;;  %v3756_v21 = vld [vmem:[#allocation2 + $0x138] sm:$0xff] }
 0xca3   :  { %v3753_v48 = vld [vmem:[#allocation2 + $0x120] sm:$0xff]  ;;  %v3755_v29 = vld [vmem:[#allocation2 + $0x130] sm:$0xff]  ;;  %v3758_v58 = vld [vmem:[#allocation2 + $0x148] sm:$0xff] }
 0xca4   :  { %4258 = vmatpush1.bf16.msra.mxu0 %v3729_v17  ;;  %4586 = vmatpush1.bf16.msra.mxu1 %v3731_v23  ;;  %v3760_v46 = vld [vmem:[#allocation2 + $0x158] sm:$0xff]  ;;  %v3757_v39 = vld [vmem:[#allocation2 + $0x140] sm:$0xff]  ;;  %v3759_v41 = vld [vmem:[#allocation2 + $0x150] sm:$0xff] }
 0xca5   :  { %4259 = vmatprep.subr.bf16.mxu0 %v3734_v1  ;;  %4587 = vmatprep.subr.bf16.mxu1 %v3736_v54  ;;  %v3762_v18 = vld [vmem:[#allocation2 + $0x168] sm:$0xff]  ;;  %v3764_v31 = vld [vmem:[#allocation2 + $0x178] sm:$0xff]  ;;  %v3761_v51 = vld [vmem:[#allocation2 + $0x160] sm:$0xff] }
 0xca6   :  { %v3763_v60 = vld [vmem:[#allocation2 + $0x170] sm:$0xff]  ;;  %v3766_v53 = vld [vmem:[#allocation2 + $0x188] sm:$0xff]  ;;  %v3768_v61 = vld [vmem:[#allocation2 + $0x198] sm:$0xff] }
 0xca7   :  { %v3765_v63 = vld [vmem:[#allocation2 + $0x180] sm:$0xff]  ;;  %v3767_v2 = vld [vmem:[#allocation2 + $0x190] sm:$0xff]  ;;  %v3770_v3 = vld [vmem:[#allocation2 + $0x1a8] sm:$0xff] }
 0xca8   :  { %4260 = vmatpush1.bf16.msra.mxu0 %v3733_v20  ;;  %4588 = vmatpush1.bf16.msra.mxu1 %v3735_v42  ;;  %v3772_v5 = vld [vmem:[#allocation2 + $0x1b8] sm:$0xff]  ;;  %v3769_v26 = vld [vmem:[#allocation2 + $0x1a0] sm:$0xff]  ;;  %v3771_v10 = vld [vmem:[#allocation2 + $0x1b0] sm:$0xff] }
 0xca9   :  { %4261 = vmatprep.subr.bf16.mxu0 %v3738_v14  ;;  %4589 = vmatprep.subr.bf16.mxu1 %v3740_v4  ;;  %v3774_v16 = vld [vmem:[#allocation2 + $0x1c8] sm:$0xff]  ;;  %v3776_v40 = vld [vmem:[#allocation2 + $0x1d8] sm:$0xff]  ;;  %v3773_v9 = vld [vmem:[#allocation2 + $0x1c0] sm:$0xff] }
 0xcaa   :  { %v3775_v34 = vld [vmem:[#allocation2 + $0x1d0] sm:$0xff]  ;;  %v3778_v33 = vld [vmem:[#allocation2 + $0x1e8] sm:$0xff]  ;;  %v3780_v17 = vld [vmem:[#allocation2 + $0x1f8] sm:$0xff] }
 0xcab   :  { %v3777_v23 = vld [vmem:[#allocation2 + $0x1e0] sm:$0xff]  ;;  %v3779_v1 = vld [vmem:[#allocation2 + $0x1f0] sm:$0xff]  ;;  %v3782_v54 = vld [vmem:[#allocation2 + $0x208] sm:$0xff] }
 0xcac   :  { %4262 = vmatpush1.bf16.msra.mxu0 %v3737_v8  ;;  %4590 = vmatpush1.bf16.msra.mxu1 %v3739_v24  ;;  %v3784_v20 = vld [vmem:[#allocation2 + $0x218] sm:$0xff]  ;;  %v3781_v42 = vld [vmem:[#allocation2 + $0x200] sm:$0xff]  ;;  %v3783_v14 = vld [vmem:[#allocation2 + $0x210] sm:$0xff] }
 0xcad   :  { %4263 = vmatprep.subr.bf16.mxu0 %v3742_v43  ;;  %4591 = vmatprep.subr.bf16.mxu1 %v3744_v27  ;;  %v3786_v4 = vld [vmem:[#allocation2 + $0x228] sm:$0xff]  ;;  %v3788_v8 = vld [vmem:[#allocation2 + $0x238] sm:$0xff]  ;;  %v3785_v24 = vld [vmem:[#allocation2 + $0x220] sm:$0xff] }
 0xcae   :  { %v3787_v43 = vld [vmem:[#allocation2 + $0x230] sm:$0xff]  ;;  %v3790_v27 = vld [vmem:[#allocation2 + $0x248] sm:$0xff] }
 0xcb0   :  { %4264 = vmatpush1.bf16.msra.mxu0 %v3741_v7  ;;  %4592 = vmatpush1.bf16.msra.mxu1 %v3743_v62  ;;  %v3792_v7 = vld [vmem:[#allocation2 + $0x258] sm:$0xff]  ;;  %v3789_v62 = vld [vmem:[#allocation2 + $0x240] sm:$0xff] }
 0xcb1   :  { %4265 = vmatprep.subr.bf16.mxu0 %v3746_v35  ;;  %4593 = vmatprep.subr.bf16.mxu1 %v3748_v0  ;;  %v3791_v35 = vld [vmem:[#allocation2 + $0x250] sm:$0xff]  ;;  %v3794_v0 = vld [vmem:[#allocation2 + $0x268] sm:$0xff] }
 0xcb4   :  { %4266 = vmatpush1.bf16.msra.mxu0 %v3745_v36  ;;  %4594 = vmatpush1.bf16.msra.mxu1 %v3747_v30  ;;  %v3793_v36 = vld [vmem:[#allocation2 + $0x260] sm:$0xff]  ;;  %v3795_v30 = vld [vmem:[#allocation2 + $0x270] sm:$0xff] }
 0xcb5   :  { %4267 = vmatprep.subr.bf16.mxu0 %v3750_v55  ;;  %4595 = vmatprep.subr.bf16.mxu1 %v3752_v6  ;;  %v3798_v55 = vld [vmem:[#allocation2 + $0x288] sm:$0xff]  ;;  %v3800_v6 = vld [vmem:[#allocation2 + $0x298] sm:$0xff] }
 0xcb8   :  { %4268 = vmatpush1.bf16.msra.mxu0 %v3749_v38  ;;  %4596 = vmatpush1.bf16.msra.mxu1 %v3751_v52  ;;  %v3799_v38 = vld [vmem:[#allocation2 + $0x290] sm:$0xff]  ;;  %v3802_v52 = vld [vmem:[#allocation2 + $0x2a8] sm:$0xff] }
 0xcb9   :  { %4269 = vmatprep.subr.bf16.mxu0 %v3754_v25  ;;  %4597 = vmatprep.subr.bf16.mxu1 %v3756_v21  ;;  %v3804_v25 = vld [vmem:[#allocation2 + $0x2b8] sm:$0xff]  ;;  %v3801_v21 = vld [vmem:[#allocation2 + $0x2a0] sm:$0xff] }
 0xcbc   :  { %4270 = vmatpush1.bf16.msra.mxu0 %v3753_v48  ;;  %4598 = vmatpush1.bf16.msra.mxu1 %v3755_v29  ;;  %v3803_v48 = vld [vmem:[#allocation2 + $0x2b0] sm:$0xff]  ;;  %v3806_v29 = vld [vmem:[#allocation2 + $0x2c8] sm:$0xff] }
 0xcbd   :  { %4271 = vmatprep.subr.bf16.mxu0 %v3758_v58  ;;  %4599 = vmatprep.subr.bf16.mxu1 %v3760_v46  ;;  %v3808_v58 = vld [vmem:[#allocation2 + $0x2d8] sm:$0xff]  ;;  %v3805_v46 = vld [vmem:[#allocation2 + $0x2c0] sm:$0xff] }
 0xcc0   :  { %4272 = vmatpush1.bf16.msra.mxu0 %v3757_v39  ;;  %4600 = vmatpush1.bf16.msra.mxu1 %v3759_v41  ;;  %v3807_v39 = vld [vmem:[#allocation2 + $0x2d0] sm:$0xff]  ;;  %v3810_v41 = vld [vmem:[#allocation2 + $0x2e8] sm:$0xff] }
 0xcc1   :  { %4273 = vmatprep.subr.bf16.mxu0 %v3762_v18  ;;  %4601 = vmatprep.subr.bf16.mxu1 %v3764_v31  ;;  %v3812_v18 = vld [vmem:[#allocation2 + $0x2f8] sm:$0xff]  ;;  %v3809_v31 = vld [vmem:[#allocation2 + $0x2e0] sm:$0xff] }
 0xcc4   :  { %4274 = vmatpush1.bf16.msra.mxu0 %v3761_v51  ;;  %4602 = vmatpush1.bf16.msra.mxu1 %v3763_v60  ;;  %v3811_v51 = vld [vmem:[#allocation2 + $0x2f0] sm:$0xff]  ;;  %v3814_v60 = vld [vmem:[#allocation2 + $0x308] sm:$0xff] }
 0xcc5   :  { %4275 = vmatprep.subr.bf16.mxu0 %v3766_v53  ;;  %4603 = vmatprep.subr.bf16.mxu1 %v3768_v61  ;;  %v3816_v53 = vld [vmem:[#allocation2 + $0x318] sm:$0xff]  ;;  %v3813_v61 = vld [vmem:[#allocation2 + $0x300] sm:$0xff] }
 0xcc8   :  { %4276 = vmatpush1.bf16.msra.mxu0 %v3765_v63  ;;  %4604 = vmatpush1.bf16.msra.mxu1 %v3767_v2  ;;  %v3815_v63 = vld [vmem:[#allocation2 + $0x310] sm:$0xff]  ;;  %v3818_v2 = vld [vmem:[#allocation2 + $0x328] sm:$0xff] }
 0xcc9   :  { %4277 = vmatprep.subr.bf16.mxu0 %v3770_v3  ;;  %4605 = vmatprep.subr.bf16.mxu1 %v3772_v5  ;;  %v3820_v3 = vld [vmem:[#allocation2 + $0x338] sm:$0xff]  ;;  %v3817_v5 = vld [vmem:[#allocation2 + $0x320] sm:$0xff] }
 0xccc   :  { %4278 = vmatpush1.bf16.msra.mxu0 %v3769_v26  ;;  %4606 = vmatpush1.bf16.msra.mxu1 %v3771_v10  ;;  %v3819_v26 = vld [vmem:[#allocation2 + $0x330] sm:$0xff]  ;;  %v3822_v10 = vld [vmem:[#allocation2 + $0x348] sm:$0xff] }
 0xccd   :  { %4279 = vmatprep.subr.bf16.mxu0 %v3774_v16  ;;  %4607 = vmatprep.subr.bf16.mxu1 %v3776_v40  ;;  %v3824_v16 = vld [vmem:[#allocation2 + $0x358] sm:$0xff]  ;;  %v3821_v40 = vld [vmem:[#allocation2 + $0x340] sm:$0xff] }
 0xcd0   :  { %4280 = vmatpush1.bf16.msra.mxu0 %v3773_v9  ;;  %4608 = vmatpush1.bf16.msra.mxu1 %v3775_v34  ;;  %v3823_v9 = vld [vmem:[#allocation2 + $0x350] sm:$0xff]  ;;  %v3826_v34 = vld [vmem:[#allocation2 + $0x368] sm:$0xff] }
 0xcd1   :  { %4281 = vmatprep.subr.bf16.mxu0 %v3778_v33  ;;  %4609 = vmatprep.subr.bf16.mxu1 %v3780_v17  ;;  %v3828_v33 = vld [vmem:[#allocation2 + $0x378] sm:$0xff]  ;;  %v3825_v17 = vld [vmem:[#allocation2 + $0x360] sm:$0xff] }
 0xcd4   :  { %4282 = vmatpush1.bf16.msra.mxu0 %v3777_v23  ;;  %4610 = vmatpush1.bf16.msra.mxu1 %v3779_v1  ;;  %v3827_v23 = vld [vmem:[#allocation2 + $0x370] sm:$0xff]  ;;  %v3830_v1 = vld [vmem:[#allocation2 + $0x388] sm:$0xff] }
 0xcd5   :  { %4292 = vmatprep.subr.bf16.mxu0 %v3782_v54  ;;  %4620 = vmatprep.subr.bf16.mxu1 %v3784_v20  ;;  %v3832_v54 = vld [vmem:[#allocation2 + $0x398] sm:$0xff]  ;;  %v3829_v20 = vld [vmem:[#allocation2 + $0x380] sm:$0xff] }
 0xcd7   :  { %4284 = vmatmul.mubr.bf16.vlgmr.msra.gmra.mrb[32].mxu0 %v8280_v28  ;;  %4612 = vmatmul.mubr.bf16.vlgmr.msra.gmra.mrb[52].mxu1 %v8280_v28  ;;  %v3796_v28 = vld [vmem:[#allocation2 + $0x278] sm:$0xff] }
 0xcd8   :  { %4293 = vmatpush1.bf16.msra.mxu0 %v3781_v42  ;;  %4621 = vmatpush1.bf16.msra.mxu1 %v3783_v14  ;;  %v3831_v42 = vld [vmem:[#allocation2 + $0x390] sm:$0xff]  ;;  %v3834_v14 = vld [vmem:[#allocation2 + $0x3a8] sm:$0xff] }
 0xcd9   :  { %4294 = vmatprep.subr.bf16.mxu0 %v3786_v4  ;;  %4622 = vmatprep.subr.bf16.mxu1 %v3788_v8  ;;  %v3836_v4 = vld [vmem:[#allocation2 + $0x3b8] sm:$0xff]  ;;  %v3833_v8 = vld [vmem:[#allocation2 + $0x3a0] sm:$0xff] }
 0xcda   :  { %4324 = vmatprep.mubr.bf16.mxu0 %v8284_v22  ;;  %4652 = vmatprep.mubr.bf16.mxu1 %v8284_v22  ;;  %v3797_v22 = vld [vmem:[#allocation2 + $0x280] sm:$0xff] }
 0xcdc   :  { %4295 = vmatpush1.bf16.msra.mxu0 %v3785_v24  ;;  %4623 = vmatpush1.bf16.msra.mxu1 %v3787_v43  ;;  %v3835_v24 = vld [vmem:[#allocation2 + $0x3b0] sm:$0xff]  ;;  %v3838_v43 = vld [vmem:[#allocation2 + $0x3c8] sm:$0xff] }
 0xcdd   :  { %4296 = vmatprep.subr.bf16.mxu0 %v3790_v27  ;;  %4624 = vmatprep.subr.bf16.mxu1 %v3792_v7  ;;  %v3840_v27 = vld [vmem:[#allocation2 + $0x3d8] sm:$0xff]  ;;  %v3837_v7 = vld [vmem:[#allocation2 + $0x3c0] sm:$0xff] }
 0xce0   :  { %4297 = vmatpush1.bf16.msra.mxu0 %v3789_v62  ;;  %4625 = vmatpush1.bf16.msra.mxu1 %v3791_v35  ;;  %v3839_v62 = vld [vmem:[#allocation2 + $0x3d0] sm:$0xff]  ;;  %v3842_v35 = vld [vmem:[#allocation2 + $0x3e8] sm:$0xff] }
 0xce1   :  { %4298 = vmatprep.subr.bf16.mxu0 %v3794_v0  ;;  %4626 = vmatprep.subr.bf16.mxu1 %v3796_v28  ;;  %v3844_v0 = vld [vmem:[#allocation2 + $0x3f8] sm:$0xff]  ;;  %v3841_v28 = vld [vmem:[#allocation2 + $0x3e0] sm:$0xff] }
 0xce4   :  { %4299 = vmatpush1.bf16.msra.mxu0 %v3793_v36  ;;  %4627 = vmatpush1.bf16.msra.mxu1 %v3795_v30  ;;  %v3843_v36 = vld [vmem:[#allocation2 + $0x3f0] sm:$0xff]  ;;  %v3846_v30 = vld [vmem:[#allocation2 + $0x408] sm:$0xff] }
 0xce5   :  { %4300 = vmatprep.subr.bf16.mxu0 %v3798_v55  ;;  %4628 = vmatprep.subr.bf16.mxu1 %v3800_v6  ;;  %v3848_v55 = vld [vmem:[#allocation2 + $0x418] sm:$0xff]  ;;  %v3845_v6 = vld [vmem:[#allocation2 + $0x400] sm:$0xff] }
 0xce8   :  { %4301 = vmatpush1.bf16.msra.mxu0 %v3797_v22  ;;  %4629 = vmatpush1.bf16.msra.mxu1 %v3799_v38  ;;  %v3847_v22 = vld [vmem:[#allocation2 + $0x410] sm:$0xff]  ;;  %v3850_v38 = vld [vmem:[#allocation2 + $0x428] sm:$0xff] }
 0xce9   :  { %4302 = vmatprep.subr.bf16.mxu0 %v3802_v52  ;;  %4630 = vmatprep.subr.bf16.mxu1 %v3804_v25  ;;  %v3852_v52 = vld [vmem:[#allocation2 + $0x438] sm:$0xff]  ;;  %v3849_v25 = vld [vmem:[#allocation2 + $0x420] sm:$0xff] }
 0xcec   :  { %4303 = vmatpush1.bf16.msra.mxu0 %v3801_v21  ;;  %4631 = vmatpush1.bf16.msra.mxu1 %v3803_v48  ;;  %v3851_v21 = vld [vmem:[#allocation2 + $0x430] sm:$0xff]  ;;  %v3854_v48 = vld [vmem:[#allocation2 + $0x448] sm:$0xff] }
 0xced   :  { %4304 = vmatprep.subr.bf16.mxu0 %v3806_v29  ;;  %4632 = vmatprep.subr.bf16.mxu1 %v3808_v58  ;;  %v3856_v29 = vld [vmem:[#allocation2 + $0x458] sm:$0xff]  ;;  %v3853_v58 = vld [vmem:[#allocation2 + $0x440] sm:$0xff] }
 0xcf0   :  { %4305 = vmatpush1.bf16.msra.mxu0 %v3805_v46  ;;  %4633 = vmatpush1.bf16.msra.mxu1 %v3807_v39  ;;  %v3855_v46 = vld [vmem:[#allocation2 + $0x450] sm:$0xff]  ;;  %v3858_v39 = vld [vmem:[#allocation2 + $0x468] sm:$0xff] }
 0xcf1   :  { %4306 = vmatprep.subr.bf16.mxu0 %v3810_v41  ;;  %4634 = vmatprep.subr.bf16.mxu1 %v3812_v18  ;;  %v3857_v41 = vld [vmem:[#allocation2 + $0x460] sm:$0xff]  ;;  %v3859_v18 = vld [vmem:[#allocation2 + $0x470] sm:$0xff] }
 0xcf4   :  { %4307 = vmatpush1.bf16.msra.mxu0 %v3809_v31  ;;  %4635 = vmatpush1.bf16.msra.mxu1 %v3811_v51  ;;  %v3862_v31 = vld [vmem:[#allocation2 + $0x488] sm:$0xff]  ;;  %v3864_v51 = vld [vmem:[#allocation2 + $0x498] sm:$0xff] }
 0xcf5   :  { %4308 = vmatprep.subr.bf16.mxu0 %v3814_v60  ;;  %4636 = vmatprep.subr.bf16.mxu1 %v3816_v53  ;;  %v3863_v60 = vld [vmem:[#allocation2 + $0x490] sm:$0xff]  ;;  %v3866_v53 = vld [vmem:[#allocation2 + $0x4a8] sm:$0xff] }
 0xcf8   :  { %4309 = vmatpush1.bf16.msra.mxu0 %v3813_v61  ;;  %4637 = vmatpush1.bf16.msra.mxu1 %v3815_v63  ;;  %v3868_v61 = vld [vmem:[#allocation2 + $0x4b8] sm:$0xff]  ;;  %v3865_v63 = vld [vmem:[#allocation2 + $0x4a0] sm:$0xff] }
 0xcf9   :  { %4310 = vmatprep.subr.bf16.mxu0 %v3818_v2  ;;  %4638 = vmatprep.subr.bf16.mxu1 %v3820_v3  ;;  %v3867_v2 = vld [vmem:[#allocation2 + $0x4b0] sm:$0xff]  ;;  %v3870_v3 = vld [vmem:[#allocation2 + $0x4c8] sm:$0xff] }
 0xcfc   :  { %4311 = vmatpush1.bf16.msra.mxu0 %v3817_v5  ;;  %4639 = vmatpush1.bf16.msra.mxu1 %v3819_v26  ;;  %v3872_v5 = vld [vmem:[#allocation2 + $0x4d8] sm:$0xff]  ;;  %v3869_v26 = vld [vmem:[#allocation2 + $0x4c0] sm:$0xff] }
 0xcfd   :  { %4312 = vmatprep.subr.bf16.mxu0 %v3822_v10  ;;  %4640 = vmatprep.subr.bf16.mxu1 %v3824_v16  ;;  %v3871_v10 = vld [vmem:[#allocation2 + $0x4d0] sm:$0xff]  ;;  %v3874_v16 = vld [vmem:[#allocation2 + $0x4e8] sm:$0xff] }
 0xd00   :  { %4313 = vmatpush1.bf16.msra.mxu0 %v3821_v40  ;;  %4641 = vmatpush1.bf16.msra.mxu1 %v3823_v9  ;;  %v3876_v40 = vld [vmem:[#allocation2 + $0x4f8] sm:$0xff]  ;;  %v3873_v9 = vld [vmem:[#allocation2 + $0x4e0] sm:$0xff] }
 0xd01   :  { %4314 = vmatprep.subr.bf16.mxu0 %v3826_v34  ;;  %4642 = vmatprep.subr.bf16.mxu1 %v3828_v33  ;;  %v3875_v34 = vld [vmem:[#allocation2 + $0x4f0] sm:$0xff]  ;;  %v3878_v33 = vld [vmem:[#allocation2 + $0x508] sm:$0xff] }
 0xd04   :  { %4315 = vmatpush1.bf16.msra.mxu0 %v3825_v17  ;;  %4643 = vmatpush1.bf16.msra.mxu1 %v3827_v23  ;;  %v3880_v17 = vld [vmem:[#allocation2 + $0x518] sm:$0xff]  ;;  %v3877_v23 = vld [vmem:[#allocation2 + $0x500] sm:$0xff] }
 0xd05   :  { %4316 = vmatprep.subr.bf16.mxu0 %v3830_v1  ;;  %4644 = vmatprep.subr.bf16.mxu1 %v3832_v54  ;;  %v3879_v1 = vld [vmem:[#allocation2 + $0x510] sm:$0xff]  ;;  %v3882_v54 = vld [vmem:[#allocation2 + $0x528] sm:$0xff] }
 0xd08   :  { %4317 = vmatpush1.bf16.msra.mxu0 %v3829_v20  ;;  %4645 = vmatpush1.bf16.msra.mxu1 %v3831_v42  ;;  %v3884_v20 = vld [vmem:[#allocation2 + $0x538] sm:$0xff]  ;;  %v3881_v42 = vld [vmem:[#allocation2 + $0x520] sm:$0xff] }
 0xd09   :  { %4318 = vmatprep.subr.bf16.mxu0 %v3834_v14  ;;  %4646 = vmatprep.subr.bf16.mxu1 %v3836_v4  ;;  %v3883_v14 = vld [vmem:[#allocation2 + $0x530] sm:$0xff]  ;;  %v3886_v4 = vld [vmem:[#allocation2 + $0x548] sm:$0xff] }
 0xd0c   :  { %4319 = vmatpush1.bf16.msra.mxu0 %v3833_v8  ;;  %4647 = vmatpush1.bf16.msra.mxu1 %v3835_v24  ;;  %v3888_v8 = vld [vmem:[#allocation2 + $0x558] sm:$0xff]  ;;  %v3885_v24 = vld [vmem:[#allocation2 + $0x540] sm:$0xff] }
 0xd0d   :  { %4320 = vmatprep.subr.bf16.mxu0 %v3838_v43  ;;  %4648 = vmatprep.subr.bf16.mxu1 %v3840_v27  ;;  %v3887_v43 = vld [vmem:[#allocation2 + $0x550] sm:$0xff]  ;;  %v3890_v27 = vld [vmem:[#allocation2 + $0x568] sm:$0xff] }
 0xd10   :  { %4321 = vmatpush1.bf16.msra.mxu0 %v3837_v7  ;;  %4649 = vmatpush1.bf16.msra.mxu1 %v3839_v62  ;;  %v3892_v7 = vld [vmem:[#allocation2 + $0x578] sm:$0xff]  ;;  %v3889_v62 = vld [vmem:[#allocation2 + $0x560] sm:$0xff] }
 0xd11   :  { %4322 = vmatprep.subr.bf16.mxu0 %v3842_v35  ;;  %4650 = vmatprep.subr.bf16.mxu1 %v3844_v0  ;;  %v3891_v35 = vld [vmem:[#allocation2 + $0x570] sm:$0xff]  ;;  %v3894_v0 = vld [vmem:[#allocation2 + $0x588] sm:$0xff] }
 0xd14   :  { %4323 = vmatpush1.bf16.msra.mxu0 %v3841_v28  ;;  %4651 = vmatpush1.bf16.msra.mxu1 %v3843_v36  ;;  %v3896_v28 = vld [vmem:[#allocation2 + $0x598] sm:$0xff]  ;;  %v3893_v36 = vld [vmem:[#allocation2 + $0x580] sm:$0xff] }
 0xd15   :  { %4333 = vmatprep.subr.bf16.mxu0 %v3846_v30  ;;  %4661 = vmatprep.subr.bf16.mxu1 %v3848_v55  ;;  %v3895_v30 = vld [vmem:[#allocation2 + $0x590] sm:$0xff]  ;;  %v3898_v55 = vld [vmem:[#allocation2 + $0x5a8] sm:$0xff] }
 0xd17   :  { %4325 = vmatmul.mubr.bf16.vlgmr.msra.gmra.mrb[32].mxu0 %v8282_v12  ;;  %4653 = vmatmul.mubr.bf16.vlgmr.msra.gmra.mrb[52].mxu1 %v8282_v12  ;;  %v3860_v12 = vld [vmem:[#allocation2 + $0x478] sm:$0xff] }
 0xd18   :  { %4334 = vmatpush1.bf16.msra.mxu0 %v3845_v6  ;;  %4662 = vmatpush1.bf16.msra.mxu1 %v3847_v22  ;;  %v3900_v6 = vld [vmem:[#allocation2 + $0x5b8] sm:$0xff]  ;;  %v3897_v22 = vld [vmem:[#allocation2 + $0x5a0] sm:$0xff] }
 0xd19   :  { %4335 = vmatprep.subr.bf16.mxu0 %v3850_v38  ;;  %4663 = vmatprep.subr.bf16.mxu1 %v3852_v52  ;;  %v3899_v38 = vld [vmem:[#allocation2 + $0x5b0] sm:$0xff]  ;;  %v3902_v52 = vld [vmem:[#allocation2 + $0x5c8] sm:$0xff] }
 0xd1a   :  { %4365 = vmatprep.mubr.bf16.mxu0 %v8288_v15  ;;  %4693 = vmatprep.mubr.bf16.mxu1 %v8288_v15  ;;  %v3861_v15 = vld [vmem:[#allocation2 + $0x480] sm:$0xff] }
 0xd1c   :  { %4336 = vmatpush1.bf16.msra.mxu0 %v3849_v25  ;;  %4664 = vmatpush1.bf16.msra.mxu1 %v3851_v21  ;;  %v3904_v25 = vld [vmem:[#allocation2 + $0x5d8] sm:$0xff]  ;;  %v3901_v21 = vld [vmem:[#allocation2 + $0x5c0] sm:$0xff] }
 0xd1d   :  { %4337 = vmatprep.subr.bf16.mxu0 %v3854_v48  ;;  %4665 = vmatprep.subr.bf16.mxu1 %v3856_v29  ;;  %v3903_v48 = vld [vmem:[#allocation2 + $0x5d0] sm:$0xff]  ;;  %v3906_v29 = vld [vmem:[#allocation2 + $0x5e8] sm:$0xff] }
 0xd20   :  { %4338 = vmatpush1.bf16.msra.mxu0 %v3853_v58  ;;  %4666 = vmatpush1.bf16.msra.mxu1 %v3855_v46  ;;  %v3908_v58 = vld [vmem:[#allocation2 + $0x5f8] sm:$0xff]  ;;  %v3905_v46 = vld [vmem:[#allocation2 + $0x5e0] sm:$0xff] }
 0xd21   :  { %4339 = vmatprep.subr.bf16.mxu0 %v3858_v39  ;;  %4667 = vmatprep.subr.bf16.mxu1 %v3860_v12  ;;  %v3907_v39 = vld [vmem:[#allocation2 + $0x5f0] sm:$0xff]  ;;  %v3910_v12 = vld [vmem:[#allocation2 + $0x608] sm:$0xff] }
 0xd24   :  { %4340 = vmatpush1.bf16.msra.mxu0 %v3857_v41  ;;  %4668 = vmatpush1.bf16.msra.mxu1 %v3859_v18  ;;  %v3912_v41 = vld [vmem:[#allocation2 + $0x618] sm:$0xff]  ;;  %v3909_v18 = vld [vmem:[#allocation2 + $0x600] sm:$0xff] }
 0xd25   :  { %4341 = vmatprep.subr.bf16.mxu0 %v3862_v31  ;;  %4669 = vmatprep.subr.bf16.mxu1 %v3864_v51  ;;  %v3911_v31 = vld [vmem:[#allocation2 + $0x610] sm:$0xff]  ;;  %v3914_v51 = vld [vmem:[#allocation2 + $0x628] sm:$0xff] }
 0xd28   :  { %4342 = vmatpush1.bf16.msra.mxu0 %v3861_v15  ;;  %4670 = vmatpush1.bf16.msra.mxu1 %v3863_v60  ;;  %v3916_v15 = vld [vmem:[#allocation2 + $0x638] sm:$0xff]  ;;  %v3913_v60 = vld [vmem:[#allocation2 + $0x620] sm:$0xff] }
 0xd29   :  { %4343 = vmatprep.subr.bf16.mxu0 %v3866_v53  ;;  %4671 = vmatprep.subr.bf16.mxu1 %v3868_v61  ;;  %v3915_v53 = vld [vmem:[#allocation2 + $0x630] sm:$0xff]  ;;  %v3918_v61 = vld [vmem:[#allocation2 + $0x648] sm:$0xff] }
 0xd2c   :  { %4344 = vmatpush1.bf16.msra.mxu0 %v3865_v63  ;;  %4672 = vmatpush1.bf16.msra.mxu1 %v3867_v2  ;;  %v3920_v63 = vld [vmem:[#allocation2 + $0x658] sm:$0xff]  ;;  %v3917_v2 = vld [vmem:[#allocation2 + $0x640] sm:$0xff] }
 0xd2d   :  { %4345 = vmatprep.subr.bf16.mxu0 %v3870_v3  ;;  %4673 = vmatprep.subr.bf16.mxu1 %v3872_v5  ;;  %v3919_v3 = vld [vmem:[#allocation2 + $0x650] sm:$0xff]  ;;  %v3922_v5 = vld [vmem:[#allocation2 + $0x668] sm:$0xff] }
 0xd30   :  { %4346 = vmatpush1.bf16.msra.mxu0 %v3869_v26  ;;  %4674 = vmatpush1.bf16.msra.mxu1 %v3871_v10  ;;  %v3921_v26 = vld [vmem:[#allocation2 + $0x660] sm:$0xff]  ;;  %v3923_v10 = vld [vmem:[#allocation2 + $0x670] sm:$0xff] }
 0xd31   :  { %4347 = vmatprep.subr.bf16.mxu0 %v3874_v16  ;;  %4675 = vmatprep.subr.bf16.mxu1 %v3876_v40  ;;  %v3926_v16 = vld [vmem:[#allocation2 + $0x688] sm:$0xff]  ;;  %v3928_v40 = vld [vmem:[#allocation2 + $0x698] sm:$0xff] }
 0xd34   :  { %4348 = vmatpush1.bf16.msra.mxu0 %v3873_v9  ;;  %4676 = vmatpush1.bf16.msra.mxu1 %v3875_v34  ;;  %v3927_v9 = vld [vmem:[#allocation2 + $0x690] sm:$0xff]  ;;  %v3930_v34 = vld [vmem:[#allocation2 + $0x6a8] sm:$0xff] }
 0xd35   :  { %4349 = vmatprep.subr.bf16.mxu0 %v3878_v33  ;;  %4677 = vmatprep.subr.bf16.mxu1 %v3880_v17  ;;  %v3932_v33 = vld [vmem:[#allocation2 + $0x6b8] sm:$0xff]  ;;  %v3929_v17 = vld [vmem:[#allocation2 + $0x6a0] sm:$0xff] }
 0xd38   :  { %4350 = vmatpush1.bf16.msra.mxu0 %v3877_v23  ;;  %4678 = vmatpush1.bf16.msra.mxu1 %v3879_v1  ;;  %v3931_v23 = vld [vmem:[#allocation2 + $0x6b0] sm:$0xff]  ;;  %v3934_v1 = vld [vmem:[#allocation2 + $0x6c8] sm:$0xff] }
 0xd39   :  { %4351 = vmatprep.subr.bf16.mxu0 %v3882_v54  ;;  %4679 = vmatprep.subr.bf16.mxu1 %v3884_v20  ;;  %v3936_v54 = vld [vmem:[#allocation2 + $0x6d8] sm:$0xff]  ;;  %v3933_v20 = vld [vmem:[#allocation2 + $0x6c0] sm:$0xff] }
 0xd3c   :  { %4352 = vmatpush1.bf16.msra.mxu0 %v3881_v42  ;;  %4680 = vmatpush1.bf16.msra.mxu1 %v3883_v14  ;;  %v3935_v42 = vld [vmem:[#allocation2 + $0x6d0] sm:$0xff]  ;;  %v3938_v14 = vld [vmem:[#allocation2 + $0x6e8] sm:$0xff] }
 0xd3d   :  { %4353 = vmatprep.subr.bf16.mxu0 %v3886_v4  ;;  %4681 = vmatprep.subr.bf16.mxu1 %v3888_v8  ;;  %v3940_v4 = vld [vmem:[#allocation2 + $0x6f8] sm:$0xff]  ;;  %v3937_v8 = vld [vmem:[#allocation2 + $0x6e0] sm:$0xff] }
 0xd40   :  { %4354 = vmatpush1.bf16.msra.mxu0 %v3885_v24  ;;  %4682 = vmatpush1.bf16.msra.mxu1 %v3887_v43  ;;  %v3939_v24 = vld [vmem:[#allocation2 + $0x6f0] sm:$0xff]  ;;  %v3942_v43 = vld [vmem:[#allocation2 + $0x708] sm:$0xff] }
 0xd41   :  { %4355 = vmatprep.subr.bf16.mxu0 %v3890_v27  ;;  %4683 = vmatprep.subr.bf16.mxu1 %v3892_v7  ;;  %v3944_v27 = vld [vmem:[#allocation2 + $0x718] sm:$0xff]  ;;  %v3941_v7 = vld [vmem:[#allocation2 + $0x700] sm:$0xff] }
 0xd44   :  { %4356 = vmatpush1.bf16.msra.mxu0 %v3889_v62  ;;  %4684 = vmatpush1.bf16.msra.mxu1 %v3891_v35  ;;  %v3943_v62 = vld [vmem:[#allocation2 + $0x710] sm:$0xff]  ;;  %v3946_v35 = vld [vmem:[#allocation2 + $0x728] sm:$0xff] }
 0xd45   :  { %4357 = vmatprep.subr.bf16.mxu0 %v3894_v0  ;;  %4685 = vmatprep.subr.bf16.mxu1 %v3896_v28  ;;  %v3948_v0 = vld [vmem:[#allocation2 + $0x738] sm:$0xff]  ;;  %v3945_v28 = vld [vmem:[#allocation2 + $0x720] sm:$0xff] }
 0xd48   :  { %4358 = vmatpush1.bf16.msra.mxu0 %v3893_v36  ;;  %4686 = vmatpush1.bf16.msra.mxu1 %v3895_v30  ;;  %v3947_v36 = vld [vmem:[#allocation2 + $0x730] sm:$0xff]  ;;  %v3950_v30 = vld [vmem:[#allocation2 + $0x748] sm:$0xff] }
 0xd49   :  { %4359 = vmatprep.subr.bf16.mxu0 %v3898_v55  ;;  %4687 = vmatprep.subr.bf16.mxu1 %v3900_v6  ;;  %v3952_v55 = vld [vmem:[#allocation2 + $0x758] sm:$0xff]  ;;  %v3949_v6 = vld [vmem:[#allocation2 + $0x740] sm:$0xff] }
 0xd4c   :  { %4360 = vmatpush1.bf16.msra.mxu0 %v3897_v22  ;;  %4688 = vmatpush1.bf16.msra.mxu1 %v3899_v38  ;;  %v3951_v22 = vld [vmem:[#allocation2 + $0x750] sm:$0xff]  ;;  %v3954_v38 = vld [vmem:[#allocation2 + $0x768] sm:$0xff] }
 0xd4d   :  { %4361 = vmatprep.subr.bf16.mxu0 %v3902_v52  ;;  %4689 = vmatprep.subr.bf16.mxu1 %v3904_v25  ;;  %v3956_v52 = vld [vmem:[#allocation2 + $0x778] sm:$0xff]  ;;  %v3953_v25 = vld [vmem:[#allocation2 + $0x760] sm:$0xff] }
 0xd50   :  { %4362 = vmatpush1.bf16.msra.mxu0 %v3901_v21  ;;  %4690 = vmatpush1.bf16.msra.mxu1 %v3903_v48  ;;  %v3955_v21 = vld [vmem:[#allocation2 + $0x770] sm:$0xff]  ;;  %v3958_v48 = vld [vmem:[#allocation2 + $0x788] sm:$0xff] }
 0xd51   :  { %4363 = vmatprep.subr.bf16.mxu0 %v3906_v29  ;;  %4691 = vmatprep.subr.bf16.mxu1 %v3908_v58  ;;  %v3960_v29 = vld [vmem:[#allocation2 + $0x798] sm:$0xff]  ;;  %v3957_v58 = vld [vmem:[#allocation2 + $0x780] sm:$0xff] }
 0xd54   :  { %4364 = vmatpush1.bf16.msra.mxu0 %v3905_v46  ;;  %4692 = vmatpush1.bf16.msra.mxu1 %v3907_v39  ;;  %v3959_v46 = vld [vmem:[#allocation2 + $0x790] sm:$0xff]  ;;  %v3962_v39 = vld [vmem:[#allocation2 + $0x7a8] sm:$0xff] }
 0xd55   :  { %4374 = vmatprep.subr.bf16.mxu0 %v3910_v12  ;;  %4702 = vmatprep.subr.bf16.mxu1 %v3912_v41  ;;  %v3964_v12 = vld [vmem:[#allocation2 + $0x7b8] sm:$0xff]  ;;  %v3961_v41 = vld [vmem:[#allocation2 + $0x7a0] sm:$0xff] }
 0xd57   :  { %4366 = vmatmul.mubr.bf16.vlgmr.msra.gmra.mrb[32].mxu0 %v8286_v11  ;;  %4694 = vmatmul.mubr.bf16.vlgmr.msra.gmra.mrb[52].mxu1 %v8286_v11  ;;  %v3924_v11 = vld [vmem:[#allocation2 + $0x678] sm:$0xff] }
 0xd58   :  { %4375 = vmatpush1.bf16.msra.mxu0 %v3909_v18  ;;  %4703 = vmatpush1.bf16.msra.mxu1 %v3911_v31  ;;  %v3963_v18 = vld [vmem:[#allocation2 + $0x7b0] sm:$0xff]  ;;  %v3966_v31 = vld [vmem:[#allocation2 + $0x7c8] sm:$0xff] }
 0xd59   :  { %4376 = vmatprep.subr.bf16.mxu0 %v3914_v51  ;;  %4704 = vmatprep.subr.bf16.mxu1 %v3916_v15  ;;  %v3968_v51 = vld [vmem:[#allocation2 + $0x7d8] sm:$0xff]  ;;  %v3965_v15 = vld [vmem:[#allocation2 + $0x7c0] sm:$0xff] }
 0xd5a   :  { %4406 = vmatprep.mubr.bf16.mxu0 %v8292_v56  ;;  %4734 = vmatprep.mubr.bf16.mxu1 %v8292_v56  ;;  %v3925_v56 = vld [vmem:[#allocation2 + $0x680] sm:$0xff] }
 0xd5c   :  { %4377 = vmatpush1.bf16.msra.mxu0 %v3913_v60  ;;  %4705 = vmatpush1.bf16.msra.mxu1 %v3915_v53  ;;  %v3967_v60 = vld [vmem:[#allocation2 + $0x7d0] sm:$0xff]  ;;  %v3970_v53 = vld [vmem:[#allocation2 + $0x7e8] sm:$0xff] }
 0xd5d   :  { %4378 = vmatprep.subr.bf16.mxu0 %v3918_v61  ;;  %4706 = vmatprep.subr.bf16.mxu1 %v3920_v63  ;;  %v3972_v61 = vld [vmem:[#allocation2 + $0x7f8] sm:$0xff]  ;;  %v3969_v63 = vld [vmem:[#allocation2 + $0x7e0] sm:$0xff] }
 0xd60   :  { %4379 = vmatpush1.bf16.msra.mxu0 %v3917_v2  ;;  %4707 = vmatpush1.bf16.msra.mxu1 %v3919_v3  ;;  %v3971_v2 = vld [vmem:[#allocation2 + $0x7f0] sm:$0xff]  ;;  %v3974_v3 = vld [vmem:[#allocation2 + $0x808] sm:$0xff] }
 0xd61   :  { %4380 = vmatprep.subr.bf16.mxu0 %v3922_v5  ;;  %4708 = vmatprep.subr.bf16.mxu1 %v3924_v11  ;;  %v3976_v5 = vld [vmem:[#allocation2 + $0x818] sm:$0xff]  ;;  %v3973_v11 = vld [vmem:[#allocation2 + $0x800] sm:$0xff] }
 0xd64   :  { %4381 = vmatpush1.bf16.msra.mxu0 %v3921_v26  ;;  %4709 = vmatpush1.bf16.msra.mxu1 %v3923_v10  ;;  %v3975_v26 = vld [vmem:[#allocation2 + $0x810] sm:$0xff]  ;;  %v3978_v10 = vld [vmem:[#allocation2 + $0x828] sm:$0xff] }
 0xd65   :  { %4382 = vmatprep.subr.bf16.mxu0 %v3926_v16  ;;  %4710 = vmatprep.subr.bf16.mxu1 %v3928_v40  ;;  %v3980_v16 = vld [vmem:[#allocation2 + $0x838] sm:$0xff]  ;;  %v3977_v40 = vld [vmem:[#allocation2 + $0x820] sm:$0xff] }
 0xd68   :  { %4383 = vmatpush1.bf16.msra.mxu0 %v3925_v56  ;;  %4711 = vmatpush1.bf16.msra.mxu1 %v3927_v9  ;;  %v3979_v56 = vld [vmem:[#allocation2 + $0x830] sm:$0xff]  ;;  %v3982_v9 = vld [vmem:[#allocation2 + $0x848] sm:$0xff] }
 0xd69   :  { %4384 = vmatprep.subr.bf16.mxu0 %v3930_v34  ;;  %4712 = vmatprep.subr.bf16.mxu1 %v3932_v33  ;;  %v3984_v34 = vld [vmem:[#allocation2 + $0x858] sm:$0xff]  ;;  %v3981_v33 = vld [vmem:[#allocation2 + $0x840] sm:$0xff] }
 0xd6c   :  { %4385 = vmatpush1.bf16.msra.mxu0 %v3929_v17  ;;  %4713 = vmatpush1.bf16.msra.mxu1 %v3931_v23  ;;  %v3983_v17 = vld [vmem:[#allocation2 + $0x850] sm:$0xff]  ;;  %v3986_v23 = vld [vmem:[#allocation2 + $0x868] sm:$0xff] }
 0xd6d   :  { %4386 = vmatprep.subr.bf16.mxu0 %v3934_v1  ;;  %4714 = vmatprep.subr.bf16.mxu1 %v3936_v54  ;;  %v3985_v1 = vld [vmem:[#allocation2 + $0x860] sm:$0xff]  ;;  %v3987_v54 = vld [vmem:[#allocation2 + $0x870] sm:$0xff] }
 0xd70   :  { %4387 = vmatpush1.bf16.msra.mxu0 %v3933_v20  ;;  %4715 = vmatpush1.bf16.msra.mxu1 %v3935_v42  ;;  %v3990_v20 = vld [vmem:[#allocation2 + $0x888] sm:$0xff]  ;;  %v3992_v42 = vld [vmem:[#allocation2 + $0x898] sm:$0xff] }
 0xd71   :  { %4388 = vmatprep.subr.bf16.mxu0 %v3938_v14  ;;  %4716 = vmatprep.subr.bf16.mxu1 %v3940_v4  ;;  %v3991_v14 = vld [vmem:[#allocation2 + $0x890] sm:$0xff]  ;;  %v3994_v4 = vld [vmem:[#allocation2 + $0x8a8] sm:$0xff] }
 0xd74   :  { %4389 = vmatpush1.bf16.msra.mxu0 %v3937_v8  ;;  %4717 = vmatpush1.bf16.msra.mxu1 %v3939_v24  ;;  %v3996_v8 = vld [vmem:[#allocation2 + $0x8b8] sm:$0xff]  ;;  %v3993_v24 = vld [vmem:[#allocation2 + $0x8a0] sm:$0xff] }
 0xd75   :  { %4390 = vmatprep.subr.bf16.mxu0 %v3942_v43  ;;  %4718 = vmatprep.subr.bf16.mxu1 %v3944_v27  ;;  %v3995_v43 = vld [vmem:[#allocation2 + $0x8b0] sm:$0xff]  ;;  %v3998_v27 = vld [vmem:[#allocation2 + $0x8c8] sm:$0xff] }
 0xd78   :  { %4391 = vmatpush1.bf16.msra.mxu0 %v3941_v7  ;;  %4719 = vmatpush1.bf16.msra.mxu1 %v3943_v62  ;;  %v4000_v7 = vld [vmem:[#allocation2 + $0x8d8] sm:$0xff]  ;;  %v3997_v62 = vld [vmem:[#allocation2 + $0x8c0] sm:$0xff] }
 0xd79   :  { %4392 = vmatprep.subr.bf16.mxu0 %v3946_v35  ;;  %4720 = vmatprep.subr.bf16.mxu1 %v3948_v0  ;;  %v3999_v35 = vld [vmem:[#allocation2 + $0x8d0] sm:$0xff]  ;;  %v4002_v0 = vld [vmem:[#allocation2 + $0x8e8] sm:$0xff] }
 0xd7c   :  { %4393 = vmatpush1.bf16.msra.mxu0 %v3945_v28  ;;  %4721 = vmatpush1.bf16.msra.mxu1 %v3947_v36  ;;  %v4004_v28 = vld [vmem:[#allocation2 + $0x8f8] sm:$0xff]  ;;  %v4001_v36 = vld [vmem:[#allocation2 + $0x8e0] sm:$0xff] }
 0xd7d   :  { %4394 = vmatprep.subr.bf16.mxu0 %v3950_v30  ;;  %4722 = vmatprep.subr.bf16.mxu1 %v3952_v55  ;;  %v4003_v30 = vld [vmem:[#allocation2 + $0x8f0] sm:$0xff]  ;;  %v4006_v55 = vld [vmem:[#allocation2 + $0x908] sm:$0xff] }
 0xd80   :  { %4395 = vmatpush1.bf16.msra.mxu0 %v3949_v6  ;;  %4723 = vmatpush1.bf16.msra.mxu1 %v3951_v22  ;;  %v4008_v6 = vld [vmem:[#allocation2 + $0x918] sm:$0xff]  ;;  %v4005_v22 = vld [vmem:[#allocation2 + $0x900] sm:$0xff] }
 0xd81   :  { %4396 = vmatprep.subr.bf16.mxu0 %v3954_v38  ;;  %4724 = vmatprep.subr.bf16.mxu1 %v3956_v52  ;;  %v4007_v38 = vld [vmem:[#allocation2 + $0x910] sm:$0xff]  ;;  %v4010_v52 = vld [vmem:[#allocation2 + $0x928] sm:$0xff] }
 0xd84   :  { %4397 = vmatpush1.bf16.msra.mxu0 %v3953_v25  ;;  %4725 = vmatpush1.bf16.msra.mxu1 %v3955_v21  ;;  %v4012_v25 = vld [vmem:[#allocation2 + $0x938] sm:$0xff]  ;;  %v4009_v21 = vld [vmem:[#allocation2 + $0x920] sm:$0xff] }
 0xd85   :  { %4398 = vmatprep.subr.bf16.mxu0 %v3958_v48  ;;  %4726 = vmatprep.subr.bf16.mxu1 %v3960_v29  ;;  %v4011_v48 = vld [vmem:[#allocation2 + $0x930] sm:$0xff]  ;;  %v4014_v29 = vld [vmem:[#allocation2 + $0x948] sm:$0xff] }
 0xd88   :  { %4399 = vmatpush1.bf16.msra.mxu0 %v3957_v58  ;;  %4727 = vmatpush1.bf16.msra.mxu1 %v3959_v46  ;;  %v4016_v58 = vld [vmem:[#allocation2 + $0x958] sm:$0xff]  ;;  %v4013_v46 = vld [vmem:[#allocation2 + $0x940] sm:$0xff] }
 0xd89   :  { %4400 = vmatprep.subr.bf16.mxu0 %v3962_v39  ;;  %4728 = vmatprep.subr.bf16.mxu1 %v3964_v12  ;;  %v4015_v39 = vld [vmem:[#allocation2 + $0x950] sm:$0xff]  ;;  %v4018_v12 = vld [vmem:[#allocation2 + $0x968] sm:$0xff] }
 0xd8c   :  { %4401 = vmatpush1.bf16.msra.mxu0 %v3961_v41  ;;  %4729 = vmatpush1.bf16.msra.mxu1 %v3963_v18  ;;  %v4020_v41 = vld [vmem:[#allocation2 + $0x978] sm:$0xff]  ;;  %v4017_v18 = vld [vmem:[#allocation2 + $0x960] sm:$0xff] }
 0xd8d   :  { %4402 = vmatprep.subr.bf16.mxu0 %v3966_v31  ;;  %4730 = vmatprep.subr.bf16.mxu1 %v3968_v51  ;;  %v4019_v31 = vld [vmem:[#allocation2 + $0x970] sm:$0xff]  ;;  %v4022_v51 = vld [vmem:[#allocation2 + $0x988] sm:$0xff] }
 0xd90   :  { %4403 = vmatpush1.bf16.msra.mxu0 %v3965_v15  ;;  %4731 = vmatpush1.bf16.msra.mxu1 %v3967_v60  ;;  %v4024_v15 = vld [vmem:[#allocation2 + $0x998] sm:$0xff]  ;;  %v4021_v60 = vld [vmem:[#allocation2 + $0x980] sm:$0xff] }
 0xd91   :  { %4404 = vmatprep.subr.bf16.mxu0 %v3970_v53  ;;  %4732 = vmatprep.subr.bf16.mxu1 %v3972_v61  ;;  %v4023_v53 = vld [vmem:[#allocation2 + $0x990] sm:$0xff]  ;;  %v4026_v61 = vld [vmem:[#allocation2 + $0x9a8] sm:$0xff] }
 0xd94   :  { %4405 = vmatpush1.bf16.msra.mxu0 %v3969_v63  ;;  %4733 = vmatpush1.bf16.msra.mxu1 %v3971_v2  ;;  %v4028_v63 = vld [vmem:[#allocation2 + $0x9b8] sm:$0xff]  ;;  %v4025_v2 = vld [vmem:[#allocation2 + $0x9a0] sm:$0xff] }
 0xd95   :  { %4415 = vmatprep.subr.bf16.mxu0 %v3974_v3  ;;  %4743 = vmatprep.subr.bf16.mxu1 %v3976_v5  ;;  %v4027_v3 = vld [vmem:[#allocation2 + $0x9b0] sm:$0xff]  ;;  %v4030_v5 = vld [vmem:[#allocation2 + $0x9c8] sm:$0xff] }
 0xd97   :  { %4407 = vmatmul.mubr.bf16.vlgmr.msra.gmra.mrb[32].mxu0 %v8290_v47  ;;  %4735 = vmatmul.mubr.bf16.vlgmr.msra.gmra.mrb[52].mxu1 %v8290_v47  ;;  %v3988_v47 = vld [vmem:[#allocation2 + $0x878] sm:$0xff] }
 0xd98   :  { %4416 = vmatpush1.bf16.msra.mxu0 %v3973_v11  ;;  %4744 = vmatpush1.bf16.msra.mxu1 %v3975_v26  ;;  %v4032_v11 = vld [vmem:[#allocation2 + $0x9d8] sm:$0xff]  ;;  %v4029_v26 = vld [vmem:[#allocation2 + $0x9c0] sm:$0xff] }
 0xd99   :  { %4417 = vmatprep.subr.bf16.mxu0 %v3978_v10  ;;  %4745 = vmatprep.subr.bf16.mxu1 %v3980_v16  ;;  %v4031_v10 = vld [vmem:[#allocation2 + $0x9d0] sm:$0xff]  ;;  %v4034_v16 = vld [vmem:[#allocation2 + $0x9e8] sm:$0xff] }
 0xd9a   :  { %4447 = vmatprep.mubr.bf16.mxu0 %v8296_v57  ;;  %4775 = vmatprep.mubr.bf16.mxu1 %v8296_v57  ;;  %v3989_v57 = vld [vmem:[#allocation2 + $0x880] sm:$0xff] }
 0xd9c   :  { %4418 = vmatpush1.bf16.msra.mxu0 %v3977_v40  ;;  %4746 = vmatpush1.bf16.msra.mxu1 %v3979_v56  ;;  %v4036_v40 = vld [vmem:[#allocation2 + $0x9f8] sm:$0xff]  ;;  %v4033_v56 = vld [vmem:[#allocation2 + $0x9e0] sm:$0xff] }
 0xd9d   :  { %4419 = vmatprep.subr.bf16.mxu0 %v3982_v9  ;;  %4747 = vmatprep.subr.bf16.mxu1 %v3984_v34  ;;  %v4035_v9 = vld [vmem:[#allocation2 + $0x9f0] sm:$0xff]  ;;  %v4038_v34 = vld [vmem:[#allocation2 + $0xa08] sm:$0xff] }
 0xda0   :  { %4420 = vmatpush1.bf16.msra.mxu0 %v3981_v33  ;;  %4748 = vmatpush1.bf16.msra.mxu1 %v3983_v17  ;;  %v4040_v33 = vld [vmem:[#allocation2 + $0xa18] sm:$0xff]  ;;  %v4037_v17 = vld [vmem:[#allocation2 + $0xa00] sm:$0xff] }
 0xda1   :  { %4421 = vmatprep.subr.bf16.mxu0 %v3986_v23  ;;  %4749 = vmatprep.subr.bf16.mxu1 %v3988_v47  ;;  %v4039_v23 = vld [vmem:[#allocation2 + $0xa10] sm:$0xff]  ;;  %v4042_v47 = vld [vmem:[#allocation2 + $0xa28] sm:$0xff] }
 0xda4   :  { %4422 = vmatpush1.bf16.msra.mxu0 %v3985_v1  ;;  %4750 = vmatpush1.bf16.msra.mxu1 %v3987_v54  ;;  %v4044_v1 = vld [vmem:[#allocation2 + $0xa38] sm:$0xff]  ;;  %v4041_v54 = vld [vmem:[#allocation2 + $0xa20] sm:$0xff] }
 0xda5   :  { %4423 = vmatprep.subr.bf16.mxu0 %v3990_v20  ;;  %4751 = vmatprep.subr.bf16.mxu1 %v3992_v42  ;;  %v4043_v20 = vld [vmem:[#allocation2 + $0xa30] sm:$0xff]  ;;  %v4046_v42 = vld [vmem:[#allocation2 + $0xa48] sm:$0xff] }
 0xda8   :  { %4424 = vmatpush1.bf16.msra.mxu0 %v3989_v57  ;;  %4752 = vmatpush1.bf16.msra.mxu1 %v3991_v14  ;;  %v4048_v57 = vld [vmem:[#allocation2 + $0xa58] sm:$0xff]  ;;  %v4045_v14 = vld [vmem:[#allocation2 + $0xa40] sm:$0xff] }
 0xda9   :  { %4425 = vmatprep.subr.bf16.mxu0 %v3994_v4  ;;  %4753 = vmatprep.subr.bf16.mxu1 %v3996_v8  ;;  %v4047_v4 = vld [vmem:[#allocation2 + $0xa50] sm:$0xff]  ;;  %v4050_v8 = vld [vmem:[#allocation2 + $0xa68] sm:$0xff] }
 0xdac   :  { %4426 = vmatpush1.bf16.msra.mxu0 %v3993_v24  ;;  %4754 = vmatpush1.bf16.msra.mxu1 %v3995_v43  ;;  %v4049_v24 = vld [vmem:[#allocation2 + $0xa60] sm:$0xff]  ;;  %v4051_v43 = vld [vmem:[#allocation2 + $0xa70] sm:$0xff] }
 0xdad   :  { %4427 = vmatprep.subr.bf16.mxu0 %v3998_v27  ;;  %4755 = vmatprep.subr.bf16.mxu1 %v4000_v7  ;;  %v4054_v27 = vld [vmem:[#allocation2 + $0xa88] sm:$0xff]  ;;  %v4056_v7 = vld [vmem:[#allocation2 + $0xa98] sm:$0xff] }
 0xdb0   :  { %4428 = vmatpush1.bf16.msra.mxu0 %v3997_v62  ;;  %4756 = vmatpush1.bf16.msra.mxu1 %v3999_v35  ;;  %v4055_v62 = vld [vmem:[#allocation2 + $0xa90] sm:$0xff]  ;;  %v4058_v35 = vld [vmem:[#allocation2 + $0xaa8] sm:$0xff] }
 0xdb1   :  { %4429 = vmatprep.subr.bf16.mxu0 %v4002_v0  ;;  %4757 = vmatprep.subr.bf16.mxu1 %v4004_v28  ;;  %v4060_v0 = vld [vmem:[#allocation2 + $0xab8] sm:$0xff]  ;;  %v4057_v28 = vld [vmem:[#allocation2 + $0xaa0] sm:$0xff] }
 0xdb4   :  { %4430 = vmatpush1.bf16.msra.mxu0 %v4001_v36  ;;  %4758 = vmatpush1.bf16.msra.mxu1 %v4003_v30  ;;  %v4059_v36 = vld [vmem:[#allocation2 + $0xab0] sm:$0xff]  ;;  %v4062_v30 = vld [vmem:[#allocation2 + $0xac8] sm:$0xff] }
 0xdb5   :  { %4431 = vmatprep.subr.bf16.mxu0 %v4006_v55  ;;  %4759 = vmatprep.subr.bf16.mxu1 %v4008_v6  ;;  %v4064_v55 = vld [vmem:[#allocation2 + $0xad8] sm:$0xff]  ;;  %v4061_v6 = vld [vmem:[#allocation2 + $0xac0] sm:$0xff] }
 0xdb8   :  { %4432 = vmatpush1.bf16.msra.mxu0 %v4005_v22  ;;  %4760 = vmatpush1.bf16.msra.mxu1 %v4007_v38  ;;  %v4063_v22 = vld [vmem:[#allocation2 + $0xad0] sm:$0xff]  ;;  %v4066_v38 = vld [vmem:[#allocation2 + $0xae8] sm:$0xff] }
 0xdb9   :  { %4433 = vmatprep.subr.bf16.mxu0 %v4010_v52  ;;  %4761 = vmatprep.subr.bf16.mxu1 %v4012_v25  ;;  %v4068_v52 = vld [vmem:[#allocation2 + $0xaf8] sm:$0xff]  ;;  %v4065_v25 = vld [vmem:[#allocation2 + $0xae0] sm:$0xff] }
 0xdbc   :  { %4434 = vmatpush1.bf16.msra.mxu0 %v4009_v21  ;;  %4762 = vmatpush1.bf16.msra.mxu1 %v4011_v48  ;;  %v4067_v21 = vld [vmem:[#allocation2 + $0xaf0] sm:$0xff]  ;;  %v4070_v48 = vld [vmem:[#allocation2 + $0xb08] sm:$0xff] }
 0xdbd   :  { %4435 = vmatprep.subr.bf16.mxu0 %v4014_v29  ;;  %4763 = vmatprep.subr.bf16.mxu1 %v4016_v58  ;;  %v4072_v29 = vld [vmem:[#allocation2 + $0xb18] sm:$0xff]  ;;  %v4069_v58 = vld [vmem:[#allocation2 + $0xb00] sm:$0xff] }
 0xdc0   :  { %4436 = vmatpush1.bf16.msra.mxu0 %v4013_v46  ;;  %4764 = vmatpush1.bf16.msra.mxu1 %v4015_v39  ;;  %v4071_v46 = vld [vmem:[#allocation2 + $0xb10] sm:$0xff]  ;;  %v4074_v39 = vld [vmem:[#allocation2 + $0xb28] sm:$0xff] }
 0xdc1   :  { %4437 = vmatprep.subr.bf16.mxu0 %v4018_v12  ;;  %4765 = vmatprep.subr.bf16.mxu1 %v4020_v41  ;;  %v4076_v12 = vld [vmem:[#allocation2 + $0xb38] sm:$0xff]  ;;  %v4073_v41 = vld [vmem:[#allocation2 + $0xb20] sm:$0xff] }
 0xdc4   :  { %4438 = vmatpush1.bf16.msra.mxu0 %v4017_v18  ;;  %4766 = vmatpush1.bf16.msra.mxu1 %v4019_v31  ;;  %v4075_v18 = vld [vmem:[#allocation2 + $0xb30] sm:$0xff]  ;;  %v4078_v31 = vld [vmem:[#allocation2 + $0xb48] sm:$0xff] }
 0xdc5   :  { %4439 = vmatprep.subr.bf16.mxu0 %v4022_v51  ;;  %4767 = vmatprep.subr.bf16.mxu1 %v4024_v15  ;;  %v4080_v51 = vld [vmem:[#allocation2 + $0xb58] sm:$0xff]  ;;  %v4077_v15 = vld [vmem:[#allocation2 + $0xb40] sm:$0xff] }
 0xdc8   :  { %4440 = vmatpush1.bf16.msra.mxu0 %v4021_v60  ;;  %4768 = vmatpush1.bf16.msra.mxu1 %v4023_v53  ;;  %v4079_v60 = vld [vmem:[#allocation2 + $0xb50] sm:$0xff]  ;;  %v4082_v53 = vld [vmem:[#allocation2 + $0xb68] sm:$0xff] }
 0xdc9   :  { %4441 = vmatprep.subr.bf16.mxu0 %v4026_v61  ;;  %4769 = vmatprep.subr.bf16.mxu1 %v4028_v63  ;;  %v4084_v61 = vld [vmem:[#allocation2 + $0xb78] sm:$0xff]  ;;  %v4081_v63 = vld [vmem:[#allocation2 + $0xb60] sm:$0xff] }
 0xdcc   :  { %4442 = vmatpush1.bf16.msra.mxu0 %v4025_v2  ;;  %4770 = vmatpush1.bf16.msra.mxu1 %v4027_v3  ;;  %v4083_v2 = vld [vmem:[#allocation2 + $0xb70] sm:$0xff]  ;;  %v4086_v3 = vld [vmem:[#allocation2 + $0xb88] sm:$0xff] }
 0xdcd   :  { %4443 = vmatprep.subr.bf16.mxu0 %v4030_v5  ;;  %4771 = vmatprep.subr.bf16.mxu1 %v4032_v11  ;;  %v4088_v5 = vld [vmem:[#allocation2 + $0xb98] sm:$0xff]  ;;  %v4085_v11 = vld [vmem:[#allocation2 + $0xb80] sm:$0xff] }
 0xdd0   :  { %4444 = vmatpush1.bf16.msra.mxu0 %v4029_v26  ;;  %4772 = vmatpush1.bf16.msra.mxu1 %v4031_v10  ;;  %v4087_v26 = vld [vmem:[#allocation2 + $0xb90] sm:$0xff]  ;;  %v4090_v10 = vld [vmem:[#allocation2 + $0xba8] sm:$0xff] }
 0xdd1   :  { %4445 = vmatprep.subr.bf16.mxu0 %v4034_v16  ;;  %4773 = vmatprep.subr.bf16.mxu1 %v4036_v40  ;;  %v4092_v16 = vld [vmem:[#allocation2 + $0xbb8] sm:$0xff]  ;;  %v4089_v40 = vld [vmem:[#allocation2 + $0xba0] sm:$0xff] }
 0xdd4   :  { %4446 = vmatpush1.bf16.msra.mxu0 %v4033_v56  ;;  %4774 = vmatpush1.bf16.msra.mxu1 %v4035_v9  ;;  %v4091_v56 = vld [vmem:[#allocation2 + $0xbb0] sm:$0xff]  ;;  %v4094_v9 = vld [vmem:[#allocation2 + $0xbc8] sm:$0xff] }
 0xdd5   :  { %4456 = vmatprep.subr.bf16.mxu0 %v4038_v34  ;;  %4784 = vmatprep.subr.bf16.mxu1 %v4040_v33  ;;  %v4096_v34 = vld [vmem:[#allocation2 + $0xbd8] sm:$0xff]  ;;  %v4093_v33 = vld [vmem:[#allocation2 + $0xbc0] sm:$0xff] }
 0xdd7   :  { %4448 = vmatmul.mubr.bf16.vlgmr.msra.gmra.mrb[32].mxu0 %v8294_v49  ;;  %4776 = vmatmul.mubr.bf16.vlgmr.msra.gmra.mrb[52].mxu1 %v8294_v49  ;;  %v4052_v49 = vld [vmem:[#allocation2 + $0xa78] sm:$0xff] }
 0xdd8   :  { %4457 = vmatpush1.bf16.msra.mxu0 %v4037_v17  ;;  %4785 = vmatpush1.bf16.msra.mxu1 %v4039_v23  ;;  %v4095_v17 = vld [vmem:[#allocation2 + $0xbd0] sm:$0xff]  ;;  %v4098_v23 = vld [vmem:[#allocation2 + $0xbe8] sm:$0xff] }
 0xdd9   :  { %4458 = vmatprep.subr.bf16.mxu0 %v4042_v47  ;;  %4786 = vmatprep.subr.bf16.mxu1 %v4044_v1  ;;  %v4100_v47 = vld [vmem:[#allocation2 + $0xbf8] sm:$0xff]  ;;  %v4097_v1 = vld [vmem:[#allocation2 + $0xbe0] sm:$0xff] }
 0xdda   :  { %4488 = vmatprep.mubr.bf16.mxu0 %v8300_v32  ;;  %4816 = vmatprep.mubr.bf16.mxu1 %v8300_v32  ;;  %v4053_v32 = vld [vmem:[#allocation2 + $0xa80] sm:$0xff] }
 0xddc   :  { %4459 = vmatpush1.bf16.msra.mxu0 %v4041_v54  ;;  %4787 = vmatpush1.bf16.msra.mxu1 %v4043_v20  ;;  %v4099_v54 = vld [vmem:[#allocation2 + $0xbf0] sm:$0xff]  ;;  %v4102_v20 = vld [vmem:[#allocation2 + $0xc08] sm:$0xff] }
 0xddd   :  { %4460 = vmatprep.subr.bf16.mxu0 %v4046_v42  ;;  %4788 = vmatprep.subr.bf16.mxu1 %v4048_v57  ;;  %v4104_v42 = vld [vmem:[#allocation2 + $0xc18] sm:$0xff]  ;;  %v4101_v57 = vld [vmem:[#allocation2 + $0xc00] sm:$0xff] }
 0xde0   :  { %4461 = vmatpush1.bf16.msra.mxu0 %v4045_v14  ;;  %4789 = vmatpush1.bf16.msra.mxu1 %v4047_v4  ;;  %v4103_v14 = vld [vmem:[#allocation2 + $0xc10] sm:$0xff]  ;;  %v4106_v4 = vld [vmem:[#allocation2 + $0xc28] sm:$0xff] }
 0xde1   :  { %4462 = vmatprep.subr.bf16.mxu0 %v4050_v8  ;;  %4790 = vmatprep.subr.bf16.mxu1 %v4052_v49  ;;  %v4108_v8 = vld [vmem:[#allocation2 + $0xc38] sm:$0xff]  ;;  %v4105_v49 = vld [vmem:[#allocation2 + $0xc20] sm:$0xff] }
 0xde4   :  { %4463 = vmatpush1.bf16.msra.mxu0 %v4049_v24  ;;  %4791 = vmatpush1.bf16.msra.mxu1 %v4051_v43  ;;  %v4107_v24 = vld [vmem:[#allocation2 + $0xc30] sm:$0xff]  ;;  %v4110_v43 = vld [vmem:[#allocation2 + $0xc48] sm:$0xff] }
 0xde5   :  { %4464 = vmatprep.subr.bf16.mxu0 %v4054_v27  ;;  %4792 = vmatprep.subr.bf16.mxu1 %v4056_v7  ;;  %v4112_v27 = vld [vmem:[#allocation2 + $0xc58] sm:$0xff]  ;;  %v4109_v7 = vld [vmem:[#allocation2 + $0xc40] sm:$0xff] }
 0xde8   :  { %4465 = vmatpush1.bf16.msra.mxu0 %v4053_v32  ;;  %4793 = vmatpush1.bf16.msra.mxu1 %v4055_v62  ;;  %v4111_v32 = vld [vmem:[#allocation2 + $0xc50] sm:$0xff]  ;;  %v4114_v62 = vld [vmem:[#allocation2 + $0xc68] sm:$0xff] }
 0xde9   :  { %4466 = vmatprep.subr.bf16.mxu0 %v4058_v35  ;;  %4794 = vmatprep.subr.bf16.mxu1 %v4060_v0  ;;  %v4113_v35 = vld [vmem:[#allocation2 + $0xc60] sm:$0xff]  ;;  %v4115_v0 = vld [vmem:[#allocation2 + $0xc70] sm:$0xff] }
 0xdec   :  { %4467 = vmatpush1.bf16.msra.mxu0 %v4057_v28  ;;  %4795 = vmatpush1.bf16.msra.mxu1 %v4059_v36  ;;  %v4118_v28 = vld [vmem:[#allocation2 + $0xc88] sm:$0xff]  ;;  %v4120_v36 = vld [vmem:[#allocation2 + $0xc98] sm:$0xff] }
 0xded   :  { %4468 = vmatprep.subr.bf16.mxu0 %v4062_v30  ;;  %4796 = vmatprep.subr.bf16.mxu1 %v4064_v55  ;;  %v4119_v30 = vld [vmem:[#allocation2 + $0xc90] sm:$0xff]  ;;  %v4122_v55 = vld [vmem:[#allocation2 + $0xca8] sm:$0xff] }
 0xdf0   :  { %4469 = vmatpush1.bf16.msra.mxu0 %v4061_v6  ;;  %4797 = vmatpush1.bf16.msra.mxu1 %v4063_v22  ;;  %v4124_v6 = vld [vmem:[#allocation2 + $0xcb8] sm:$0xff]  ;;  %v4121_v22 = vld [vmem:[#allocation2 + $0xca0] sm:$0xff] }
 0xdf1   :  { %4470 = vmatprep.subr.bf16.mxu0 %v4066_v38  ;;  %4798 = vmatprep.subr.bf16.mxu1 %v4068_v52  ;;  %v4123_v38 = vld [vmem:[#allocation2 + $0xcb0] sm:$0xff]  ;;  %v4126_v52 = vld [vmem:[#allocation2 + $0xcc8] sm:$0xff] }
 0xdf4   :  { %4471 = vmatpush1.bf16.msra.mxu0 %v4065_v25  ;;  %4799 = vmatpush1.bf16.msra.mxu1 %v4067_v21  ;;  %v4128_v25 = vld [vmem:[#allocation2 + $0xcd8] sm:$0xff]  ;;  %v4125_v21 = vld [vmem:[#allocation2 + $0xcc0] sm:$0xff] }
 0xdf5   :  { %4472 = vmatprep.subr.bf16.mxu0 %v4070_v48  ;;  %4800 = vmatprep.subr.bf16.mxu1 %v4072_v29  ;;  %v4127_v48 = vld [vmem:[#allocation2 + $0xcd0] sm:$0xff]  ;;  %v4130_v29 = vld [vmem:[#allocation2 + $0xce8] sm:$0xff] }
 0xdf8   :  { %4473 = vmatpush1.bf16.msra.mxu0 %v4069_v58  ;;  %4801 = vmatpush1.bf16.msra.mxu1 %v4071_v46  ;;  %v4132_v58 = vld [vmem:[#allocation2 + $0xcf8] sm:$0xff]  ;;  %v4129_v46 = vld [vmem:[#allocation2 + $0xce0] sm:$0xff] }
 0xdf9   :  { %4474 = vmatprep.subr.bf16.mxu0 %v4074_v39  ;;  %4802 = vmatprep.subr.bf16.mxu1 %v4076_v12  ;;  %v4131_v39 = vld [vmem:[#allocation2 + $0xcf0] sm:$0xff]  ;;  %v4134_v12 = vld [vmem:[#allocation2 + $0xd08] sm:$0xff] }
 0xdfc   :  { %4475 = vmatpush1.bf16.msra.mxu0 %v4073_v41  ;;  %4803 = vmatpush1.bf16.msra.mxu1 %v4075_v18  ;;  %v4136_v41 = vld [vmem:[#allocation2 + $0xd18] sm:$0xff]  ;;  %v4133_v18 = vld [vmem:[#allocation2 + $0xd00] sm:$0xff] }
 0xdfd   :  { %4476 = vmatprep.subr.bf16.mxu0 %v4078_v31  ;;  %4804 = vmatprep.subr.bf16.mxu1 %v4080_v51  ;;  %v4135_v31 = vld [vmem:[#allocation2 + $0xd10] sm:$0xff]  ;;  %v4138_v51 = vld [vmem:[#allocation2 + $0xd28] sm:$0xff] }
 0xe00   :  { %4477 = vmatpush1.bf16.msra.mxu0 %v4077_v15  ;;  %4805 = vmatpush1.bf16.msra.mxu1 %v4079_v60  ;;  %v4140_v15 = vld [vmem:[#allocation2 + $0xd38] sm:$0xff]  ;;  %v4137_v60 = vld [vmem:[#allocation2 + $0xd20] sm:$0xff] }
 0xe01   :  { %4478 = vmatprep.subr.bf16.mxu0 %v4082_v53  ;;  %4806 = vmatprep.subr.bf16.mxu1 %v4084_v61  ;;  %v4139_v53 = vld [vmem:[#allocation2 + $0xd30] sm:$0xff]  ;;  %v4142_v61 = vld [vmem:[#allocation2 + $0xd48] sm:$0xff] }
 0xe04   :  { %4479 = vmatpush1.bf16.msra.mxu0 %v4081_v63  ;;  %4807 = vmatpush1.bf16.msra.mxu1 %v4083_v2  ;;  %v4144_v63 = vld [vmem:[#allocation2 + $0xd58] sm:$0xff]  ;;  %v4141_v2 = vld [vmem:[#allocation2 + $0xd40] sm:$0xff] }
 0xe05   :  { %4480 = vmatprep.subr.bf16.mxu0 %v4086_v3  ;;  %4808 = vmatprep.subr.bf16.mxu1 %v4088_v5  ;;  %v4143_v3 = vld [vmem:[#allocation2 + $0xd50] sm:$0xff]  ;;  %v4146_v5 = vld [vmem:[#allocation2 + $0xd68] sm:$0xff] }
 0xe08   :  { %4481 = vmatpush1.bf16.msra.mxu0 %v4085_v11  ;;  %4809 = vmatpush1.bf16.msra.mxu1 %v4087_v26  ;;  %v4148_v11 = vld [vmem:[#allocation2 + $0xd78] sm:$0xff]  ;;  %v4145_v26 = vld [vmem:[#allocation2 + $0xd60] sm:$0xff] }
 0xe09   :  { %4482 = vmatprep.subr.bf16.mxu0 %v4090_v10  ;;  %4810 = vmatprep.subr.bf16.mxu1 %v4092_v16  ;;  %v4147_v10 = vld [vmem:[#allocation2 + $0xd70] sm:$0xff]  ;;  %v4150_v16 = vld [vmem:[#allocation2 + $0xd88] sm:$0xff] }
 0xe0c   :  { %4483 = vmatpush1.bf16.msra.mxu0 %v4089_v40  ;;  %4811 = vmatpush1.bf16.msra.mxu1 %v4091_v56  ;;  %v4152_v40 = vld [vmem:[#allocation2 + $0xd98] sm:$0xff]  ;;  %v4149_v56 = vld [vmem:[#allocation2 + $0xd80] sm:$0xff] }
 0xe0d   :  { %4484 = vmatprep.subr.bf16.mxu0 %v4094_v9  ;;  %4812 = vmatprep.subr.bf16.mxu1 %v4096_v34  ;;  %v4151_v9 = vld [vmem:[#allocation2 + $0xd90] sm:$0xff]  ;;  %v4154_v34 = vld [vmem:[#allocation2 + $0xda8] sm:$0xff] }
 0xe10   :  { %4485 = vmatpush1.bf16.msra.mxu0 %v4093_v33  ;;  %4813 = vmatpush1.bf16.msra.mxu1 %v4095_v17  ;;  %v4156_v33 = vld [vmem:[#allocation2 + $0xdb8] sm:$0xff]  ;;  %v4153_v17 = vld [vmem:[#allocation2 + $0xda0] sm:$0xff] }
 0xe11   :  { %4486 = vmatprep.subr.bf16.mxu0 %v4098_v23  ;;  %4814 = vmatprep.subr.bf16.mxu1 %v4100_v47  ;;  %v4155_v23 = vld [vmem:[#allocation2 + $0xdb0] sm:$0xff]  ;;  %v4158_v47 = vld [vmem:[#allocation2 + $0xdc8] sm:$0xff] }
 0xe14   :  { %4487 = vmatpush1.bf16.msra.mxu0 %v4097_v1  ;;  %4815 = vmatpush1.bf16.msra.mxu1 %v4099_v54  ;;  %v4160_v1 = vld [vmem:[#allocation2 + $0xdd8] sm:$0xff]  ;;  %v4157_v54 = vld [vmem:[#allocation2 + $0xdc0] sm:$0xff] }
 0xe15   :  { %4497 = vmatprep.subr.bf16.mxu0 %v4102_v20  ;;  %4825 = vmatprep.subr.bf16.mxu1 %v4104_v42  ;;  %v4159_v20 = vld [vmem:[#allocation2 + $0xdd0] sm:$0xff]  ;;  %v4162_v42 = vld [vmem:[#allocation2 + $0xde8] sm:$0xff] }
 0xe17   :  { %4489 = vmatmul.mubr.bf16.vlgmr.msra.gmra.mrb[32].mxu0 %v8298_v13  ;;  %4817 = vmatmul.mubr.bf16.vlgmr.msra.gmra.mrb[52].mxu1 %v8298_v13  ;;  %v4116_v13 = vld [vmem:[#allocation2 + $0xc78] sm:$0xff] }
 0xe18   :  { %4498 = vmatpush1.bf16.msra.mxu0 %v4101_v57  ;;  %4826 = vmatpush1.bf16.msra.mxu1 %v4103_v14  ;;  %v4164_v57 = vld [vmem:[#allocation2 + $0xdf8] sm:$0xff]  ;;  %v4161_v14 = vld [vmem:[#allocation2 + $0xde0] sm:$0xff] }
 0xe19   :  { %4499 = vmatprep.subr.bf16.mxu0 %v4106_v4  ;;  %4827 = vmatprep.subr.bf16.mxu1 %v4108_v8  ;;  %v4163_v4 = vld [vmem:[#allocation2 + $0xdf0] sm:$0xff]  ;;  %v4166_v8 = vld [vmem:[#allocation2 + $0xe08] sm:$0xff] }
 0xe1a   :  { %4529 = vmatprep.mubr.bf16.mxu0 %v8304_v59  ;;  %4857 = vmatprep.mubr.bf16.mxu1 %v8304_v59  ;;  %v4117_v59 = vld [vmem:[#allocation2 + $0xc80] sm:$0xff] }
 0xe1c   :  { %4500 = vmatpush1.bf16.msra.mxu0 %v4105_v49  ;;  %4828 = vmatpush1.bf16.msra.mxu1 %v4107_v24  ;;  %v4168_v49 = vld [vmem:[#allocation2 + $0xe18] sm:$0xff]  ;;  %v4165_v24 = vld [vmem:[#allocation2 + $0xe00] sm:$0xff] }
 0xe1d   :  { %4501 = vmatprep.subr.bf16.mxu0 %v4110_v43  ;;  %4829 = vmatprep.subr.bf16.mxu1 %v4112_v27  ;;  %v4167_v43 = vld [vmem:[#allocation2 + $0xe10] sm:$0xff]  ;;  %v4170_v27 = vld [vmem:[#allocation2 + $0xe28] sm:$0xff] }
 0xe20   :  { %4502 = vmatpush1.bf16.msra.mxu0 %v4109_v7  ;;  %4830 = vmatpush1.bf16.msra.mxu1 %v4111_v32  ;;  %v4172_v7 = vld [vmem:[#allocation2 + $0xe38] sm:$0xff]  ;;  %v4169_v32 = vld [vmem:[#allocation2 + $0xe20] sm:$0xff] }
 0xe21   :  { %4503 = vmatprep.subr.bf16.mxu0 %v4114_v62  ;;  %4831 = vmatprep.subr.bf16.mxu1 %v4116_v13  ;;  %v4171_v62 = vld [vmem:[#allocation2 + $0xe30] sm:$0xff]  ;;  %v4174_v13 = vld [vmem:[#allocation2 + $0xe48] sm:$0xff] }
 0xe24   :  { %4504 = vmatpush1.bf16.msra.mxu0 %v4113_v35  ;;  %4832 = vmatpush1.bf16.msra.mxu1 %v4115_v0  ;;  %v4176_v35 = vld [vmem:[#allocation2 + $0xe58] sm:$0xff]  ;;  %v4173_v0 = vld [vmem:[#allocation2 + $0xe40] sm:$0xff] }
 0xe25   :  { %4505 = vmatprep.subr.bf16.mxu0 %v4118_v28  ;;  %4833 = vmatprep.subr.bf16.mxu1 %v4120_v36  ;;  %v4175_v28 = vld [vmem:[#allocation2 + $0xe50] sm:$0xff]  ;;  %v4178_v36 = vld [vmem:[#allocation2 + $0xe68] sm:$0xff] }
 0xe28   :  { %4506 = vmatpush1.bf16.msra.mxu0 %v4117_v59  ;;  %4834 = vmatpush1.bf16.msra.mxu1 %v4119_v30  ;;  %v4177_v59 = vld [vmem:[#allocation2 + $0xe60] sm:$0xff]  ;;  %v4179_v30 = vld [vmem:[#allocation2 + $0xe70] sm:$0xff] }
 0xe29   :  { %4507 = vmatprep.subr.bf16.mxu0 %v4122_v55  ;;  %4835 = vmatprep.subr.bf16.mxu1 %v4124_v6  ;;  %v4182_v55 = vld [vmem:[#allocation2 + $0xe88] sm:$0xff]  ;;  %v4184_v6 = vld [vmem:[#allocation2 + $0xe98] sm:$0xff] }
 0xe2c   :  { %4508 = vmatpush1.bf16.msra.mxu0 %v4121_v22  ;;  %4836 = vmatpush1.bf16.msra.mxu1 %v4123_v38  ;;  %v4183_v22 = vld [vmem:[#allocation2 + $0xe90] sm:$0xff]  ;;  %v4186_v38 = vld [vmem:[#allocation2 + $0xea8] sm:$0xff] }
 0xe2d   :  { %4509 = vmatprep.subr.bf16.mxu0 %v4126_v52  ;;  %4837 = vmatprep.subr.bf16.mxu1 %v4128_v25  ;;  %v4188_v52 = vld [vmem:[#allocation2 + $0xeb8] sm:$0xff]  ;;  %v4185_v25 = vld [vmem:[#allocation2 + $0xea0] sm:$0xff] }
 0xe30   :  { %4510 = vmatpush1.bf16.msra.mxu0 %v4125_v21  ;;  %4838 = vmatpush1.bf16.msra.mxu1 %v4127_v48  ;;  %v4187_v21 = vld [vmem:[#allocation2 + $0xeb0] sm:$0xff]  ;;  %v4190_v48 = vld [vmem:[#allocation2 + $0xec8] sm:$0xff] }
 0xe31   :  { %4511 = vmatprep.subr.bf16.mxu0 %v4130_v29  ;;  %4839 = vmatprep.subr.bf16.mxu1 %v4132_v58  ;;  %v4192_v29 = vld [vmem:[#allocation2 + $0xed8] sm:$0xff]  ;;  %v4189_v58 = vld [vmem:[#allocation2 + $0xec0] sm:$0xff] }
 0xe34   :  { %4512 = vmatpush1.bf16.msra.mxu0 %v4129_v46  ;;  %4840 = vmatpush1.bf16.msra.mxu1 %v4131_v39  ;;  %v4191_v46 = vld [vmem:[#allocation2 + $0xed0] sm:$0xff]  ;;  %v4194_v39 = vld [vmem:[#allocation2 + $0xee8] sm:$0xff] }
 0xe35   :  { %4513 = vmatprep.subr.bf16.mxu0 %v4134_v12  ;;  %4841 = vmatprep.subr.bf16.mxu1 %v4136_v41  ;;  %v4196_v12 = vld [vmem:[#allocation2 + $0xef8] sm:$0xff]  ;;  %v4193_v41 = vld [vmem:[#allocation2 + $0xee0] sm:$0xff] }
 0xe38   :  { %4514 = vmatpush1.bf16.msra.mxu0 %v4133_v18  ;;  %4842 = vmatpush1.bf16.msra.mxu1 %v4135_v31  ;;  %v4195_v18 = vld [vmem:[#allocation2 + $0xef0] sm:$0xff]  ;;  %v4198_v31 = vld [vmem:[#allocation2 + $0xf08] sm:$0xff] }
 0xe39   :  { %4515 = vmatprep.subr.bf16.mxu0 %v4138_v51  ;;  %4843 = vmatprep.subr.bf16.mxu1 %v4140_v15  ;;  %v4200_v51 = vld [vmem:[#allocation2 + $0xf18] sm:$0xff]  ;;  %v4197_v15 = vld [vmem:[#allocation2 + $0xf00] sm:$0xff] }
 0xe3c   :  { %4516 = vmatpush1.bf16.msra.mxu0 %v4137_v60  ;;  %4844 = vmatpush1.bf16.msra.mxu1 %v4139_v53  ;;  %v4199_v60 = vld [vmem:[#allocation2 + $0xf10] sm:$0xff]  ;;  %v4202_v53 = vld [vmem:[#allocation2 + $0xf28] sm:$0xff] }
 0xe3d   :  { %4517 = vmatprep.subr.bf16.mxu0 %v4142_v61  ;;  %4845 = vmatprep.subr.bf16.mxu1 %v4144_v63  ;;  %v4204_v61 = vld [vmem:[#allocation2 + $0xf38] sm:$0xff]  ;;  %v4201_v63 = vld [vmem:[#allocation2 + $0xf20] sm:$0xff] }
 0xe40   :  { %4518 = vmatpush1.bf16.msra.mxu0 %v4141_v2  ;;  %4846 = vmatpush1.bf16.msra.mxu1 %v4143_v3  ;;  %v4203_v2 = vld [vmem:[#allocation2 + $0xf30] sm:$0xff]  ;;  %v4206_v3 = vld [vmem:[#allocation2 + $0xf48] sm:$0xff] }
 0xe41   :  { %4519 = vmatprep.subr.bf16.mxu0 %v4146_v5  ;;  %4847 = vmatprep.subr.bf16.mxu1 %v4148_v11  ;;  %v4208_v5 = vld [vmem:[#allocation2 + $0xf58] sm:$0xff]  ;;  %v4205_v11 = vld [vmem:[#allocation2 + $0xf40] sm:$0xff] }
 0xe44   :  { %4520 = vmatpush1.bf16.msra.mxu0 %v4145_v26  ;;  %4848 = vmatpush1.bf16.msra.mxu1 %v4147_v10  ;;  %v4207_v26 = vld [vmem:[#allocation2 + $0xf50] sm:$0xff]  ;;  %v4210_v10 = vld [vmem:[#allocation2 + $0xf68] sm:$0xff] }
 0xe45   :  { %4521 = vmatprep.subr.bf16.mxu0 %v4150_v16  ;;  %4849 = vmatprep.subr.bf16.mxu1 %v4152_v40  ;;  %v4212_v16 = vld [vmem:[#allocation2 + $0xf78] sm:$0xff]  ;;  %v4209_v40 = vld [vmem:[#allocation2 + $0xf60] sm:$0xff] }
 0xe48   :  { %4522 = vmatpush1.bf16.msra.mxu0 %v4149_v56  ;;  %4850 = vmatpush1.bf16.msra.mxu1 %v4151_v9  ;;  %v4211_v56 = vld [vmem:[#allocation2 + $0xf70] sm:$0xff]  ;;  %v4214_v9 = vld [vmem:[#allocation2 + $0xf88] sm:$0xff] }
 0xe49   :  { %4523 = vmatprep.subr.bf16.mxu0 %v4154_v34  ;;  %4851 = vmatprep.subr.bf16.mxu1 %v4156_v33  ;;  %v4216_v34 = vld [vmem:[#allocation2 + $0xf98] sm:$0xff]  ;;  %v4213_v33 = vld [vmem:[#allocation2 + $0xf80] sm:$0xff] }
 0xe4c   :  { %4524 = vmatpush1.bf16.msra.mxu0 %v4153_v17  ;;  %4852 = vmatpush1.bf16.msra.mxu1 %v4155_v23  ;;  %v4215_v17 = vld [vmem:[#allocation2 + $0xf90] sm:$0xff]  ;;  %v4218_v23 = vld [vmem:[#allocation2 + $0xfa8] sm:$0xff] }
 0xe4d   :  { %4525 = vmatprep.subr.bf16.mxu0 %v4158_v47  ;;  %4853 = vmatprep.subr.bf16.mxu1 %v4160_v1  ;;  %v4220_v47 = vld [vmem:[#allocation2 + $0xfb8] sm:$0xff]  ;;  %v4217_v1 = vld [vmem:[#allocation2 + $0xfa0] sm:$0xff] }
 0xe50   :  { %4526 = vmatpush1.bf16.msra.mxu0 %v4157_v54  ;;  %4854 = vmatpush1.bf16.msra.mxu1 %v4159_v20  ;;  %v4219_v54 = vld [vmem:[#allocation2 + $0xfb0] sm:$0xff]  ;;  %v4222_v20 = vld [vmem:[#allocation2 + $0xfc8] sm:$0xff] }
 0xe51   :  { %4527 = vmatprep.subr.bf16.mxu0 %v4162_v42  ;;  %4855 = vmatprep.subr.bf16.mxu1 %v4164_v57  ;;  %v4224_v42 = vld [vmem:[#allocation2 + $0xfd8] sm:$0xff]  ;;  %v4221_v57 = vld [vmem:[#allocation2 + $0xfc0] sm:$0xff] }
 0xe54   :  { %4528 = vmatpush1.bf16.msra.mxu0 %v4161_v14  ;;  %4856 = vmatpush1.bf16.msra.mxu1 %v4163_v4  ;;  %v4223_v14 = vld [vmem:[#allocation2 + $0xfd0] sm:$0xff]  ;;  %v4226_v4 = vld [vmem:[#allocation2 + $0xfe8] sm:$0xff] }
 0xe55   :  { %4538 = vmatprep.subr.bf16.mxu0 %v4166_v8  ;;  %4866 = vmatprep.subr.bf16.mxu1 %v4168_v49  ;;  %v4228_v8 = vld [vmem:[#allocation2 + $0xff8] sm:$0xff]  ;;  %v4225_v49 = vld [vmem:[#allocation2 + $0xfe0] sm:$0xff] }
 0xe57   :  { %4530 = vmatmul.mubr.bf16.vlgmr.msra.gmra.mrb[32].mxu0 %v8302_v44  ;;  %4858 = vmatmul.mubr.bf16.vlgmr.msra.gmra.mrb[52].mxu1 %v8302_v44  ;;  %v4180_v44 = vld [vmem:[#allocation2 + $0xe78] sm:$0xff] }
 0xe58   :  { %4539 = vmatpush1.bf16.msra.mxu0 %v4165_v24  ;;  %4867 = vmatpush1.bf16.msra.mxu1 %v4167_v43  ;;  %v4227_v24 = vld [vmem:[#allocation2 + $0xff0] sm:$0xff]  ;;  %v4241_v43 = vsub.s32 2, %v7580_v45 }
 0xe59   :  { %4540 = vmatprep.subr.bf16.mxu0 %v4170_v27  ;;  %4868 = vmatprep.subr.bf16.mxu1 %v4172_v7  ;;  %v4229_v27 = vld [vmem:[#allocation31] sm:$0xf]  ;;  %v4237_v7 = vsub.s32 1, %v7580_v45 }
 0xe5a   :  { %4570 = vmatprep.mubr.bf16.mxu0 %v8308_v19  ;;  %4898 = vmatprep.mubr.bf16.mxu1 %v8308_v19  ;;  %v4181_v19 = vld [vmem:[#allocation2 + $0xe80] sm:$0xff] }
 0xe5c   :  { %4541 = vmatpush1.bf16.msra.mxu0 %v4169_v32  ;;  %4869 = vmatpush1.bf16.msra.mxu1 %v4171_v62  ;;  %v4245_v32 = vsub.s32 3, %v7580_v45  ;;  %v4234_v62 = vrot.slane %v4229_v27, %v7587_v50 }
 0xe5d   :  { %4542 = vmatprep.subr.bf16.mxu0 %v4174_v13  ;;  %4870 = vmatprep.subr.bf16.mxu1 %v4176_v35  ;;  %v4242_v13 = vrot.slane %v4229_v27, %v4241_v43  ;;  %v4238_v35 = vrot.slane %v4229_v27, %v4237_v7 }
 0xe60   :  { %4543 = vmatpush1.bf16.msra.mxu0 %v4173_v0  ;;  %4871 = vmatpush1.bf16.msra.mxu1 %v4175_v28  ;;  %v4246_v0 = vrot.slane %v4229_v27, %v4245_v32 }
 0xe61   :  { %4544 = vmatprep.subr.bf16.mxu0 %v4178_v36  ;;  %4872 = vmatprep.subr.bf16.mxu1 %v4180_v44 }
 0xe64   :  { %4545 = vmatpush1.bf16.msra.mxu0 %v4177_v59  ;;  %4873 = vmatpush1.bf16.msra.mxu1 %v4179_v30 }
 0xe65   :  { %4546 = vmatprep.subr.bf16.mxu0 %v4182_v55  ;;  %4874 = vmatprep.subr.bf16.mxu1 %v4184_v6 }
 0xe68   :  { %4547 = vmatpush1.bf16.msra.mxu0 %v4181_v19  ;;  %4875 = vmatpush1.bf16.msra.mxu1 %v4183_v22 }
 0xe69   :  { %4548 = vmatprep.subr.bf16.mxu0 %v4186_v38  ;;  %4876 = vmatprep.subr.bf16.mxu1 %v4188_v52 }
 0xe6c   :  { %4549 = vmatpush1.bf16.msra.mxu0 %v4185_v25  ;;  %4877 = vmatpush1.bf16.msra.mxu1 %v4187_v21 }
 0xe6d   :  { %4550 = vmatprep.subr.bf16.mxu0 %v4190_v48  ;;  %4878 = vmatprep.subr.bf16.mxu1 %v4192_v29 }
 0xe70   :  { %4551 = vmatpush1.bf16.msra.mxu0 %v4189_v58  ;;  %4879 = vmatpush1.bf16.msra.mxu1 %v4191_v46 }
 0xe71   :  { %4552 = vmatprep.subr.bf16.mxu0 %v4194_v39  ;;  %4880 = vmatprep.subr.bf16.mxu1 %v4196_v12 }
 0xe74   :  { %4553 = vmatpush1.bf16.msra.mxu0 %v4193_v41  ;;  %4881 = vmatpush1.bf16.msra.mxu1 %v4195_v18 }
 0xe75   :  { %4554 = vmatprep.subr.bf16.mxu0 %v4198_v31  ;;  %4882 = vmatprep.subr.bf16.mxu1 %v4200_v51 }
 0xe78   :  { %4555 = vmatpush1.bf16.msra.mxu0 %v4197_v15  ;;  %4883 = vmatpush1.bf16.msra.mxu1 %v4199_v60 }
 0xe79   :  { %4556 = vmatprep.subr.bf16.mxu0 %v4202_v53  ;;  %4884 = vmatprep.subr.bf16.mxu1 %v4204_v61 }
 0xe7c   :  { %4557 = vmatpush1.bf16.msra.mxu0 %v4201_v63  ;;  %4885 = vmatpush1.bf16.msra.mxu1 %v4203_v2 }
 0xe7d   :  { %4558 = vmatprep.subr.bf16.mxu0 %v4206_v3  ;;  %4886 = vmatprep.subr.bf16.mxu1 %v4208_v5 }
 0xe80   :  { %4559 = vmatpush1.bf16.msra.mxu0 %v4205_v11  ;;  %4887 = vmatpush1.bf16.msra.mxu1 %v4207_v26 }
 0xe81   :  { %4560 = vmatprep.subr.bf16.mxu0 %v4210_v10  ;;  %4888 = vmatprep.subr.bf16.mxu1 %v4212_v16 }
 0xe84   :  { %4561 = vmatpush1.bf16.msra.mxu0 %v4209_v40  ;;  %4889 = vmatpush1.bf16.msra.mxu1 %v4211_v56 }
 0xe85   :  { %4562 = vmatprep.subr.bf16.mxu0 %v4214_v9  ;;  %4890 = vmatprep.subr.bf16.mxu1 %v4216_v34 }
 0xe88   :  { %4563 = vmatpush1.bf16.msra.mxu0 %v4213_v33  ;;  %4891 = vmatpush1.bf16.msra.mxu1 %v4215_v17 }
 0xe89   :  { %4564 = vmatprep.subr.bf16.mxu0 %v4218_v23  ;;  %4892 = vmatprep.subr.bf16.mxu1 %v4220_v47 }
 0xe8c   :  { %4565 = vmatpush1.bf16.msra.mxu0 %v4217_v1  ;;  %4893 = vmatpush1.bf16.msra.mxu1 %v4219_v54 }
 0xe8d   :  { %4566 = vmatprep.subr.bf16.mxu0 %v4222_v20  ;;  %4894 = vmatprep.subr.bf16.mxu1 %v4224_v42 }
 0xe90   :  { %4567 = vmatpush1.bf16.msra.mxu0 %v4221_v57  ;;  %4895 = vmatpush1.bf16.msra.mxu1 %v4223_v14 }
 0xe91   :  { %4568 = vmatprep.subr.bf16.mxu0 %v4226_v4  ;;  %4896 = vmatprep.subr.bf16.mxu1 %v4228_v8 }
 0xe94   :  { %4569 = vmatpush1.bf16.msra.mxu0 %v4225_v49  ;;  %4897 = vmatpush1.bf16.msra.mxu1 %v4227_v24 }
 0xe97   :  { %4571 = vmatmul.mubr.bf16.vlgmr.msra.gmra.mrb[32].mxu0 %v8306_v37  ;;  %4899 = vmatmul.mubr.bf16.vlgmr.msra.gmra.mrb[52].mxu1 %v8306_v37 }
 0xf6a   :  { %v4572_v28 = vpop.f32.mrb[32].mxu0  ;;  %v4900_v37 = vpop.f32.mrb[52].mxu1 }
 0xf6b   :  { %v6297_v36 = vadd.f32 %v4572_v28, %v4234_v62  ;;  %v6299_v44 = vadd.f32 %v4900_v37, %v4242_v13  ;;  %v4574_v59 = vpop.f32.mrb[33].mxu0  ;;  %v4902_v30 = vpop.f32.mrb[53].mxu1 }
 0xf6c   :  { %v6298_v55 = vadd.f32 %v4574_v59, %v4238_v35  ;;  %v6300_v6 = vadd.f32 %v4902_v30, %v4246_v0  ;;  %v4576_v19 = vpop.f32.mrb[34].mxu0  ;;  %v4904_v22 = vpop.f32.mrb[54].mxu1 }
 0xf6d   :  { %v4907_v38 = vmax.f32 %v6297_v36, 0.0  ;;  %v4909_v52 = vmax.f32 %v6299_v44, 0.0  ;;  %v4577_v25 = vpop.f32.mrb[35].mxu0  ;;  %v4905_v21 = vpop.f32.mrb[55].mxu1 }
 0xf6e   :  { %v4908_v48 = vmax.f32 %v6298_v55, 0.0  ;;  %v4910_v29 = vmax.f32 %v6300_v6, 0.0 }
 0xf6f   :  { %v8350_v58 = vpack.c.bf16 %v4907_v38, %v4907_v38  ;;  %v8352_v46 = vpack.c.bf16 %v4909_v52, %v4909_v52 }
 0xf70   :  { %v4912_v39 = vpack.c.bf16 %v4908_v48, %v4908_v48  ;;  %v8354_v12 = vpack.c.bf16 %v4910_v29, %v4910_v29 }
 0xf71   :  { %6930 = dma.done.wait [#allocation5 + $0x1], 16384 }
 0xf72   :  { %6931 = vsyncadd [#allocation5 + $0x1], 4294950912  ;;  %5101 = vmatprep.mubr.bf16.mxu0 %v4912_v39  ;;  %5183 = vmatprep.mubr.bf16.mxu1 %v4912_v39  ;;  %v4920_v41 = vld [vmem:[#allocation3 + $0x8] sm:$0xff]  ;;  %v4922_v18 = vld [vmem:[#allocation3 + $0x18] sm:$0xff] }
 0xf73   :  { %v4919_v31 = vld [vmem:[#allocation3] sm:$0xff]  ;;  %5069 = vmatprep.subr.bf16.mxu0 %v4920_v41  ;;  %5151 = vmatprep.subr.bf16.mxu1 %v4922_v18  ;;  %v4921_v51 = vld [vmem:[#allocation3 + $0x10] sm:$0xff]  ;;  %v4924_v15 = vld [vmem:[#allocation3 + $0x28] sm:$0xff] }
 0xf74   :  { %v4926_v60 = vld [vmem:[#allocation3 + $0x38] sm:$0xff]  ;;  %5070 = vmatpush1.bf16.msra.mxu0 %v4919_v31  ;;  %5152 = vmatpush1.bf16.msra.mxu1 %v4921_v51  ;;  %v4923_v53 = vld [vmem:[#allocation3 + $0x20] sm:$0xff]  ;;  %v4925_v61 = vld [vmem:[#allocation3 + $0x30] sm:$0xff] }
 0xf75   :  { %5071 = vmatprep.subr.bf16.mxu0 %v4924_v15  ;;  %5153 = vmatprep.subr.bf16.mxu1 %v4926_v60  ;;  %v4928_v63 = vld [vmem:[#allocation3 + $0x48] sm:$0xff]  ;;  %v4930_v2 = vld [vmem:[#allocation3 + $0x58] sm:$0xff]  ;;  %v4927_v3 = vld [vmem:[#allocation3 + $0x40] sm:$0xff] }
 0xf76   :  { %v4929_v5 = vld [vmem:[#allocation3 + $0x50] sm:$0xff]  ;;  %v4932_v11 = vld [vmem:[#allocation3 + $0x68] sm:$0xff]  ;;  %v4934_v26 = vld [vmem:[#allocation3 + $0x78] sm:$0xff] }
 0xf77   :  { %v4931_v10 = vld [vmem:[#allocation3 + $0x60] sm:$0xff]  ;;  %v4933_v16 = vld [vmem:[#allocation3 + $0x70] sm:$0xff]  ;;  %v4936_v40 = vld [vmem:[#allocation3 + $0x88] sm:$0xff] }
 0xf78   :  { %5072 = vmatpush1.bf16.msra.mxu0 %v4923_v53  ;;  %5154 = vmatpush1.bf16.msra.mxu1 %v4925_v61  ;;  %v4938_v56 = vld [vmem:[#allocation3 + $0x98] sm:$0xff]  ;;  %v4935_v9 = vld [vmem:[#allocation3 + $0x80] sm:$0xff]  ;;  %v4937_v34 = vld [vmem:[#allocation3 + $0x90] sm:$0xff] }
 0xf79   :  { %5073 = vmatprep.subr.bf16.mxu0 %v4928_v63  ;;  %5155 = vmatprep.subr.bf16.mxu1 %v4930_v2  ;;  %v4940_v33 = vld [vmem:[#allocation3 + $0xa8] sm:$0xff]  ;;  %v4942_v17 = vld [vmem:[#allocation3 + $0xb8] sm:$0xff]  ;;  %v4939_v23 = vld [vmem:[#allocation3 + $0xa0] sm:$0xff] }
 0xf7a   :  { %v4941_v47 = vld [vmem:[#allocation3 + $0xb0] sm:$0xff]  ;;  %v4944_v1 = vld [vmem:[#allocation3 + $0xc8] sm:$0xff]  ;;  %v4946_v54 = vld [vmem:[#allocation3 + $0xd8] sm:$0xff] }
 0xf7b   :  { %v4943_v20 = vld [vmem:[#allocation3 + $0xc0] sm:$0xff]  ;;  %v4945_v42 = vld [vmem:[#allocation3 + $0xd0] sm:$0xff]  ;;  %v4948_v57 = vld [vmem:[#allocation3 + $0xe8] sm:$0xff] }
 0xf7c   :  { %5074 = vmatpush1.bf16.msra.mxu0 %v4927_v3  ;;  %5156 = vmatpush1.bf16.msra.mxu1 %v4929_v5  ;;  %v4950_v14 = vld [vmem:[#allocation3 + $0xf8] sm:$0xff]  ;;  %v4947_v4 = vld [vmem:[#allocation3 + $0xe0] sm:$0xff]  ;;  %v4949_v8 = vld [vmem:[#allocation3 + $0xf0] sm:$0xff] }
 0xf7d   :  { %5075 = vmatprep.subr.bf16.mxu0 %v4932_v11  ;;  %5157 = vmatprep.subr.bf16.mxu1 %v4934_v26  ;;  %v4952_v49 = vld [vmem:[#allocation3 + $0x108] sm:$0xff]  ;;  %v4954_v24 = vld [vmem:[#allocation3 + $0x118] sm:$0xff]  ;;  %v4951_v27 = vld [vmem:[#allocation3 + $0x100] sm:$0xff] }
 0xf7e   :  { %v4953_v62 = vld [vmem:[#allocation3 + $0x110] sm:$0xff]  ;;  %v4956_v13 = vld [vmem:[#allocation3 + $0x128] sm:$0xff]  ;;  %v4958_v35 = vld [vmem:[#allocation3 + $0x138] sm:$0xff] }
 0xf7f   :  { %v4955_v0 = vld [vmem:[#allocation3 + $0x120] sm:$0xff]  ;;  %v4957_v28 = vld [vmem:[#allocation3 + $0x130] sm:$0xff]  ;;  %v4960_v37 = vld [vmem:[#allocation3 + $0x148] sm:$0xff] }
 0xf80   :  { %5076 = vmatpush1.bf16.msra.mxu0 %v4931_v10  ;;  %5158 = vmatpush1.bf16.msra.mxu1 %v4933_v16  ;;  %v4962_v36 = vld [vmem:[#allocation3 + $0x158] sm:$0xff]  ;;  %v4959_v44 = vld [vmem:[#allocation3 + $0x140] sm:$0xff]  ;;  %v4961_v59 = vld [vmem:[#allocation3 + $0x150] sm:$0xff] }
 0xf81   :  { %5077 = vmatprep.subr.bf16.mxu0 %v4936_v40  ;;  %5159 = vmatprep.subr.bf16.mxu1 %v4938_v56  ;;  %v4964_v30 = vld [vmem:[#allocation3 + $0x168] sm:$0xff]  ;;  %v4966_v55 = vld [vmem:[#allocation3 + $0x178] sm:$0xff]  ;;  %v4963_v6 = vld [vmem:[#allocation3 + $0x160] sm:$0xff] }
 0xf82   :  { %v4965_v19 = vld [vmem:[#allocation3 + $0x170] sm:$0xff]  ;;  %v4968_v22 = vld [vmem:[#allocation3 + $0x188] sm:$0xff]  ;;  %v4970_v38 = vld [vmem:[#allocation3 + $0x198] sm:$0xff] }
 0xf83   :  { %v4967_v52 = vld [vmem:[#allocation3 + $0x180] sm:$0xff]  ;;  %v4969_v25 = vld [vmem:[#allocation3 + $0x190] sm:$0xff]  ;;  %v4972_v21 = vld [vmem:[#allocation3 + $0x1a8] sm:$0xff] }
 0xf84   :  { %5078 = vmatpush1.bf16.msra.mxu0 %v4935_v9  ;;  %5160 = vmatpush1.bf16.msra.mxu1 %v4937_v34  ;;  %v4974_v48 = vld [vmem:[#allocation3 + $0x1b8] sm:$0xff]  ;;  %v4971_v29 = vld [vmem:[#allocation3 + $0x1a0] sm:$0xff]  ;;  %v4973_v39 = vld [vmem:[#allocation3 + $0x1b0] sm:$0xff] }
 0xf85   :  { %5079 = vmatprep.subr.bf16.mxu0 %v4940_v33  ;;  %5161 = vmatprep.subr.bf16.mxu1 %v4942_v17  ;;  %v4976_v41 = vld [vmem:[#allocation3 + $0x1c8] sm:$0xff]  ;;  %v4978_v18 = vld [vmem:[#allocation3 + $0x1d8] sm:$0xff]  ;;  %v4975_v31 = vld [vmem:[#allocation3 + $0x1c0] sm:$0xff] }
 0xf86   :  { %v4977_v51 = vld [vmem:[#allocation3 + $0x1d0] sm:$0xff]  ;;  %v4980_v15 = vld [vmem:[#allocation3 + $0x1e8] sm:$0xff]  ;;  %v4982_v60 = vld [vmem:[#allocation3 + $0x1f8] sm:$0xff] }
 0xf87   :  { %v4979_v53 = vld [vmem:[#allocation3 + $0x1e0] sm:$0xff]  ;;  %v4981_v61 = vld [vmem:[#allocation3 + $0x1f0] sm:$0xff]  ;;  %v4984_v63 = vld [vmem:[#allocation3 + $0x208] sm:$0xff] }
 0xf88   :  { %5080 = vmatpush1.bf16.msra.mxu0 %v4939_v23  ;;  %5162 = vmatpush1.bf16.msra.mxu1 %v4941_v47  ;;  %v4986_v2 = vld [vmem:[#allocation3 + $0x218] sm:$0xff]  ;;  %v4983_v3 = vld [vmem:[#allocation3 + $0x200] sm:$0xff]  ;;  %v4985_v5 = vld [vmem:[#allocation3 + $0x210] sm:$0xff] }
 0xf89   :  { %5081 = vmatprep.subr.bf16.mxu0 %v4944_v1  ;;  %5163 = vmatprep.subr.bf16.mxu1 %v4946_v54  ;;  %v4988_v11 = vld [vmem:[#allocation3 + $0x228] sm:$0xff]  ;;  %v4990_v26 = vld [vmem:[#allocation3 + $0x238] sm:$0xff]  ;;  %v4987_v10 = vld [vmem:[#allocation3 + $0x220] sm:$0xff] }
 0xf8a   :  { %v4989_v16 = vld [vmem:[#allocation3 + $0x230] sm:$0xff]  ;;  %v4992_v40 = vld [vmem:[#allocation3 + $0x248] sm:$0xff]  ;;  %v4994_v56 = vld [vmem:[#allocation3 + $0x258] sm:$0xff] }
 0xf8b   :  { %v4991_v9 = vld [vmem:[#allocation3 + $0x240] sm:$0xff]  ;;  %v4993_v34 = vld [vmem:[#allocation3 + $0x250] sm:$0xff]  ;;  %v4996_v33 = vld [vmem:[#allocation3 + $0x268] sm:$0xff] }
 0xf8c   :  { %5082 = vmatpush1.bf16.msra.mxu0 %v4943_v20  ;;  %5164 = vmatpush1.bf16.msra.mxu1 %v4945_v42  ;;  %v4995_v17 = vld [vmem:[#allocation3 + $0x260] sm:$0xff]  ;;  %v4997_v23 = vld [vmem:[#allocation3 + $0x270] sm:$0xff]  ;;  %v5000_v47 = vld [vmem:[#allocation3 + $0x288] sm:$0xff] }
 0xf8d   :  { %5083 = vmatprep.subr.bf16.mxu0 %v4948_v57  ;;  %5165 = vmatprep.subr.bf16.mxu1 %v4950_v14  ;;  %v5002_v1 = vld [vmem:[#allocation3 + $0x298] sm:$0xff]  ;;  %v5001_v54 = vld [vmem:[#allocation3 + $0x290] sm:$0xff]  ;;  %v5004_v20 = vld [vmem:[#allocation3 + $0x2a8] sm:$0xff] }
 0xf8e   :  { %v5006_v42 = vld [vmem:[#allocation3 + $0x2b8] sm:$0xff]  ;;  %v5003_v57 = vld [vmem:[#allocation3 + $0x2a0] sm:$0xff]  ;;  %v5005_v14 = vld [vmem:[#allocation3 + $0x2b0] sm:$0xff] }
 0xf90   :  { %5084 = vmatpush1.bf16.msra.mxu0 %v4947_v4  ;;  %5166 = vmatpush1.bf16.msra.mxu1 %v4949_v8  ;;  %v5008_v4 = vld [vmem:[#allocation3 + $0x2c8] sm:$0xff]  ;;  %v5010_v8 = vld [vmem:[#allocation3 + $0x2d8] sm:$0xff] }
 0xf91   :  { %5085 = vmatprep.subr.bf16.mxu0 %v4952_v49  ;;  %5167 = vmatprep.subr.bf16.mxu1 %v4954_v24  ;;  %v5007_v49 = vld [vmem:[#allocation3 + $0x2c0] sm:$0xff]  ;;  %v5009_v24 = vld [vmem:[#allocation3 + $0x2d0] sm:$0xff] }
 0xf94   :  { %5086 = vmatpush1.bf16.msra.mxu0 %v4951_v27  ;;  %5168 = vmatpush1.bf16.msra.mxu1 %v4953_v62  ;;  %v5012_v27 = vld [vmem:[#allocation3 + $0x2e8] sm:$0xff]  ;;  %v5014_v62 = vld [vmem:[#allocation3 + $0x2f8] sm:$0xff] }
 0xf95   :  { %5087 = vmatprep.subr.bf16.mxu0 %v4956_v13  ;;  %5169 = vmatprep.subr.bf16.mxu1 %v4958_v35  ;;  %v5011_v13 = vld [vmem:[#allocation3 + $0x2e0] sm:$0xff]  ;;  %v5013_v35 = vld [vmem:[#allocation3 + $0x2f0] sm:$0xff] }
 0xf98   :  { %5088 = vmatpush1.bf16.msra.mxu0 %v4955_v0  ;;  %5170 = vmatpush1.bf16.msra.mxu1 %v4957_v28  ;;  %v5016_v0 = vld [vmem:[#allocation3 + $0x308] sm:$0xff]  ;;  %v5018_v28 = vld [vmem:[#allocation3 + $0x318] sm:$0xff] }
 0xf99   :  { %5089 = vmatprep.subr.bf16.mxu0 %v4960_v37  ;;  %5171 = vmatprep.subr.bf16.mxu1 %v4962_v36  ;;  %v5015_v37 = vld [vmem:[#allocation3 + $0x300] sm:$0xff]  ;;  %v5017_v36 = vld [vmem:[#allocation3 + $0x310] sm:$0xff] }
 0xf9c   :  { %5090 = vmatpush1.bf16.msra.mxu0 %v4959_v44  ;;  %5172 = vmatpush1.bf16.msra.mxu1 %v4961_v59  ;;  %v5020_v44 = vld [vmem:[#allocation3 + $0x328] sm:$0xff]  ;;  %v5022_v59 = vld [vmem:[#allocation3 + $0x338] sm:$0xff] }
 0xf9d   :  { %5091 = vmatprep.subr.bf16.mxu0 %v4964_v30  ;;  %5173 = vmatprep.subr.bf16.mxu1 %v4966_v55  ;;  %v5019_v30 = vld [vmem:[#allocation3 + $0x320] sm:$0xff]  ;;  %v5021_v55 = vld [vmem:[#allocation3 + $0x330] sm:$0xff] }
 0xfa0   :  { %5092 = vmatpush1.bf16.msra.mxu0 %v4963_v6  ;;  %5174 = vmatpush1.bf16.msra.mxu1 %v4965_v19  ;;  %v5024_v6 = vld [vmem:[#allocation3 + $0x348] sm:$0xff]  ;;  %v5026_v19 = vld [vmem:[#allocation3 + $0x358] sm:$0xff] }
 0xfa1   :  { %5093 = vmatprep.subr.bf16.mxu0 %v4968_v22  ;;  %5175 = vmatprep.subr.bf16.mxu1 %v4970_v38  ;;  %v5023_v22 = vld [vmem:[#allocation3 + $0x340] sm:$0xff]  ;;  %v5025_v38 = vld [vmem:[#allocation3 + $0x350] sm:$0xff] }
 0xfa4   :  { %5094 = vmatpush1.bf16.msra.mxu0 %v4967_v52  ;;  %5176 = vmatpush1.bf16.msra.mxu1 %v4969_v25  ;;  %v5028_v52 = vld [vmem:[#allocation3 + $0x368] sm:$0xff]  ;;  %v5030_v25 = vld [vmem:[#allocation3 + $0x378] sm:$0xff] }
 0xfa5   :  { %5095 = vmatprep.subr.bf16.mxu0 %v4972_v21  ;;  %5177 = vmatprep.subr.bf16.mxu1 %v4974_v48  ;;  %v5027_v21 = vld [vmem:[#allocation3 + $0x360] sm:$0xff]  ;;  %v5029_v48 = vld [vmem:[#allocation3 + $0x370] sm:$0xff] }
 0xfa8   :  { %5096 = vmatpush1.bf16.msra.mxu0 %v4971_v29  ;;  %5178 = vmatpush1.bf16.msra.mxu1 %v4973_v39  ;;  %v5032_v29 = vld [vmem:[#allocation3 + $0x388] sm:$0xff]  ;;  %v5034_v39 = vld [vmem:[#allocation3 + $0x398] sm:$0xff] }
 0xfa9   :  { %5097 = vmatprep.subr.bf16.mxu0 %v4976_v41  ;;  %5179 = vmatprep.subr.bf16.mxu1 %v4978_v18  ;;  %v5031_v41 = vld [vmem:[#allocation3 + $0x380] sm:$0xff]  ;;  %v5033_v18 = vld [vmem:[#allocation3 + $0x390] sm:$0xff] }
 0xfac   :  { %5098 = vmatpush1.bf16.msra.mxu0 %v4975_v31  ;;  %5180 = vmatpush1.bf16.msra.mxu1 %v4977_v51  ;;  %v5036_v31 = vld [vmem:[#allocation3 + $0x3a8] sm:$0xff]  ;;  %v5038_v51 = vld [vmem:[#allocation3 + $0x3b8] sm:$0xff] }
 0xfad   :  { %5099 = vmatprep.subr.bf16.mxu0 %v4980_v15  ;;  %5181 = vmatprep.subr.bf16.mxu1 %v4982_v60  ;;  %v5035_v15 = vld [vmem:[#allocation3 + $0x3a0] sm:$0xff]  ;;  %v5037_v60 = vld [vmem:[#allocation3 + $0x3b0] sm:$0xff] }
 0xfb0   :  { %5100 = vmatpush1.bf16.msra.mxu0 %v4979_v53  ;;  %5182 = vmatpush1.bf16.msra.mxu1 %v4981_v61  ;;  %v5040_v53 = vld [vmem:[#allocation3 + $0x3c8] sm:$0xff]  ;;  %v5042_v61 = vld [vmem:[#allocation3 + $0x3d8] sm:$0xff] }
 0xfb1   :  { %5110 = vmatprep.subr.bf16.mxu0 %v4984_v63  ;;  %5192 = vmatprep.subr.bf16.mxu1 %v4986_v2  ;;  %v5039_v63 = vld [vmem:[#allocation3 + $0x3c0] sm:$0xff]  ;;  %v5041_v2 = vld [vmem:[#allocation3 + $0x3d0] sm:$0xff] }
 0xfb3   :  { %5102 = vmatmul.mubr.bf16.vlgmr.msra.gmra.mrb[36].mxu0 %v8350_v58  ;;  %5184 = vmatmul.mubr.bf16.vlgmr.msra.gmra.mrb[56].mxu1 %v8350_v58  ;;  %v4998_v58 = vld [vmem:[#allocation3 + $0x278] sm:$0xff] }
 0xfb4   :  { %5111 = vmatpush1.bf16.msra.mxu0 %v4983_v3  ;;  %5193 = vmatpush1.bf16.msra.mxu1 %v4985_v5  ;;  %v5044_v3 = vld [vmem:[#allocation3 + $0x3e8] sm:$0xff]  ;;  %v5046_v5 = vld [vmem:[#allocation3 + $0x3f8] sm:$0xff] }
 0xfb5   :  { %5112 = vmatprep.subr.bf16.mxu0 %v4988_v11  ;;  %5194 = vmatprep.subr.bf16.mxu1 %v4990_v26  ;;  %v5043_v11 = vld [vmem:[#allocation3 + $0x3e0] sm:$0xff]  ;;  %v5045_v26 = vld [vmem:[#allocation3 + $0x3f0] sm:$0xff] }
 0xfb6   :  { %5142 = vmatprep.mubr.bf16.mxu0 %v8354_v12  ;;  %5224 = vmatprep.mubr.bf16.mxu1 %v8354_v12  ;;  %v4999_v12 = vld [vmem:[#allocation3 + $0x280] sm:$0xff] }
 0xfb8   :  { %5113 = vmatpush1.bf16.msra.mxu0 %v4987_v10  ;;  %5195 = vmatpush1.bf16.msra.mxu1 %v4989_v16  ;;  %v5047_v10 = vld [vmem:[#allocation32] sm:$0xf] }
 0xfb9   :  { %5114 = vmatprep.subr.bf16.mxu0 %v4992_v40  ;;  %5196 = vmatprep.subr.bf16.mxu1 %v4994_v56  ;;  %v5052_v16 = vrot.slane %v5047_v10, %v7587_v50  ;;  %v5060_v40 = vrot.slane %v5047_v10, %v4241_v43  ;;  %v5056_v56 = vrot.slane %v5047_v10, %v4237_v7 }
 0xfbc   :  { %5115 = vmatpush1.bf16.msra.mxu0 %v4991_v9  ;;  %5197 = vmatpush1.bf16.msra.mxu1 %v4993_v34  ;;  %v5064_v9 = vrot.slane %v5047_v10, %v4245_v32 }
 0xfbd   :  { %5116 = vmatprep.subr.bf16.mxu0 %v4996_v33  ;;  %5198 = vmatprep.subr.bf16.mxu1 %v4998_v58 }
 0xfc0   :  { %5117 = vmatpush1.bf16.msra.mxu0 %v4995_v17  ;;  %5199 = vmatpush1.bf16.msra.mxu1 %v4997_v23 }
 0xfc1   :  { %5118 = vmatprep.subr.bf16.mxu0 %v5000_v47  ;;  %5200 = vmatprep.subr.bf16.mxu1 %v5002_v1 }
 0xfc4   :  { %5119 = vmatpush1.bf16.msra.mxu0 %v4999_v12  ;;  %5201 = vmatpush1.bf16.msra.mxu1 %v5001_v54 }
 0xfc5   :  { %5120 = vmatprep.subr.bf16.mxu0 %v5004_v20  ;;  %5202 = vmatprep.subr.bf16.mxu1 %v5006_v42 }
 0xfc8   :  { %5121 = vmatpush1.bf16.msra.mxu0 %v5003_v57  ;;  %5203 = vmatpush1.bf16.msra.mxu1 %v5005_v14 }
 0xfc9   :  { %5122 = vmatprep.subr.bf16.mxu0 %v5008_v4  ;;  %5204 = vmatprep.subr.bf16.mxu1 %v5010_v8 }
 0xfcc   :  { %5123 = vmatpush1.bf16.msra.mxu0 %v5007_v49  ;;  %5205 = vmatpush1.bf16.msra.mxu1 %v5009_v24 }
 0xfcd   :  { %5124 = vmatprep.subr.bf16.mxu0 %v5012_v27  ;;  %5206 = vmatprep.subr.bf16.mxu1 %v5014_v62 }
 0xfd0   :  { %5125 = vmatpush1.bf16.msra.mxu0 %v5011_v13  ;;  %5207 = vmatpush1.bf16.msra.mxu1 %v5013_v35 }
 0xfd1   :  { %5126 = vmatprep.subr.bf16.mxu0 %v5016_v0  ;;  %5208 = vmatprep.subr.bf16.mxu1 %v5018_v28 }
 0xfd4   :  { %5127 = vmatpush1.bf16.msra.mxu0 %v5015_v37  ;;  %5209 = vmatpush1.bf16.msra.mxu1 %v5017_v36 }
 0xfd5   :  { %5128 = vmatprep.subr.bf16.mxu0 %v5020_v44  ;;  %5210 = vmatprep.subr.bf16.mxu1 %v5022_v59 }
 0xfd8   :  { %5129 = vmatpush1.bf16.msra.mxu0 %v5019_v30  ;;  %5211 = vmatpush1.bf16.msra.mxu1 %v5021_v55 }
 0xfd9   :  { %5130 = vmatprep.subr.bf16.mxu0 %v5024_v6  ;;  %5212 = vmatprep.subr.bf16.mxu1 %v5026_v19 }
 0xfdc   :  { %5131 = vmatpush1.bf16.msra.mxu0 %v5023_v22  ;;  %5213 = vmatpush1.bf16.msra.mxu1 %v5025_v38 }
 0xfdd   :  { %5132 = vmatprep.subr.bf16.mxu0 %v5028_v52  ;;  %5214 = vmatprep.subr.bf16.mxu1 %v5030_v25 }
 0xfe0   :  { %5133 = vmatpush1.bf16.msra.mxu0 %v5027_v21  ;;  %5215 = vmatpush1.bf16.msra.mxu1 %v5029_v48 }
 0xfe1   :  { %5134 = vmatprep.subr.bf16.mxu0 %v5032_v29  ;;  %5216 = vmatprep.subr.bf16.mxu1 %v5034_v39 }
 0xfe4   :  { %5135 = vmatpush1.bf16.msra.mxu0 %v5031_v41  ;;  %5217 = vmatpush1.bf16.msra.mxu1 %v5033_v18 }
 0xfe5   :  { %5136 = vmatprep.subr.bf16.mxu0 %v5036_v31  ;;  %5218 = vmatprep.subr.bf16.mxu1 %v5038_v51 }
 0xfe8   :  { %5137 = vmatpush1.bf16.msra.mxu0 %v5035_v15  ;;  %5219 = vmatpush1.bf16.msra.mxu1 %v5037_v60 }
 0xfe9   :  { %5138 = vmatprep.subr.bf16.mxu0 %v5040_v53  ;;  %5220 = vmatprep.subr.bf16.mxu1 %v5042_v61 }
 0xfec   :  { %5139 = vmatpush1.bf16.msra.mxu0 %v5039_v63  ;;  %5221 = vmatpush1.bf16.msra.mxu1 %v5041_v2 }
 0xfed   :  { %5140 = vmatprep.subr.bf16.mxu0 %v5044_v3  ;;  %5222 = vmatprep.subr.bf16.mxu1 %v5046_v5 }
 0xff0   :  { %5141 = vmatpush1.bf16.msra.mxu0 %v5043_v11  ;;  %5223 = vmatpush1.bf16.msra.mxu1 %v5045_v26 }
 0xff3   :  { %5143 = vmatmul.mubr.bf16.vlgmr.msra.gmra.mrb[36].mxu0 %v8352_v46  ;;  %5225 = vmatmul.mubr.bf16.vlgmr.msra.gmra.mrb[56].mxu1 %v8352_v46 }
0x10c6   :  { %v5144_v34 = vpop.f32.mrb[36].mxu0  ;;  %v5226_v33 = vpop.f32.mrb[56].mxu1 }
0x10c7   :  { %v6301_v58 = vadd.f32 %v5144_v34, %v5052_v16  ;;  %v6303_v17 = vadd.f32 %v5226_v33, %v5060_v40  ;;  %v5146_v23 = vpop.f32.mrb[37].mxu0  ;;  %v5228_v47 = vpop.f32.mrb[57].mxu1 }
0x10c8   :  { %v6302_v1 = vadd.f32 %v5146_v23, %v5056_v56  ;;  %v6304_v46 = vadd.f32 %v5228_v47, %v5064_v9  ;;  %v5148_v12 = vpop.f32.mrb[38].mxu0  ;;  %v5230_v54 = vpop.f32.mrb[58].mxu1 }
0x10c9   :  { %v5233_v50 = vmax.f32 %v6301_v58, 0.0  ;;  %v5235_v20 = vmax.f32 %v6303_v17, 0.0  ;;  %v5149_v42 = vpop.f32.mrb[39].mxu0  ;;  %v5231_v43 = vpop.f32.mrb[59].mxu1 }
0x10ca   :  { %v5234_v57 = vmax.f32 %v6302_v1, 0.0  ;;  %v5236_v14 = vmax.f32 %v6304_v46, 0.0 }
0x10cb   :  { %v8369_v7 = vpack.c.bf16 %v5233_v50, %v5233_v50  ;;  %v8371_v45 = vpack.c.bf16 %v5235_v20, %v5235_v20 }
0x10cc   :  { %v5238_v32 = vpack.c.bf16 %v5234_v57, %v5234_v57  ;;  %v5240_v4 = vpack.c.bf16 %v5236_v14, %v5236_v14 }
0x10cd   :  { %6932 = dma.done.wait [#allocation5 + $0x2], 4096 }
0x10ce   :  { %6933 = vsyncadd [#allocation5 + $0x2], 4294963200  ;;  %5315 = vmatprep.mubr.bf16.mxu0 %v5238_v32  ;;  %5355 = vmatprep.mubr.bf16.mxu1 %v5240_v4  ;;  %v5252_v8 = vld [vmem:[#allocation4 + $0x40] sm:$0xff]  ;;  %v5253_v62 = vld [vmem:[#allocation4 + $0x48] sm:$0xff]  ;;  %s8429_s10 = sld [smem:[#allocation63_spill]] }
0x10cf   :  { %v5268_v49 = vld [vmem:[#allocation4 + $0xc0] sm:$0xff]  ;;  %5662 = vmatprep.subr.bf16.mxu0 %v5252_v8  ;;  %v5269_v13 = vld [vmem:[#allocation4 + $0xc8] sm:$0xff]  ;;  %v5254_v28 = vld [vmem:[#allocation4 + $0x50] sm:$0xff] }
0x10d0   :  { %v5244_v24 = vld [vmem:[#allocation4] sm:$0xff]  ;;  %5684 = vmatprep.subr.bf16.mxu1 %v5268_v49  ;;  %v5245_v35 = vld [vmem:[#allocation4 + $0x8] sm:$0xff]  ;;  %v5270_v37 = vld [vmem:[#allocation4 + $0xd0] sm:$0xff] }
0x10d1   :  { %v5260_v27 = vld [vmem:[#allocation4 + $0x80] sm:$0xff]  ;;  %5663 = vmatpush3.bf16.msra.mxu0 %v5244_v24  ;;  %v5261_v0 = vld [vmem:[#allocation4 + $0x88] sm:$0xff]  ;;  %v5246_v36 = vld [vmem:[#allocation4 + $0x10] sm:$0xff] }
0x10d2   :  { %5685 = vmatpush3.bf16.msra.mxu1 %v5260_v27  ;;  %5664 = vmatprep.subr.bf16.mxu0 %v5253_v62  ;;  %v5262_v44 = vld [vmem:[#allocation4 + $0x90] sm:$0xff]  ;;  %v5255_v59 = vld [vmem:[#allocation4 + $0x58] sm:$0xff]  ;;  %v5256_v19 = vld [vmem:[#allocation4 + $0x60] sm:$0xff] }
0x10d3   :  { %5686 = vmatprep.subr.bf16.mxu1 %v5269_v13  ;;  %v5271_v30 = vld [vmem:[#allocation4 + $0xd8] sm:$0xff]  ;;  %v5272_v22 = vld [vmem:[#allocation4 + $0xe0] sm:$0xff]  ;;  %v5257_v25 = vld [vmem:[#allocation4 + $0x68] sm:$0xff] }
0x10d4   :  { %v5247_v55 = vld [vmem:[#allocation4 + $0x18] sm:$0xff]  ;;  %v5248_v38 = vld [vmem:[#allocation4 + $0x20] sm:$0xff]  ;;  %v5273_v21 = vld [vmem:[#allocation4 + $0xe8] sm:$0xff] }
0x10d5   :  { %5665 = vmatpush3.bf16.msra.mxu0 %v5245_v35  ;;  %v5263_v6 = vld [vmem:[#allocation4 + $0x98] sm:$0xff]  ;;  %v5264_v52 = vld [vmem:[#allocation4 + $0xa0] sm:$0xff]  ;;  %v5249_v48 = vld [vmem:[#allocation4 + $0x28] sm:$0xff] }
0x10d6   :  { %5687 = vmatpush3.bf16.msra.mxu1 %v5261_v0  ;;  %5666 = vmatprep.subr.bf16.mxu0 %v5254_v28  ;;  %v5265_v29 = vld [vmem:[#allocation4 + $0xa8] sm:$0xff]  ;;  %v5258_v39 = vld [vmem:[#allocation4 + $0x70] sm:$0xff]  ;;  %v5259_v51 = vld [vmem:[#allocation4 + $0x78] sm:$0xff] }
0x10d7   :  { %5688 = vmatprep.subr.bf16.mxu1 %v5270_v37  ;;  %v5274_v41 = vld [vmem:[#allocation4 + $0xf0] sm:$0xff]  ;;  %v5275_v15 = vld [vmem:[#allocation4 + $0xf8] sm:$0xff]  ;;  %v5488_v2 = vld [vmem:[#allocation34] ss:$0 sm:$0xff] }
0x10d8   :  { %v5250_v18 = vld [vmem:[#allocation4 + $0x30] sm:$0xff]  ;;  %v5251_v60 = vld [vmem:[#allocation4 + $0x38] sm:$0xff] }
0x10d9   :  { %5667 = vmatpush3.bf16.msra.mxu0 %v5246_v36  ;;  %v5266_v31 = vld [vmem:[#allocation4 + $0xb0] sm:$0xff]  ;;  %v5267_v53 = vld [vmem:[#allocation4 + $0xb8] sm:$0xff] }
0x10da   :  { %5689 = vmatpush3.bf16.msra.mxu1 %v5262_v44  ;;  %5668 = vmatprep.subr.bf16.mxu0 %v5255_v59 }
0x10db   :  { %5690 = vmatprep.subr.bf16.mxu1 %v5271_v30 }
0x10dd   :  { %5669 = vmatpush3.bf16.msra.mxu0 %v5247_v55 }
0x10de   :  { %5691 = vmatpush3.bf16.msra.mxu1 %v5263_v6  ;;  %5670 = vmatprep.subr.bf16.mxu0 %v5256_v19 }
0x10df   :  { %5692 = vmatprep.subr.bf16.mxu1 %v5272_v22 }
0x10e1   :  { %5671 = vmatpush3.bf16.msra.mxu0 %v5248_v38 }
0x10e2   :  { %5693 = vmatpush3.bf16.msra.mxu1 %v5264_v52  ;;  %5672 = vmatprep.subr.bf16.mxu0 %v5257_v25 }
0x10e3   :  { %5694 = vmatprep.subr.bf16.mxu1 %v5273_v21 }
0x10e5   :  { %5673 = vmatpush3.bf16.msra.mxu0 %v5249_v48 }
0x10e6   :  { %5695 = vmatpush3.bf16.msra.mxu1 %v5265_v29  ;;  %5674 = vmatprep.subr.bf16.mxu0 %v5258_v39 }
0x10e7   :  { %5696 = vmatprep.subr.bf16.mxu1 %v5274_v41 }
0x10e9   :  { %5675 = vmatpush3.bf16.msra.mxu0 %v5250_v18 }
0x10ea   :  { %5697 = vmatpush3.bf16.msra.mxu1 %v5266_v31  ;;  %5676 = vmatprep.subr.bf16.mxu0 %v5259_v51 }
0x10eb   :  { %5698 = vmatprep.subr.bf16.mxu1 %v5275_v15 }
0x10ed   :  { %5677 = vmatpush3.bf16.msra.mxu0 %v5251_v60 }
0x10ee   :  { %5699 = vmatpush3.bf16.msra.mxu1 %v5267_v53 }
0x10f0   :  { %5316 = vmatmul.mubr.bf16.vlgmr.msra.gmra.mrb[40].mxu0 %v8369_v7 }
0x10f1   :  { %5356 = vmatmul.mubr.bf16.vlgmr.msra.gmra.mrb[60].mxu1 %v8371_v45 }
0x11c3   :  { %v5678_v61 = vpop.f32.mrb[40].mxu0 }
0x11c4   :  { %v5700_v63 = vpop.f32.mrb[60].mxu1  ;;  %v5679_v3 = vpop.f32.mrb[41].mxu0 }
0x11c5   :  { %v5701_v5 = vpop.f32.mrb[61].mxu1  ;;  %v5680_v11 = vadd.f32 %v5679_v3, %v5678_v61  ;;  %v5681_v10 = vpop.f32.mrb[42].mxu0 }
0x11c6   :  { %v5702_v26 = vadd.f32 %v5701_v5, %v5700_v63  ;;  %v5703_v16 = vpop.f32.mrb[62].mxu1  ;;  %v5682_v40 = vpop.f32.mrb[43].mxu0 }
0x11c7   :  { %v5704_v56 = vpop.f32.mrb[63].mxu1  ;;  %v5318_v9 = vadd.f32 %v5680_v11, %v5488_v2 }
0x11c9   :  { %v5358_v34 = vadd.f32 %v5702_v26, %v5318_v9 }
0x11cb   :  { %5363 = vst [vmem:[%s8429_s10] sm:$0xf] %v5358_v34 }
0x11cc   :  { %5368 = vsyncpa [#allocation7], 1 }
0x11cd   :  { %5369 = vsyncpa [#allocation9], 1 }
0x11ce   :  { %5370 = vsyncpa [#allocation12], 1 }
0x11cf   :  { %5371 = vsyncpa [#allocation15], 1 }
0x11d0   :  { %5372 = vsyncpa [#allocation18], 1 }
0x11d1   :  { %5373 = vsyncpa [#allocation21], 1 }
0x11d2   :  { %5374 = vsyncpa [#allocation24], 1 }
0x11d3   :  { %5375 = vsyncpa [#allocation27], 1 }
0x11d4   :  { %5376 = vsyncpa [#allocation30], 1 }
0x11d5   :  { %5377 = vsyncpa [#allocation33], 1 }
0x11d6   :  { %5378 = vsyncmov [#allocation5] }
0x11d9   :  { %s5379_s14 = vpop.sfrf %5378 }
0x11da   :  { %p5489_p6 = scmp.ne.s32.totalorder %s5379_s14, 0 }
0x11dc   :  { %5383 = shalt.err (%p5489_p6)  }
0x11dd   :  { %5385 = vsyncmov [#allocation5 + $0x1] }
0x11e0   :  { %s5386_s29 = vpop.sfrf %5385 }
0x11e1   :  { %p5490_p7 = scmp.ne.s32.totalorder %s5386_s29, 0 }
0x11e3   :  { %5390 = shalt.err (%p5490_p7)  }
0x11e4   :  { %5392 = vsyncmov [#allocation5 + $0x2] }
0x11e7   :  { %s5393_s5 = vpop.sfrf %5392 }
0x11e8   :  { %p5491_p8 = scmp.ne.s32.totalorder %s5393_s5, 0 }
0x11ea   :  { %5397 = shalt.err (%p5491_p8)  }

</bundles_post_ra>
